<compile_context>
chip_gen: v7x
topology: tpu7x:2x2x1
jax: 0.10.0
libtpu: 0.0.40
codegen_flags: <defaults>
</compile_context>

<pallas_src>
import math

import jax
import jax.numpy as jnp
from jax.experimental import pallas as pl
from jax.experimental.pallas import tpu as pltpu

_EPS = 1e-5
_SUB = 16          # channel (sublane) padding -> bf16-friendly tiles
_LANE = 128        # lane width; N*H*W must be a multiple of this


def _ceil_to(x, m):
    return ((x + m - 1) // m) * m


# ---------------------------------------------------------------------------
# Pallas kernels
# ---------------------------------------------------------------------------

def _build_conv_bn_kernel(act, emit_bn0, inv_m):
    """conv (tap-accumulated matmul) + BatchNorm(batch stats) + activation.

    Grid axis 0 iterates over the k*k conv taps (reduction, "arbitrary").
    The f32 accumulator lives in VMEM scratch; BN + activation are applied
    in the epilogue of the last tap.  If `emit_bn0`, a second output holds
    the BatchNorm-normalized activation (== bn_1 applied to this channel
    slice of the concatenation).
    """

    def _bn(y):                                   # gamma=1, beta=0 (default init)
        mean = jnp.sum(y, axis=1, keepdims=True) * inv_m
        ctr = y - mean
        var = jnp.sum(ctr * ctr, axis=1, keepdims=True) * inv_m
        return ctr * jax.lax.rsqrt(var + _EPS)

    def body(x_ref, w_ref, o_ref, o2_ref, acc_ref):
        t = pl.program_id(0)

        @pl.when(t == 0)
        def _():
            acc_ref[...] = jnp.zeros_like(acc_ref)

        # bf16 MXU matmul, f32 accumulation: [Cout_p, Cin_p] @ [Cin_p, M]
        acc_ref[...] += jnp.dot(w_ref[...], x_ref[...],
                                preferred_element_type=jnp.float32)

        @pl.when(t == pl.num_programs(0) - 1)
        def _():
            y = _bn(acc_ref[...])
            if act == "relu":
                y = jnp.maximum(y, 0.0)
            elif act == "tanh":
                y = jnp.tanh(y)
            o_ref[...] = y.astype(o_ref.dtype)
            if emit_bn0:
                o2_ref[...] = _bn(y).astype(o2_ref.dtype)

    if emit_bn0:
        return body

    def body_single(x_ref, w_ref, o_ref, acc_ref):
        body(x_ref, w_ref, o_ref, None, acc_ref)

    return body_single


def _build_sum_relu_bn_kernel(inv_m):
    """bn_2(relu(shortcut + out + out_2)) fused: 3 reads, 1 write."""

    def body(s_ref, a_ref, b_ref, o_ref):
        y = (s_ref[...].astype(jnp.float32)
             + a_ref[...].astype(jnp.float32)
             + b_ref[...].astype(jnp.float32))
        y = jnp.maximum(y, 0.0)
        mean = jnp.sum(y, axis=1, keepdims=True) * inv_m
        ctr = y - mean
        var = jnp.sum(ctr * ctr, axis=1, keepdims=True) * inv_m
        o_ref[...] = (ctr * jax.lax.rsqrt(var + _EPS)).astype(o_ref.dtype)

    return body


# ---------------------------------------------------------------------------
# Wrappers (JAX glue, all under one top-level jit)
# ---------------------------------------------------------------------------

def _conv_taps(x, k):
    """x: [Cp, N, H, W] bf16 -> tap-stacked input [k*k, Cp, N*H*W] bf16.

    Reflection padding matches PyTorch Conv2dSame (ka = k//2, kb = ka for odd k).
    """
    Cp, N, H, W = x.shape
    M = N * H * W
    if k == 1:
        return x.reshape(1, Cp, M)
    ka = k // 2
    kb = ka - 1 if k % 2 == 0 else ka
    xp = jnp.pad(x, ((0, 0), (0, 0), (ka, kb), (ka, kb)), mode="reflect")
    taps = [xp[:, :, kh:kh + H, kw:kw + W].reshape(Cp, M)
            for kh in range(k) for kw in range(k)]
    return jnp.stack(taps, axis=0)


def conv_bn_act(x, w, act=None, emit_bn0=False):
    """Fused 'same' conv (no bias) + BatchNorm (batch stats) + activation.

    x: [Cin_p, N, H, W] bf16, channel-padded (padded channels must be zero).
    w: [Cout, Cin, k, k] f32 (PyTorch layout).
    Returns [Cout_p, N, H, W] bf16 (plus the bn_1-normalized copy if emit_bn0).
    """
    Cin_p, N, H, W = x.shape
    M = N * H * W
    assert M % _LANE == 0, "N*H*W must be a multiple of 128"
    cout, cin, k, _ = w.shape
    assert cin <= Cin_p
    cout_p = _ceil_to(cout, _SUB)
    T = k * k

    taps = _conv_taps(x, k)                                   # [T, Cin_p, M] bf16
    wt = jnp.transpose(w, (2, 3, 0, 1)).reshape(T, cout, cin)
    wt = jnp.pad(wt, ((0, 0), (0, cout_p - cout), (0, Cin_p - cin)))
    wt = wt.astype(jnp.bfloat16)                              # [T, Cout_p, Cin_p]

    kern = _build_conv_bn_kernel(act, emit_bn0, 1.0 / M)
    blk = pl.BlockSpec((cout_p, M), lambda t: (0, 0))
    shp = jax.ShapeDtypeStruct((cout_p, M), jnp.bfloat16)
    out_shape = (shp, shp) if emit_bn0 else shp
    out_specs = (blk, blk) if emit_bn0 else blk

    res = pl.pallas_call(
        kern,
        grid=(T,),
        in_specs=[pl.BlockSpec((None, Cin_p, M), lambda t: (t, 0, 0)),
                  pl.BlockSpec((None, cout_p, Cin_p), lambda t: (t, 0, 0))],
        out_specs=out_specs,
        out_shape=out_shape,
        scratch_shapes=[pltpu.VMEM((cout_p, M), jnp.float32)],
        compiler_params=pltpu.CompilerParams(
            dimension_semantics=("arbitrary",)),
    )(taps, wt)

    if emit_bn0:
        y, y_bn = res
        return y.reshape(cout_p, N, H, W), y_bn.reshape(cout_p, N, H, W)
    return res.reshape(cout_p, N, H, W)


def sum_relu_bn(shortcut, out1, out2):
    """Fused bn_2(relu(shortcut + out1 + out2)) over [C_p, M]."""
    C_p, M = shortcut.shape
    kern = _build_sum_relu_bn_kernel(1.0 / M)
    return pl.pallas_call(
        kern,
        out_shape=jax.ShapeDtypeStruct((C_p, M), jnp.float32),
    )(shortcut, out1, out2)


# ---------------------------------------------------------------------------
# DCBlock parameters + forward
# ---------------------------------------------------------------------------

def dc_channels(u, alpha=1.67):
    w = alpha * u
    return int(w * 0.167), int(w * 0.333), int(w * 0.5)


def init_dcblock(key, in_channels, u, alpha=1.67):
    c1, c2, c3 = dc_channels(u, alpha)
    oc = c1 + c2 + c3

    def conv(k_, cout, cin, ksz):
        bound = 1.0 / math.sqrt(cin * ksz * ksz)
        return jax.random.uniform(k_, (cout, cin, ksz, ksz), jnp.float32,
                                  -bound, bound)

    ks = jax.random.split(key, 7)
    params = dict(
        shortcut=conv(ks[0], oc, in_channels, 1),
        c3a=conv(ks[1], c1, in_channels, 3),
        c5a=conv(ks[2], c2, c1, 3),
        c7a=conv(ks[3], c3, c2, 3),
        c3b=conv(ks[4], c1, in_channels, 3),
        c5b=conv(ks[5], c2, c1, 3),
        c7b=conv(ks[6], c3, c2, 3),
    )
    return params, (c1, c2, c3)


def dcblock_fwd(params, x_nchw):
    """DCBlock.forward (use_dropout=False).  x_nchw: [N, Cin, H, W] f32."""
    # TODO(synk): dropout branch (use_dropout=True) not implemented (default off).
    N, Cin, H, W = x_nchw.shape
    M = N * H * W
    c1 = params["c3a"].shape[0]
    c2 = params["c5a"].shape[0]
    c3 = params["c7a"].shape[0]
    oc = c1 + c2 + c3
    oc_p = _ceil_to(oc, _SUB)
    cin_p = _ceil_to(Cin, _SUB)

    # -> channel-major, lane-dense layout [C_pad, N, H, W]; zero channel pad.
    x = jnp.transpose(x_nchw, (1, 0, 2, 3)).astype(jnp.bfloat16)
    x = jnp.pad(x, ((0, cin_p - Cin), (0, 0), (0, 0), (0, 0)))

    shortcut = conv_bn_act(x, params["shortcut"], act=None, emit_bn0=False)

    a3, a3n = conv_bn_act(x,  params["c3a"], act="relu", emit_bn0=True)
    a5, a5n = conv_bn_act(a3, params["c5a"], act="relu", emit_bn0=True)
    _,  a7n = conv_bn_act(a5, params["c7a"], act="relu", emit_bn0=True)

    b3, b3n = conv_bn_act(x,  params["c3b"], act="relu", emit_bn0=True)
    b5, b5n = conv_bn_act(b3, params["c5b"], act="relu", emit_bn0=True)
    _,  b7n = conv_bn_act(b5, params["c7b"], act="relu", emit_bn0=True)

    # bn_1 / bn_1_2 of the channel concat == concat of the per-piece BN
    # (BatchNorm is per-channel) -- already emitted by the conv kernels.
    def cat_pad(p1, p2, p3):
        cat = jnp.concatenate([p1[:c1], p2[:c2], p3[:c3]], axis=0)
        cat = jnp.pad(cat, ((0, oc_p - oc), (0, 0), (0, 0), (0, 0)))
        return cat.reshape(oc_p, M)

    out = cat_pad(a3n, a5n, a7n)
    out_2 = cat_pad(b3n, b5n, b7n)
    sc = shortcut.reshape(oc_p, M)

    y = sum_relu_bn(sc, out, out_2)          # bn_2(relu(shortcut + out + out_2))
    y = y[:oc].reshape(oc, N, H, W)
    return jnp.transpose(y, (1, 0, 2, 3))    # back to NCHW


# ---------------------------------------------------------------------------

if __name__ == "__main__":
    # Small shapes: batch=2, in_channels=4, 16x16 spatial (N*H*W = 512 lanes),
    # u=32 -> DCBlock channels (8, 17, 26), out_channel = 51.
    N, C_in, H, W = 2, 4, 16, 16
    u = 32

    key = jax.random.PRNGKey(0)
    kx, kp = jax.random.split(key)
    x = jax.random.normal(kx, (N, C_in, H, W), jnp.float32)
    params, (c1, c2, c3) = init_dcblock(kp, C_in, u)
    oc = c1 + c2 + c3

    fwd = jax.jit(dcblock_fwd)
    out = jax.block_until_ready(fwd(params, x))

    assert out.shape == (N, oc, H, W), out.shape
    assert bool(jnp.all(jnp.isfinite(out)))
    print("KERNEL_OK")
</pallas_src>

<mosaic_0001>
module attributes {stable_mosaic.version = 11 : i64} {
  func.func @body(%arg0: i32, %arg1: memref<1x16x512xbf16, #tpu.memory_space<vmem>>, %arg2: memref<1x16x16xbf16, #tpu.memory_space<vmem>>, %arg3: memref<16x512xbf16, #tpu.memory_space<vmem>>, %arg4: memref<16x512xbf16, #tpu.memory_space<vmem>>, %arg5: memref<16x512xf32, #tpu.memory_space<vmem>>) attributes {dimension_semantics = [#tpu.dimension_semantics<arbitrary>], iteration_bounds = array<i64: 9>, scalar_prefetch = 0 : i64, scratch_operands = 1 : i64, tpu.core_type = #tpu.core_type<tc>, window_params = [{transform_indices = @transform_0, window_bounds = array<i64: 1, 16, 512>}, {transform_indices = @transform_1, window_bounds = array<i64: 1, 16, 16>}, {pipeline_mode = #tpu.pipeline_mode<synchronous>, transform_indices = @transform_2, window_bounds = array<i64: 16, 512>}, {pipeline_mode = #tpu.pipeline_mode<synchronous>, transform_indices = @transform_3, window_bounds = array<i64: 16, 512>}]} {
    %c0_i32 = arith.constant 0 : i32
    %0 = arith.cmpi eq, %arg0, %c0_i32 : i32
    %1 = arith.extui %0 : i1 to i32
    %c0_i32_0 = arith.constant 0 : i32
    %2 = arith.cmpi ne, %1, %c0_i32_0 : i32
    scf.if %2 {
      %cst_11 = arith.constant 0.000000e+00 : f32
      %14 = vector.broadcast %cst_11 : f32 to vector<16x512xf32>
      %c0_12 = arith.constant 0 : index
      %c0_13 = arith.constant 0 : index
      %15 = vector.load %arg5[%c0_12, %c0_13] : memref<16x512xf32, #tpu.memory_space<vmem>>, vector<16x512xf32>
      tpu.vector_store %arg5[%c0_12, %c0_13], %14 {strides = array<i32>} : memref<16x512xf32, #tpu.memory_space<vmem>>, vector<16x512xf32>,
    } else {
    }
    %c0 = arith.constant 0 : index
    %c0_1 = arith.constant 0 : index
    %3 = vector.load %arg5[%c0, %c0_1] : memref<16x512xf32, #tpu.memory_space<vmem>>, vector<16x512xf32>
    %c0_2 = arith.constant 0 : index
    %c0_3 = arith.constant 0 : index
    %c0_4 = arith.constant 0 : index
    %4 = vector.load %arg2[%c0_2, %c0_3, %c0_4] : memref<1x16x16xbf16, #tpu.memory_space<vmem>>, vector<1x16x16xbf16>
    %5 = vector.shape_cast %4 : vector<1x16x16xbf16> to vector<16x16xbf16>
    %c0_5 = arith.constant 0 : index
    %c0_6 = arith.constant 0 : index
    %c0_7 = arith.constant 0 : index
    %6 = vector.load %arg1[%c0_5, %c0_6, %c0_7] : memref<1x16x512xbf16, #tpu.memory_space<vmem>>, vector<1x16x512xbf16>
    %7 = vector.shape_cast %6 : vector<1x16x512xbf16> to vector<16x512xbf16>
    %cst = arith.constant dense<0.000000e+00> : vector<16x512xf32>
    %8 = tpu.matmul %5, %7, %cst {dimension_numbers = #tpu.dot_dimension_numbers<[1], [0], [0], [1], [0, 0, 1, 1], [], []>} : vector<16x16xbf16>, vector<16x512xbf16>, vector<16x512xf32> -> vector<16x512xf32>
    %9 = arith.addf %3, %8 : vector<16x512xf32>
    %c0_8 = arith.constant 0 : index
    %c0_9 = arith.constant 0 : index
    %10 = vector.load %arg5[%c0_8, %c0_9] : memref<16x512xf32, #tpu.memory_space<vmem>>, vector<16x512xf32>
    tpu.vector_store %arg5[%c0_8, %c0_9], %9 {strides = array<i32>} : memref<16x512xf32, #tpu.memory_space<vmem>>, vector<16x512xf32>,
    %c8_i32 = arith.constant 8 : i32
    %11 = arith.cmpi eq, %arg0, %c8_i32 : i32
    %12 = arith.extui %11 : i1 to i32
    %c0_i32_10 = arith.constant 0 : i32
    %13 = arith.cmpi ne, %12, %c0_i32_10 : i32
    scf.if %13 {
      %c0_11 = arith.constant 0 : index
      %c0_12 = arith.constant 0 : index
      %14 = vector.load %arg5[%c0_11, %c0_12] : memref<16x512xf32, #tpu.memory_space<vmem>>, vector<16x512xf32>
      %cst_13 = arith.constant dense<0.000000e+00> : vector<16xf32>
      %15 = vector.multi_reduction <add>, %14, %cst_13 [1] : vector<16x512xf32> to vector<16xf32>
      %16 = vector.shape_cast %15 : vector<16xf32> to vector<16x1xf32>
      %cst_14 = arith.constant 0.001953125 : f32
      %17 = vector.broadcast %cst_14 : f32 to vector<16x1xf32>
      %18 = arith.mulf %16, %17 : vector<16x1xf32>
      %19 = vector.broadcast %18 : vector<16x1xf32> to vector<16x512xf32>
      %20 = arith.subf %14, %19 : vector<16x512xf32>
      %21 = arith.mulf %20, %20 : vector<16x512xf32>
      %cst_15 = arith.constant dense<0.000000e+00> : vector<16xf32>
      %22 = vector.multi_reduction <add>, %21, %cst_15 [1] : vector<16x512xf32> to vector<16xf32>
      %23 = vector.shape_cast %22 : vector<16xf32> to vector<16x1xf32>
      %cst_16 = arith.constant 0.001953125 : f32
      %24 = vector.broadcast %cst_16 : f32 to vector<16x1xf32>
      %25 = arith.mulf %23, %24 : vector<16x1xf32>
      %cst_17 = arith.constant 9.99999974E-6 : f32
      %26 = vector.broadcast %cst_17 : f32 to vector<16x1xf32>
      %27 = arith.addf %25, %26 : vector<16x1xf32>
      %28 = math.rsqrt %27 : vector<16x1xf32>
      %29 = vector.broadcast %28 : vector<16x1xf32> to vector<16x512xf32>
      %30 = arith.mulf %20, %29 : vector<16x512xf32>
      %cst_18 = arith.constant 0.000000e+00 : f32
      %31 = vector.broadcast %cst_18 : f32 to vector<16x512xf32>
      %32 = arith.maximumf %30, %31 : vector<16x512xf32>
      %33 = arith.truncf %32 : vector<16x512xf32> to vector<16x512xbf16>
      %c0_19 = arith.constant 0 : index
      %c0_20 = arith.constant 0 : index
      %34 = vector.load %arg3[%c0_19, %c0_20] : memref<16x512xbf16, #tpu.memory_space<vmem>>, vector<16x512xbf16>
      tpu.vector_store %arg3[%c0_19, %c0_20], %33 {strides = array<i32>} : memref<16x512xbf16, #tpu.memory_space<vmem>>, vector<16x512xbf16>,
      %cst_21 = arith.constant dense<0.000000e+00> : vector<16xf32>
      %35 = vector.multi_reduction <add>, %32, %cst_21 [1] : vector<16x512xf32> to vector<16xf32>
      %36 = vector.shape_cast %35 : vector<16xf32> to vector<16x1xf32>
      %cst_22 = arith.constant 0.001953125 : f32
      %37 = vector.broadcast %cst_22 : f32 to vector<16x1xf32>
      %38 = arith.mulf %36, %37 : vector<16x1xf32>
      %39 = vector.broadcast %38 : vector<16x1xf32> to vector<16x512xf32>
      %40 = arith.subf %32, %39 : vector<16x512xf32>
      %41 = arith.mulf %40, %40 : vector<16x512xf32>
      %cst_23 = arith.constant dense<0.000000e+00> : vector<16xf32>
      %42 = vector.multi_reduction <add>, %41, %cst_23 [1] : vector<16x512xf32> to vector<16xf32>
      %43 = vector.shape_cast %42 : vector<16xf32> to vector<16x1xf32>
      %cst_24 = arith.constant 0.001953125 : f32
      %44 = vector.broadcast %cst_24 : f32 to vector<16x1xf32>
      %45 = arith.mulf %43, %44 : vector<16x1xf32>
      %cst_25 = arith.constant 9.99999974E-6 : f32
      %46 = vector.broadcast %cst_25 : f32 to vector<16x1xf32>
      %47 = arith.addf %45, %46 : vector<16x1xf32>
      %48 = math.rsqrt %47 : vector<16x1xf32>
      %49 = vector.broadcast %48 : vector<16x1xf32> to vector<16x512xf32>
      %50 = arith.mulf %40, %49 : vector<16x512xf32>
      %51 = arith.truncf %50 : vector<16x512xf32> to vector<16x512xbf16>
      %c0_26 = arith.constant 0 : index
      %c0_27 = arith.constant 0 : index
      %52 = vector.load %arg4[%c0_26, %c0_27] : memref<16x512xbf16, #tpu.memory_space<vmem>>, vector<16x512xbf16>
      tpu.vector_store %arg4[%c0_26, %c0_27], %51 {strides = array<i32>} : memref<16x512xbf16, #tpu.memory_space<vmem>>, vector<16x512xbf16>,
    } else {
    }
    return
  }
  func.func @transform_0(%arg0: i32) -> (i32, i32, i32) {
    %c0_i32 = arith.constant 0 : i32
    %c0_i32_0 = arith.constant 0 : i32
    %c0_i32_1 = arith.constant 0 : i32
    return %arg0, %c0_i32, %c0_i32_0 : i32, i32, i32
  }
  func.func @transform_1(%arg0: i32) -> (i32, i32, i32) {
    %c0_i32 = arith.constant 0 : i32
    %c0_i32_0 = arith.constant 0 : i32
    %c0_i32_1 = arith.constant 0 : i32
    return %arg0, %c0_i32, %c0_i32_0 : i32, i32, i32
  }
  func.func @transform_2(%arg0: i32) -> (i32, i32) {
    %c0_i32 = arith.constant 0 : i32
    %c0_i32_0 = arith.constant 0 : i32
    %c0_i32_1 = arith.constant 0 : i32
    return %c0_i32, %c0_i32_0 : i32, i32
  }
  func.func @transform_3(%arg0: i32) -> (i32, i32) {
    %c0_i32 = arith.constant 0 : i32
    %c0_i32_0 = arith.constant 0 : i32
    %c0_i32_1 = arith.constant 0 : i32
    return %c0_i32, %c0_i32_0 : i32, i32
  }
}

module attributes {stable_mosaic.version = 11 : i64} {
  func.func @body(%arg0: i32, %arg1: memref<1x16x512xbf16, #tpu.memory_space<vmem>>, %arg2: memref<1x32x16xbf16, #tpu.memory_space<vmem>>, %arg3: memref<32x512xbf16, #tpu.memory_space<vmem>>, %arg4: memref<32x512xbf16, #tpu.memory_space<vmem>>, %arg5: memref<32x512xf32, #tpu.memory_space<vmem>>) attributes {dimension_semantics = [#tpu.dimension_semantics<arbitrary>], iteration_bounds = array<i64: 9>, scalar_prefetch = 0 : i64, scratch_operands = 1 : i64, tpu.core_type = #tpu.core_type<tc>, window_params = [{transform_indices = @transform_0, window_bounds = array<i64: 1, 16, 512>}, {transform_indices = @transform_1, window_bounds = array<i64: 1, 32, 16>}, {pipeline_mode = #tpu.pipeline_mode<synchronous>, transform_indices = @transform_2, window_bounds = array<i64: 32, 512>}, {pipeline_mode = #tpu.pipeline_mode<synchronous>, transform_indices = @transform_3, window_bounds = array<i64: 32, 512>}]} {
    %c0_i32 = arith.constant 0 : i32
    %0 = arith.cmpi eq, %arg0, %c0_i32 : i32
    %1 = arith.extui %0 : i1 to i32
    %c0_i32_0 = arith.constant 0 : i32
    %2 = arith.cmpi ne, %1, %c0_i32_0 : i32
    scf.if %2 {
      %cst_11 = arith.constant 0.000000e+00 : f32
      %14 = vector.broadcast %cst_11 : f32 to vector<32x512xf32>
      %c0_12 = arith.constant 0 : index
      %c0_13 = arith.constant 0 : index
      %15 = vector.load %arg5[%c0_12, %c0_13] : memref<32x512xf32, #tpu.memory_space<vmem>>, vector<32x512xf32>
      tpu.vector_store %arg5[%c0_12, %c0_13], %14 {strides = array<i32>} : memref<32x512xf32, #tpu.memory_space<vmem>>, vector<32x512xf32>,
    } else {
    }
    %c0 = arith.constant 0 : index
    %c0_1 = arith.constant 0 : index
    %3 = vector.load %arg5[%c0, %c0_1] : memref<32x512xf32, #tpu.memory_space<vmem>>, vector<32x512xf32>
    %c0_2 = arith.constant 0 : index
    %c0_3 = arith.constant 0 : index
    %c0_4 = arith.constant 0 : index
    %4 = vector.load %arg2[%c0_2, %c0_3, %c0_4] : memref<1x32x16xbf16, #tpu.memory_space<vmem>>, vector<1x32x16xbf16>
    %5 = vector.shape_cast %4 : vector<1x32x16xbf16> to vector<32x16xbf16>
    %c0_5 = arith.constant 0 : index
    %c0_6 = arith.constant 0 : index
    %c0_7 = arith.constant 0 : index
    %6 = vector.load %arg1[%c0_5, %c0_6, %c0_7] : memref<1x16x512xbf16, #tpu.memory_space<vmem>>, vector<1x16x512xbf16>
    %7 = vector.shape_cast %6 : vector<1x16x512xbf16> to vector<16x512xbf16>
    %cst = arith.constant dense<0.000000e+00> : vector<32x512xf32>
    %8 = tpu.matmul %5, %7, %cst {dimension_numbers = #tpu.dot_dimension_numbers<[1], [0], [0], [1], [0, 0, 1, 1], [], []>} : vector<32x16xbf16>, vector<16x512xbf16>, vector<32x512xf32> -> vector<32x512xf32>
    %9 = arith.addf %3, %8 : vector<32x512xf32>
    %c0_8 = arith.constant 0 : index
    %c0_9 = arith.constant 0 : index
    %10 = vector.load %arg5[%c0_8, %c0_9] : memref<32x512xf32, #tpu.memory_space<vmem>>, vector<32x512xf32>
    tpu.vector_store %arg5[%c0_8, %c0_9], %9 {strides = array<i32>} : memref<32x512xf32, #tpu.memory_space<vmem>>, vector<32x512xf32>,
    %c8_i32 = arith.constant 8 : i32
    %11 = arith.cmpi eq, %arg0, %c8_i32 : i32
    %12 = arith.extui %11 : i1 to i32
    %c0_i32_10 = arith.constant 0 : i32
    %13 = arith.cmpi ne, %12, %c0_i32_10 : i32
    scf.if %13 {
      %c0_11 = arith.constant 0 : index
      %c0_12 = arith.constant 0 : index
      %14 = vector.load %arg5[%c0_11, %c0_12] : memref<32x512xf32, #tpu.memory_space<vmem>>, vector<32x512xf32>
      %cst_13 = arith.constant dense<0.000000e+00> : vector<32xf32>
      %15 = vector.multi_reduction <add>, %14, %cst_13 [1] : vector<32x512xf32> to vector<32xf32>
      %16 = vector.shape_cast %15 : vector<32xf32> to vector<32x1xf32>
      %cst_14 = arith.constant 0.001953125 : f32
      %17 = vector.broadcast %cst_14 : f32 to vector<32x1xf32>
      %18 = arith.mulf %16, %17 : vector<32x1xf32>
      %19 = vector.broadcast %18 : vector<32x1xf32> to vector<32x512xf32>
      %20 = arith.subf %14, %19 : vector<32x512xf32>
      %21 = arith.mulf %20, %20 : vector<32x512xf32>
      %cst_15 = arith.constant dense<0.000000e+00> : vector<32xf32>
      %22 = vector.multi_reduction <add>, %21, %cst_15 [1] : vector<32x512xf32> to vector<32xf32>
      %23 = vector.shape_cast %22 : vector<32xf32> to vector<32x1xf32>
      %cst_16 = arith.constant 0.001953125 : f32
      %24 = vector.broadcast %cst_16 : f32 to vector<32x1xf32>
      %25 = arith.mulf %23, %24 : vector<32x1xf32>
      %cst_17 = arith.constant 9.99999974E-6 : f32
      %26 = vector.broadcast %cst_17 : f32 to vector<32x1xf32>
      %27 = arith.addf %25, %26 : vector<32x1xf32>
      %28 = math.rsqrt %27 : vector<32x1xf32>
      %29 = vector.broadcast %28 : vector<32x1xf32> to vector<32x512xf32>
      %30 = arith.mulf %20, %29 : vector<32x512xf32>
      %cst_18 = arith.constant 0.000000e+00 : f32
      %31 = vector.broadcast %cst_18 : f32 to vector<32x512xf32>
      %32 = arith.maximumf %30, %31 : vector<32x512xf32>
      %33 = arith.truncf %32 : vector<32x512xf32> to vector<32x512xbf16>
      %c0_19 = arith.constant 0 : index
      %c0_20 = arith.constant 0 : index
      %34 = vector.load %arg3[%c0_19, %c0_20] : memref<32x512xbf16, #tpu.memory_space<vmem>>, vector<32x512xbf16>
      tpu.vector_store %arg3[%c0_19, %c0_20], %33 {strides = array<i32>} : memref<32x512xbf16, #tpu.memory_space<vmem>>, vector<32x512xbf16>,
      %cst_21 = arith.constant dense<0.000000e+00> : vector<32xf32>
      %35 = vector.multi_reduction <add>, %32, %cst_21 [1] : vector<32x512xf32> to vector<32xf32>
      %36 = vector.shape_cast %35 : vector<32xf32> to vector<32x1xf32>
      %cst_22 = arith.constant 0.001953125 : f32
      %37 = vector.broadcast %cst_22 : f32 to vector<32x1xf32>
      %38 = arith.mulf %36, %37 : vector<32x1xf32>
      %39 = vector.broadcast %38 : vector<32x1xf32> to vector<32x512xf32>
      %40 = arith.subf %32, %39 : vector<32x512xf32>
      %41 = arith.mulf %40, %40 : vector<32x512xf32>
      %cst_23 = arith.constant dense<0.000000e+00> : vector<32xf32>
      %42 = vector.multi_reduction <add>, %41, %cst_23 [1] : vector<32x512xf32> to vector<32xf32>
      %43 = vector.shape_cast %42 : vector<32xf32> to vector<32x1xf32>
      %cst_24 = arith.constant 0.001953125 : f32
      %44 = vector.broadcast %cst_24 : f32 to vector<32x1xf32>
      %45 = arith.mulf %43, %44 : vector<32x1xf32>
      %cst_25 = arith.constant 9.99999974E-6 : f32
      %46 = vector.broadcast %cst_25 : f32 to vector<32x1xf32>
      %47 = arith.addf %45, %46 : vector<32x1xf32>
      %48 = math.rsqrt %47 : vector<32x1xf32>
      %49 = vector.broadcast %48 : vector<32x1xf32> to vector<32x512xf32>
      %50 = arith.mulf %40, %49 : vector<32x512xf32>
      %51 = arith.truncf %50 : vector<32x512xf32> to vector<32x512xbf16>
      %c0_26 = arith.constant 0 : index
      %c0_27 = arith.constant 0 : index
      %52 = vector.load %arg4[%c0_26, %c0_27] : memref<32x512xbf16, #tpu.memory_space<vmem>>, vector<32x512xbf16>
      tpu.vector_store %arg4[%c0_26, %c0_27], %51 {strides = array<i32>} : memref<32x512xbf16, #tpu.memory_space<vmem>>, vector<32x512xbf16>,
    } else {
    }
    return
  }
  func.func @transform_0(%arg0: i32) -> (i32, i32, i32) {
    %c0_i32 = arith.constant 0 : i32
    %c0_i32_0 = arith.constant 0 : i32
    %c0_i32_1 = arith.constant 0 : i32
    return %arg0, %c0_i32, %c0_i32_0 : i32, i32, i32
  }
  func.func @transform_1(%arg0: i32) -> (i32, i32, i32) {
    %c0_i32 = arith.constant 0 : i32
    %c0_i32_0 = arith.constant 0 : i32
    %c0_i32_1 = arith.constant 0 : i32
    return %arg0, %c0_i32, %c0_i32_0 : i32, i32, i32
  }
  func.func @transform_2(%arg0: i32) -> (i32, i32) {
    %c0_i32 = arith.constant 0 : i32
    %c0_i32_0 = arith.constant 0 : i32
    %c0_i32_1 = arith.constant 0 : i32
    return %c0_i32, %c0_i32_0 : i32, i32
  }
  func.func @transform_3(%arg0: i32) -> (i32, i32) {
    %c0_i32 = arith.constant 0 : i32
    %c0_i32_0 = arith.constant 0 : i32
    %c0_i32_1 = arith.constant 0 : i32
    return %c0_i32, %c0_i32_0 : i32, i32
  }
}

module attributes {stable_mosaic.version = 11 : i64} {
  func.func @body(%arg0: i32, %arg1: memref<1x32x512xbf16, #tpu.memory_space<vmem>>, %arg2: memref<1x32x32xbf16, #tpu.memory_space<vmem>>, %arg3: memref<32x512xbf16, #tpu.memory_space<vmem>>, %arg4: memref<32x512xbf16, #tpu.memory_space<vmem>>, %arg5: memref<32x512xf32, #tpu.memory_space<vmem>>) attributes {dimension_semantics = [#tpu.dimension_semantics<arbitrary>], iteration_bounds = array<i64: 9>, scalar_prefetch = 0 : i64, scratch_operands = 1 : i64, tpu.core_type = #tpu.core_type<tc>, window_params = [{transform_indices = @transform_0, window_bounds = array<i64: 1, 32, 512>}, {transform_indices = @transform_1, window_bounds = array<i64: 1, 32, 32>}, {pipeline_mode = #tpu.pipeline_mode<synchronous>, transform_indices = @transform_2, window_bounds = array<i64: 32, 512>}, {pipeline_mode = #tpu.pipeline_mode<synchronous>, transform_indices = @transform_3, window_bounds = array<i64: 32, 512>}]} {
    %c0_i32 = arith.constant 0 : i32
    %0 = arith.cmpi eq, %arg0, %c0_i32 : i32
    %1 = arith.extui %0 : i1 to i32
    %c0_i32_0 = arith.constant 0 : i32
    %2 = arith.cmpi ne, %1, %c0_i32_0 : i32
    scf.if %2 {
      %cst_11 = arith.constant 0.000000e+00 : f32
      %14 = vector.broadcast %cst_11 : f32 to vector<32x512xf32>
      %c0_12 = arith.constant 0 : index
      %c0_13 = arith.constant 0 : index
      %15 = vector.load %arg5[%c0_12, %c0_13] : memref<32x512xf32, #tpu.memory_space<vmem>>, vector<32x512xf32>
      tpu.vector_store %arg5[%c0_12, %c0_13], %14 {strides = array<i32>} : memref<32x512xf32, #tpu.memory_space<vmem>>, vector<32x512xf32>,
    } else {
    }
    %c0 = arith.constant 0 : index
    %c0_1 = arith.constant 0 : index
    %3 = vector.load %arg5[%c0, %c0_1] : memref<32x512xf32, #tpu.memory_space<vmem>>, vector<32x512xf32>
    %c0_2 = arith.constant 0 : index
    %c0_3 = arith.constant 0 : index
    %c0_4 = arith.constant 0 : index
    %4 = vector.load %arg2[%c0_2, %c0_3, %c0_4] : memref<1x32x32xbf16, #tpu.memory_space<vmem>>, vector<1x32x32xbf16>
    %5 = vector.shape_cast %4 : vector<1x32x32xbf16> to vector<32x32xbf16>
    %c0_5 = arith.constant 0 : index
    %c0_6 = arith.constant 0 : index
    %c0_7 = arith.constant 0 : index
    %6 = vector.load %arg1[%c0_5, %c0_6, %c0_7] : memref<1x32x512xbf16, #tpu.memory_space<vmem>>, vector<1x32x512xbf16>
    %7 = vector.shape_cast %6 : vector<1x32x512xbf16> to vector<32x512xbf16>
    %cst = arith.constant dense<0.000000e+00> : vector<32x512xf32>
    %8 = tpu.matmul %5, %7, %cst {dimension_numbers = #tpu.dot_dimension_numbers<[1], [0], [0], [1], [0, 0, 1, 1], [], []>} : vector<32x32xbf16>, vector<32x512xbf16>, vector<32x512xf32> -> vector<32x512xf32>
    %9 = arith.addf %3, %8 : vector<32x512xf32>
    %c0_8 = arith.constant 0 : index
    %c0_9 = arith.constant 0 : index
    %10 = vector.load %arg5[%c0_8, %c0_9] : memref<32x512xf32, #tpu.memory_space<vmem>>, vector<32x512xf32>
    tpu.vector_store %arg5[%c0_8, %c0_9], %9 {strides = array<i32>} : memref<32x512xf32, #tpu.memory_space<vmem>>, vector<32x512xf32>,
    %c8_i32 = arith.constant 8 : i32
    %11 = arith.cmpi eq, %arg0, %c8_i32 : i32
    %12 = arith.extui %11 : i1 to i32
    %c0_i32_10 = arith.constant 0 : i32
    %13 = arith.cmpi ne, %12, %c0_i32_10 : i32
    scf.if %13 {
      %c0_11 = arith.constant 0 : index
      %c0_12 = arith.constant 0 : index
      %14 = vector.load %arg5[%c0_11, %c0_12] : memref<32x512xf32, #tpu.memory_space<vmem>>, vector<32x512xf32>
      %cst_13 = arith.constant dense<0.000000e+00> : vector<32xf32>
      %15 = vector.multi_reduction <add>, %14, %cst_13 [1] : vector<32x512xf32> to vector<32xf32>
      %16 = vector.shape_cast %15 : vector<32xf32> to vector<32x1xf32>
      %cst_14 = arith.constant 0.001953125 : f32
      %17 = vector.broadcast %cst_14 : f32 to vector<32x1xf32>
      %18 = arith.mulf %16, %17 : vector<32x1xf32>
      %19 = vector.broadcast %18 : vector<32x1xf32> to vector<32x512xf32>
      %20 = arith.subf %14, %19 : vector<32x512xf32>
      %21 = arith.mulf %20, %20 : vector<32x512xf32>
      %cst_15 = arith.constant dense<0.000000e+00> : vector<32xf32>
      %22 = vector.multi_reduction <add>, %21, %cst_15 [1] : vector<32x512xf32> to vector<32xf32>
      %23 = vector.shape_cast %22 : vector<32xf32> to vector<32x1xf32>
      %cst_16 = arith.constant 0.001953125 : f32
      %24 = vector.broadcast %cst_16 : f32 to vector<32x1xf32>
      %25 = arith.mulf %23, %24 : vector<32x1xf32>
      %cst_17 = arith.constant 9.99999974E-6 : f32
      %26 = vector.broadcast %cst_17 : f32 to vector<32x1xf32>
      %27 = arith.addf %25, %26 : vector<32x1xf32>
      %28 = math.rsqrt %27 : vector<32x1xf32>
      %29 = vector.broadcast %28 : vector<32x1xf32> to vector<32x512xf32>
      %30 = arith.mulf %20, %29 : vector<32x512xf32>
      %cst_18 = arith.constant 0.000000e+00 : f32
      %31 = vector.broadcast %cst_18 : f32 to vector<32x512xf32>
      %32 = arith.maximumf %30, %31 : vector<32x512xf32>
      %33 = arith.truncf %32 : vector<32x512xf32> to vector<32x512xbf16>
      %c0_19 = arith.constant 0 : index
      %c0_20 = arith.constant 0 : index
      %34 = vector.load %arg3[%c0_19, %c0_20] : memref<32x512xbf16, #tpu.memory_space<vmem>>, vector<32x512xbf16>
      tpu.vector_store %arg3[%c0_19, %c0_20], %33 {strides = array<i32>} : memref<32x512xbf16, #tpu.memory_space<vmem>>, vector<32x512xbf16>,
      %cst_21 = arith.constant dense<0.000000e+00> : vector<32xf32>
      %35 = vector.multi_reduction <add>, %32, %cst_21 [1] : vector<32x512xf32> to vector<32xf32>
      %36 = vector.shape_cast %35 : vector<32xf32> to vector<32x1xf32>
      %cst_22 = arith.constant 0.001953125 : f32
      %37 = vector.broadcast %cst_22 : f32 to vector<32x1xf32>
      %38 = arith.mulf %36, %37 : vector<32x1xf32>
      %39 = vector.broadcast %38 : vector<32x1xf32> to vector<32x512xf32>
      %40 = arith.subf %32, %39 : vector<32x512xf32>
      %41 = arith.mulf %40, %40 : vector<32x512xf32>
      %cst_23 = arith.constant dense<0.000000e+00> : vector<32xf32>
      %42 = vector.multi_reduction <add>, %41, %cst_23 [1] : vector<32x512xf32> to vector<32xf32>
      %43 = vector.shape_cast %42 : vector<32xf32> to vector<32x1xf32>
      %cst_24 = arith.constant 0.001953125 : f32
      %44 = vector.broadcast %cst_24 : f32 to vector<32x1xf32>
      %45 = arith.mulf %43, %44 : vector<32x1xf32>
      %cst_25 = arith.constant 9.99999974E-6 : f32
      %46 = vector.broadcast %cst_25 : f32 to vector<32x1xf32>
      %47 = arith.addf %45, %46 : vector<32x1xf32>
      %48 = math.rsqrt %47 : vector<32x1xf32>
      %49 = vector.broadcast %48 : vector<32x1xf32> to vector<32x512xf32>
      %50 = arith.mulf %40, %49 : vector<32x512xf32>
      %51 = arith.truncf %50 : vector<32x512xf32> to vector<32x512xbf16>
      %c0_26 = arith.constant 0 : index
      %c0_27 = arith.constant 0 : index
      %52 = vector.load %arg4[%c0_26, %c0_27] : memref<32x512xbf16, #tpu.memory_space<vmem>>, vector<32x512xbf16>
      tpu.vector_store %arg4[%c0_26, %c0_27], %51 {strides = array<i32>} : memref<32x512xbf16, #tpu.memory_space<vmem>>, vector<32x512xbf16>,
    } else {
    }
    return
  }
  func.func @transform_0(%arg0: i32) -> (i32, i32, i32) {
    %c0_i32 = arith.constant 0 : i32
    %c0_i32_0 = arith.constant 0 : i32
    %c0_i32_1 = arith.constant 0 : i32
    return %arg0, %c0_i32, %c0_i32_0 : i32, i32, i32
  }
  func.func @transform_1(%arg0: i32) -> (i32, i32, i32) {
    %c0_i32 = arith.constant 0 : i32
    %c0_i32_0 = arith.constant 0 : i32
    %c0_i32_1 = arith.constant 0 : i32
    return %arg0, %c0_i32, %c0_i32_0 : i32, i32, i32
  }
  func.func @transform_2(%arg0: i32) -> (i32, i32) {
    %c0_i32 = arith.constant 0 : i32
    %c0_i32_0 = arith.constant 0 : i32
    %c0_i32_1 = arith.constant 0 : i32
    return %c0_i32, %c0_i32_0 : i32, i32
  }
  func.func @transform_3(%arg0: i32) -> (i32, i32) {
    %c0_i32 = arith.constant 0 : i32
    %c0_i32_0 = arith.constant 0 : i32
    %c0_i32_1 = arith.constant 0 : i32
    return %c0_i32, %c0_i32_0 : i32, i32
  }
}

module attributes {stable_mosaic.version = 11 : i64} {
  func.func @body_single(%arg0: i32, %arg1: memref<1x16x512xbf16, #tpu.memory_space<vmem>>, %arg2: memref<1x64x16xbf16, #tpu.memory_space<vmem>>, %arg3: memref<64x512xbf16, #tpu.memory_space<vmem>>, %arg4: memref<64x512xf32, #tpu.memory_space<vmem>>) attributes {dimension_semantics = [#tpu.dimension_semantics<arbitrary>], iteration_bounds = array<i64: 1>, scalar_prefetch = 0 : i64, scratch_operands = 1 : i64, tpu.core_type = #tpu.core_type<tc>, window_params = [{transform_indices = @transform_0, window_bounds = array<i64: 1, 16, 512>}, {transform_indices = @transform_1, window_bounds = array<i64: 1, 64, 16>}, {pipeline_mode = #tpu.pipeline_mode<synchronous>, transform_indices = @transform_2, window_bounds = array<i64: 64, 512>}]} {
    %c0_i32 = arith.constant 0 : i32
    %0 = arith.cmpi eq, %arg0, %c0_i32 : i32
    %1 = arith.extui %0 : i1 to i32
    %c0_i32_0 = arith.constant 0 : i32
    %2 = arith.cmpi ne, %1, %c0_i32_0 : i32
    scf.if %2 {
      %cst_12 = arith.constant 0.000000e+00 : f32
      %14 = vector.broadcast %cst_12 : f32 to vector<64x512xf32>
      %c0_13 = arith.constant 0 : index
      %c0_14 = arith.constant 0 : index
      %15 = vector.load %arg4[%c0_13, %c0_14] : memref<64x512xf32, #tpu.memory_space<vmem>>, vector<64x512xf32>
      tpu.vector_store %arg4[%c0_13, %c0_14], %14 {strides = array<i32>} : memref<64x512xf32, #tpu.memory_space<vmem>>, vector<64x512xf32>,
    } else {
    }
    %c0 = arith.constant 0 : index
    %c0_1 = arith.constant 0 : index
    %3 = vector.load %arg4[%c0, %c0_1] : memref<64x512xf32, #tpu.memory_space<vmem>>, vector<64x512xf32>
    %c0_2 = arith.constant 0 : index
    %c0_3 = arith.constant 0 : index
    %c0_4 = arith.constant 0 : index
    %4 = vector.load %arg2[%c0_2, %c0_3, %c0_4] : memref<1x64x16xbf16, #tpu.memory_space<vmem>>, vector<1x64x16xbf16>
    %5 = vector.shape_cast %4 : vector<1x64x16xbf16> to vector<64x16xbf16>
    %c0_5 = arith.constant 0 : index
    %c0_6 = arith.constant 0 : index
    %c0_7 = arith.constant 0 : index
    %6 = vector.load %arg1[%c0_5, %c0_6, %c0_7] : memref<1x16x512xbf16, #tpu.memory_space<vmem>>, vector<1x16x512xbf16>
    %7 = vector.shape_cast %6 : vector<1x16x512xbf16> to vector<16x512xbf16>
    %cst = arith.constant dense<0.000000e+00> : vector<64x512xf32>
    %8 = tpu.matmul %5, %7, %cst {dimension_numbers = #tpu.dot_dimension_numbers<[1], [0], [0], [1], [0, 0, 1, 1], [], []>} : vector<64x16xbf16>, vector<16x512xbf16>, vector<64x512xf32> -> vector<64x512xf32>
    %9 = arith.addf %3, %8 : vector<64x512xf32>
    %c0_8 = arith.constant 0 : index
    %c0_9 = arith.constant 0 : index
    %10 = vector.load %arg4[%c0_8, %c0_9] : memref<64x512xf32, #tpu.memory_space<vmem>>, vector<64x512xf32>
    tpu.vector_store %arg4[%c0_8, %c0_9], %9 {strides = array<i32>} : memref<64x512xf32, #tpu.memory_space<vmem>>, vector<64x512xf32>,
    %c0_i32_10 = arith.constant 0 : i32
    %11 = arith.cmpi eq, %arg0, %c0_i32_10 : i32
    %12 = arith.extui %11 : i1 to i32
    %c0_i32_11 = arith.constant 0 : i32
    %13 = arith.cmpi ne, %12, %c0_i32_11 : i32
    scf.if %13 {
      %c0_12 = arith.constant 0 : index
      %c0_13 = arith.constant 0 : index
      %14 = vector.load %arg4[%c0_12, %c0_13] : memref<64x512xf32, #tpu.memory_space<vmem>>, vector<64x512xf32>
      %cst_14 = arith.constant dense<0.000000e+00> : vector<64xf32>
      %15 = vector.multi_reduction <add>, %14, %cst_14 [1] : vector<64x512xf32> to vector<64xf32>
      %16 = vector.shape_cast %15 : vector<64xf32> to vector<64x1xf32>
      %cst_15 = arith.constant 0.001953125 : f32
      %17 = vector.broadcast %cst_15 : f32 to vector<64x1xf32>
      %18 = arith.mulf %16, %17 : vector<64x1xf32>
      %19 = vector.broadcast %18 : vector<64x1xf32> to vector<64x512xf32>
      %20 = arith.subf %14, %19 : vector<64x512xf32>
      %21 = arith.mulf %20, %20 : vector<64x512xf32>
      %cst_16 = arith.constant dense<0.000000e+00> : vector<64xf32>
      %22 = vector.multi_reduction <add>, %21, %cst_16 [1] : vector<64x512xf32> to vector<64xf32>
      %23 = vector.shape_cast %22 : vector<64xf32> to vector<64x1xf32>
      %cst_17 = arith.constant 0.001953125 : f32
      %24 = vector.broadcast %cst_17 : f32 to vector<64x1xf32>
      %25 = arith.mulf %23, %24 : vector<64x1xf32>
      %cst_18 = arith.constant 9.99999974E-6 : f32
      %26 = vector.broadcast %cst_18 : f32 to vector<64x1xf32>
      %27 = arith.addf %25, %26 : vector<64x1xf32>
      %28 = math.rsqrt %27 : vector<64x1xf32>
      %29 = vector.broadcast %28 : vector<64x1xf32> to vector<64x512xf32>
      %30 = arith.mulf %20, %29 : vector<64x512xf32>
      %31 = arith.truncf %30 : vector<64x512xf32> to vector<64x512xbf16>
      %c0_19 = arith.constant 0 : index
      %c0_20 = arith.constant 0 : index
      %32 = vector.load %arg3[%c0_19, %c0_20] : memref<64x512xbf16, #tpu.memory_space<vmem>>, vector<64x512xbf16>
      tpu.vector_store %arg3[%c0_19, %c0_20], %31 {strides = array<i32>} : memref<64x512xbf16, #tpu.memory_space<vmem>>, vector<64x512xbf16>,
    } else {
    }
    return
  }
  func.func @transform_0(%arg0: i32) -> (i32, i32, i32) {
    %c0_i32 = arith.constant 0 : i32
    %c0_i32_0 = arith.constant 0 : i32
    %c0_i32_1 = arith.constant 0 : i32
    return %arg0, %c0_i32, %c0_i32_0 : i32, i32, i32
  }
  func.func @transform_1(%arg0: i32) -> (i32, i32, i32) {
    %c0_i32 = arith.constant 0 : i32
    %c0_i32_0 = arith.constant 0 : i32
    %c0_i32_1 = arith.constant 0 : i32
    return %arg0, %c0_i32, %c0_i32_0 : i32, i32, i32
  }
  func.func @transform_2(%arg0: i32) -> (i32, i32) {
    %c0_i32 = arith.constant 0 : i32
    %c0_i32_0 = arith.constant 0 : i32
    %c0_i32_1 = arith.constant 0 : i32
    return %c0_i32, %c0_i32_0 : i32, i32
  }
}

module attributes {stable_mosaic.version = 11 : i64} {
  func.func @body(%arg0: memref<64x512xbf16, #tpu.memory_space<vmem>>, %arg1: memref<64x512xbf16, #tpu.memory_space<vmem>>, %arg2: memref<64x512xbf16, #tpu.memory_space<vmem>>, %arg3: memref<64x512xf32, #tpu.memory_space<vmem>>) attributes {dimension_semantics = [], scalar_prefetch = 0 : i64, scratch_operands = 0 : i64, tpu.core_type = #tpu.core_type<tc>} {
    %c0 = arith.constant 0 : index
    %c0_0 = arith.constant 0 : index
    %0 = vector.load %arg0[%c0, %c0_0] : memref<64x512xbf16, #tpu.memory_space<vmem>>, vector<64x512xbf16>
    %1 = arith.extf %0 : vector<64x512xbf16> to vector<64x512xf32>
    %c0_1 = arith.constant 0 : index
    %c0_2 = arith.constant 0 : index
    %2 = vector.load %arg1[%c0_1, %c0_2] : memref<64x512xbf16, #tpu.memory_space<vmem>>, vector<64x512xbf16>
    %3 = arith.extf %2 : vector<64x512xbf16> to vector<64x512xf32>
    %4 = arith.addf %1, %3 : vector<64x512xf32>
    %c0_3 = arith.constant 0 : index
    %c0_4 = arith.constant 0 : index
    %5 = vector.load %arg2[%c0_3, %c0_4] : memref<64x512xbf16, #tpu.memory_space<vmem>>, vector<64x512xbf16>
    %6 = arith.extf %5 : vector<64x512xbf16> to vector<64x512xf32>
    %7 = arith.addf %4, %6 : vector<64x512xf32>
    %cst = arith.constant 0.000000e+00 : f32
    %8 = vector.broadcast %cst : f32 to vector<64x512xf32>
    %9 = arith.maximumf %7, %8 : vector<64x512xf32>
    %cst_5 = arith.constant dense<0.000000e+00> : vector<64xf32>
    %10 = vector.multi_reduction <add>, %9, %cst_5 [1] : vector<64x512xf32> to vector<64xf32>
    %11 = vector.shape_cast %10 : vector<64xf32> to vector<64x1xf32>
    %cst_6 = arith.constant 0.001953125 : f32
    %12 = vector.broadcast %cst_6 : f32 to vector<64x1xf32>
    %13 = arith.mulf %11, %12 : vector<64x1xf32>
    %14 = vector.broadcast %13 : vector<64x1xf32> to vector<64x512xf32>
    %15 = arith.subf %9, %14 : vector<64x512xf32>
    %16 = arith.mulf %15, %15 : vector<64x512xf32>
    %cst_7 = arith.constant dense<0.000000e+00> : vector<64xf32>
    %17 = vector.multi_reduction <add>, %16, %cst_7 [1] : vector<64x512xf32> to vector<64xf32>
    %18 = vector.shape_cast %17 : vector<64xf32> to vector<64x1xf32>
    %cst_8 = arith.constant 0.001953125 : f32
    %19 = vector.broadcast %cst_8 : f32 to vector<64x1xf32>
    %20 = arith.mulf %18, %19 : vector<64x1xf32>
    %cst_9 = arith.constant 9.99999974E-6 : f32
    %21 = vector.broadcast %cst_9 : f32 to vector<64x1xf32>
    %22 = arith.addf %20, %21 : vector<64x1xf32>
    %23 = math.rsqrt %22 : vector<64x1xf32>
    %24 = vector.broadcast %23 : vector<64x1xf32> to vector<64x512xf32>
    %25 = arith.mulf %15, %24 : vector<64x512xf32>
    %c0_10 = arith.constant 0 : index
    %c0_11 = arith.constant 0 : index
    %26 = vector.load %arg3[%c0_10, %c0_11] : memref<64x512xf32, #tpu.memory_space<vmem>>, vector<64x512xf32>
    tpu.vector_store %arg3[%c0_10, %c0_11], %25 {strides = array<i32>} : memref<64x512xf32, #tpu.memory_space<vmem>>, vector<64x512xf32>,
    return
  }
}

</mosaic_0001>

<bundles_post_ra>
// kernel: dcblock_fwd.12
= control target key start
LH: loop header
LB: loop body
LE: loop exit
PB: predicated region body
PF: predicated region fallthrough
CT: control target
= control target key end

     0   :  { %s650_s12 = smov 0   ;;  %s697_s0 = inlined_call_operand.vmem [shape: bf16[9,16,512], index: 0, kind: input, shape index: {}]   ;;  %s698_s1 = inlined_call_operand.vmem [shape: bf16[9,16,16], index: 1, kind: input, shape index: {}]   ;;  %s699_s2 = inlined_call_operand.vmem [shape: bf16[16,512], index: 2, kind: output, shape index: {0}]   ;;  %s700_s3 = inlined_call_operand.vmem [shape: bf16[16,512], index: 3, kind: output, shape index: {1}]  }
   0x1 LB: > { %s656_s13 = sadd.s32 4294967295, %s626_s12   ;;  %p561_p0 = scmp.ge.s32.totalorder %s626_s12, 1  ;;  %s626_s12 = sphi %s650_s12, %s14_s12  }
   0x2   : > { %p140_p1 = scmp.lt.s32.totalorder %s626_s12, 10 }
   0x4   : > { %p141_p2 = pnand %p561_p0, %p140_p1 }
   0x5   : > { %p164_p3 = scmp.lt.s32.totalorder (!%p141_p2), %s656_s13, 8  ;;  %p566_p4 = scmp.ne.s32.totalorder (!%p141_p2), %s656_s13, 0 }
   0x6   : > { %144 = sbr.rel (%p141_p2) target bundleno = 898 (0x382), region = 28 }
   0xd   : > { %s165_s14 = scalar_select %p164_p3, %s656_s13, 8 }
   0xe   : > { %178 = sbr.rel (%p566_p4) target bundleno = 21 (0x15), region = 32  ;;  %v628_v0 = vmov (!%p566_p4), 0.0  }
   0xf   : > { %s585_s15 = sshll.u32 %s165_s14, 5  ;;  %s586_s16 = sshll.u32 %s165_s14, 3  ;;  %179 = vst [vmem:[#allocation2] sm:$0xff] (!%p566_p4), %v628_v0  ;;  %180 = vst [vmem:[#allocation2 + $0x8] sm:$0xff] (!%p566_p4), %v628_v0 }
  0x10   : > { %s168_s19 = scalar_lea.vmem %s697_s0, %s585_s15  ;;  %s173_s22 = scalar_lea.vmem %s698_s1, %s586_s16  ;;  %181 = vst [vmem:[#allocation2 + $0x10] sm:$0xff] (!%p566_p4), %v628_v0  ;;  %182 = vst [vmem:[#allocation2 + $0x18] sm:$0xff] (!%p566_p4), %v628_v0 }
  0x11   : > { %183 = vst [vmem:[#allocation2 + $0x20] sm:$0xff] (!%p566_p4), %v628_v0  ;;  %184 = vst [vmem:[#allocation2 + $0x28] sm:$0xff] (!%p566_p4), %v628_v0 }
  0x12   : > { %185 = vst [vmem:[#allocation2 + $0x30] sm:$0xff] (!%p566_p4), %v628_v0  ;;  %186 = vst [vmem:[#allocation2 + $0x38] sm:$0xff] (!%p566_p4), %v628_v0 }
  0x15 PF: > { %v605_v1 = vld [vmem:[%s168_s19 + $0x4] ss:$16 sps:$4 sm:$0xff]   ;;  %v607_v2 = vld [vmem:[%s168_s19 + $0xc] ss:$16 sps:$4 sm:$0xff]   ;;  %v629_v3 = vmov 0   ;;  %vm226_vm0 = vcmask 130048  }
  0x16   : > { %262 = vmatprep.mubr.bf16.mxu0 %v629_v3  ;;  %305 = vmatprep.mubr.bf16.mxu1 %v629_v3  ;;  %v609_v4 = vld [vmem:[%s168_s19] ss:$16 sps:$4 sm:$0xff]   ;;  %v610_v5 = vld [vmem:[%s168_s19 + $0x8] ss:$16 sps:$4 sm:$0xff]   ;;  %p574_p5 = scmp.ne.s32.totalorder %s656_s13, 8 }
  0x17   : > { %230 = vmatprep.subr.bf16.mxu0 %v605_v1  ;;  %273 = vmatprep.subr.bf16.mxu1 %v607_v2  ;;  %v611_v6 = vld [vmem:[%s173_s22] sm:$0xff]   ;;  %v189_v8 = vld [vmem:[#allocation2 + $0x10] sm:$0xff]  ;;  %v188_v9 = vld [vmem:[#allocation2 + $0x8] sm:$0xff] }
  0x18   : > { %231 = vmatpush1.bf16.msra.mxu0 %v609_v4  ;;  %274 = vmatpush1.bf16.msra.mxu1 %v610_v5  ;;  %v187_v7 = vld [vmem:[#allocation2] sm:$0xff]  ;;  %v190_v10 = vld [vmem:[#allocation2 + $0x18] sm:$0xff]  ;;  %v192_v19 = vld [vmem:[#allocation2 + $0x28] sm:$0xff] }
  0x19   : > { %v191_v13 = vld [vmem:[#allocation2 + $0x20] sm:$0xff]  ;;  %v193_v14 = vld [vmem:[#allocation2 + $0x30] sm:$0xff]  ;;  %v194_v20 = vld [vmem:[#allocation2 + $0x38] sm:$0xff] }
  0x1b   : > { %572 = vmatmul.mubr.msk.bf16.vlgmr.msra.gmra.mrb[0].mxu0 %vm226_vm0, %v611_v6  ;;  %573 = vmatmul.mubr.msk.bf16.vlgmr.msra.gmra.mrb[0].mxu1 %vm226_vm0, %v611_v6 }
  0xee   : > { %v264_v11 = vpop.f32.mrb[0].mxu0  ;;  %v307_v12 = vpop.f32.mrb[0].mxu1  ;;  %335 = sbr.rel (%p574_p5) target bundleno = 898 (0x382), region = 36 }
  0xef   : > { %v316_v15 = vadd.f32 %v264_v11, %v187_v7  ;;  %v318_v16 = vadd.f32 %v307_v12, %v189_v8  ;;  %v266_v17 = vpop.f32.mrb[1].mxu0  ;;  %v309_v18 = vpop.f32.mrb[1].mxu1 }
  0xf0   : > { %v317_v21 = vadd.f32 %v266_v17, %v188_v9  ;;  %v319_v22 = vadd.f32 %v309_v18, %v190_v10  ;;  %v268_v23 = vpop.f32.mrb[2].mxu0  ;;  %v311_v24 = vpop.f32.mrb[2].mxu1 }
  0xf1   : > { %324 = vst [vmem:[#allocation2] sm:$0xff] %v316_v15  ;;  %326 = vst [vmem:[#allocation2 + $0x10] sm:$0xff] %v318_v16  ;;  %v320_v25 = vadd.f32 %v268_v23, %v191_v13  ;;  %v322_v26 = vadd.f32 %v311_v24, %v193_v14  ;;  %v270_v27 = vpop.f32.mrb[3].mxu0  ;;  %v313_v28 = vpop.f32.mrb[3].mxu1 }
  0xf2   : > { %325 = vst [vmem:[#allocation2 + $0x8] sm:$0xff] %v317_v21  ;;  %327 = vst [vmem:[#allocation2 + $0x18] sm:$0xff] %v319_v22  ;;  %v321_v29 = vadd.f32 %v270_v27, %v192_v19  ;;  %v323_v30 = vadd.f32 %v313_v28, %v194_v20 }
  0xf3   : > { %328 = vst [vmem:[#allocation2 + $0x20] sm:$0xff] %v320_v25  ;;  %330 = vst [vmem:[#allocation2 + $0x30] sm:$0xff] %v322_v26 }
  0xf4   : > { %329 = vst [vmem:[#allocation2 + $0x28] sm:$0xff] %v321_v29  ;;  %331 = vst [vmem:[#allocation2 + $0x38] sm:$0xff] %v323_v30 }
  0xf8   : > { %v336_v31 = vld [vmem:[#allocation2] sm:$0xff]  ;;  %v338_v33 = vld [vmem:[#allocation2 + $0x10] sm:$0xff] }
  0xf9   : > { %v337_v32 = vld [vmem:[#allocation2 + $0x8] sm:$0xff]  ;;  %v339_v37 = vld [vmem:[#allocation2 + $0x18] sm:$0xff] }
  0xfa   : > { %v344_v34 = vadd.f32 %v337_v32, %v336_v31  ;;  %v340_v35 = vld [vmem:[#allocation2 + $0x20] sm:$0xff]  ;;  %v342_v38 = vld [vmem:[#allocation2 + $0x30] sm:$0xff] }
  0xfb   : > { %v341_v36 = vld [vmem:[#allocation2 + $0x28] sm:$0xff]  ;;  %v343_v41 = vld [vmem:[#allocation2 + $0x38] sm:$0xff] }
  0xfc   : > { %v349_v39 = vadd.f32 %v341_v36, %v340_v35  ;;  %v345_v40 = vadd.f32 %v344_v34, %v338_v33 }
  0xfe   : > { %v350_v42 = vadd.f32 %v349_v39, %v342_v38  ;;  %v346_v43 = vadd.f32 %v345_v40, %v339_v37 }
 0x100   : > { %347 = vadd.xlane.f32.xlu0 %v346_v43  ;;  %v351_v44 = vadd.f32 %v350_v42, %v343_v41 }
 0x104   : > { %352 = vadd.xlane.f32.xlu0 %v351_v44 }
 0x18d   : > { %v348_v45 = vpop.xlane.xlu0 %347 }
 0x18e   : > { %v354_v46 = vmul.f32 0.001953125, %v348_v45 }
 0x190   : > { %v356_v47 = vsub.f32 %v336_v31, %v354_v46  ;;  %v357_v48 = vsub.f32 %v337_v32, %v354_v46  ;;  %v358_v49 = vsub.f32 %v338_v33, %v354_v46  ;;  %v359_v51 = vsub.f32 %v339_v37, %v354_v46 }
 0x191   : > { %v353_v50 = vpop.xlane.xlu0 %352 }
 0x192   : > { %v355_v52 = vmul.f32 0.001953125, %v353_v50  ;;  %v364_v53 = vmul.f32 %v356_v47, %v356_v47  ;;  %v365_v54 = vmul.f32 %v357_v48, %v357_v48  ;;  %v366_v55 = vmul.f32 %v358_v49, %v358_v49 }
 0x193   : > { %v367_v60 = vmul.f32 %v359_v51, %v359_v51 }
 0x194   : > { %v360_v56 = vsub.f32 %v340_v35, %v355_v52  ;;  %v361_v57 = vsub.f32 %v341_v36, %v355_v52  ;;  %v372_v58 = vadd.f32 %v365_v54, %v364_v53  ;;  %v362_v59 = vsub.f32 %v342_v38, %v355_v52 }
 0x195   : > { %v363_v62 = vsub.f32 %v343_v41, %v355_v52 }
 0x196   : > { %v373_v61 = vadd.f32 %v372_v58, %v366_v55  ;;  %v368_v63 = vmul.f32 %v360_v56, %v360_v56  ;;  %v369_v0 = vmul.f32 %v361_v57, %v361_v57  ;;  %v370_v2 = vmul.f32 %v362_v59, %v362_v59 }
 0x197   : > { %v371_v4 = vmul.f32 %v363_v62, %v363_v62 }
 0x198   : > { %v374_v1 = vadd.f32 %v373_v61, %v367_v60  ;;  %v377_v3 = vadd.f32 %v369_v0, %v368_v63 }
 0x19a   : > { %375 = vadd.xlane.f32.xlu1 %v374_v1  ;;  %v378_v5 = vadd.f32 %v377_v3, %v370_v2 }
 0x19c   : > { %v379_v6 = vadd.f32 %v378_v5, %v371_v4 }
 0x19e   : > { %380 = vadd.xlane.f32.xlu1 %v379_v6 }
 0x227   : > { %v376_v7 = vpop.xlane.xlu1 %375 }
 0x228   : > { %v382_v8 = vmul.f32 0.001953125, %v376_v7 }
 0x22a   : > { %v384_v9 = vadd.f32 1e-05, %v382_v8 }
 0x22b   : > { %v381_v10 = vpop.xlane.xlu1 %380 }
 0x22c   : > { %612 = vrsqrt.f32 %v384_v9  ;;  %v383_v11 = vmul.f32 0.001953125, %v381_v10 }
 0x22e   : > { %v385_v12 = vadd.f32 1e-05, %v383_v11 }
 0x230   : > { %614 = vrsqrt.f32 %v385_v12 }
 0x236   : > { %v613_v13 = vpop.eup %612 }
 0x237   : > { %v388_v14 = vmul.f32 %v613_v13, %v356_v47  ;;  %v389_v15 = vmul.f32 %v613_v13, %v357_v48  ;;  %v390_v16 = vmul.f32 %v613_v13, %v358_v49  ;;  %v391_v17 = vmul.f32 %v613_v13, %v359_v51 }
 0x239   : > { %v396_v18 = vmax.f32 %v388_v14, 0.0  ;;  %v397_v19 = vmax.f32 %v389_v15, 0.0  ;;  %v398_v20 = vmax.f32 %v390_v16, 0.0  ;;  %v399_v21 = vmax.f32 %v391_v17, 0.0 }
 0x23a   : > { %v615_v22 = vpop.eup %614 }
 0x23b   : > { %v588_v23 = vpack.c.bf16 %v399_v21, %v398_v20  ;;  %v432_v24 = vadd.f32 %v397_v19, %v396_v18  ;;  %v587_v25 = vpack.c.bf16 %v397_v19, %v396_v18  ;;  %v392_v26 = vmul.f32 %v615_v22, %v360_v56 }
 0x23c   : > { %v393_v27 = vmul.f32 %v615_v22, %v361_v57  ;;  %v394_v28 = vmul.f32 %v615_v22, %v362_v59  ;;  %v395_v29 = vmul.f32 %v615_v22, %v363_v62 }
 0x23d   : > { %429 = vst [vmem:[%s699_s2 + $0x8] sm:$0xff] %v588_v23  ;;  %v433_v30 = vadd.f32 %v432_v24, %v398_v20  ;;  %428 = vst [vmem:[%s699_s2] sm:$0xff] %v587_v25  ;;  %v400_v31 = vmax.f32 %v392_v26, 0.0 }
 0x23e   : > { %v401_v32 = vmax.f32 %v393_v27, 0.0  ;;  %v402_v33 = vmax.f32 %v394_v28, 0.0  ;;  %v403_v34 = vmax.f32 %v395_v29, 0.0 }
 0x23f   : > { %v434_v35 = vadd.f32 %v433_v30, %v399_v21 }
 0x240   : > { %v590_v36 = vpack.c.bf16 %v403_v34, %v402_v33  ;;  %v437_v37 = vadd.f32 %v401_v32, %v400_v31  ;;  %v589_v38 = vpack.c.bf16 %v401_v32, %v400_v31 }
 0x241   : > { %435 = vadd.xlane.f32.xlu0 %v434_v35 }
 0x242   : > { %431 = vst [vmem:[%s699_s2 + $0x18] sm:$0xff] %v590_v36  ;;  %v438_v39 = vadd.f32 %v437_v37, %v402_v33  ;;  %430 = vst [vmem:[%s699_s2 + $0x10] sm:$0xff] %v589_v38 }
 0x244   : > { %v439_v40 = vadd.f32 %v438_v39, %v403_v34 }
 0x246   : > { %440 = vadd.xlane.f32.xlu1 %v439_v40 }
 0x2ce   : > { %v436_v41 = vpop.xlane.xlu0 %435 }
 0x2cf   : > { %v442_v42 = vmul.f32 0.001953125, %v436_v41 }
 0x2d1   : > { %v444_v43 = vsub.f32 %v396_v18, %v442_v42  ;;  %v445_v44 = vsub.f32 %v397_v19, %v442_v42  ;;  %v446_v45 = vsub.f32 %v398_v20, %v442_v42  ;;  %v447_v47 = vsub.f32 %v399_v21, %v442_v42 }
 0x2d3   : > { %v441_v46 = vpop.xlane.xlu1 %440  ;;  %v452_v48 = vmul.f32 %v444_v43, %v444_v43  ;;  %v453_v49 = vmul.f32 %v445_v44, %v445_v44  ;;  %v454_v51 = vmul.f32 %v446_v45, %v446_v45  ;;  %v455_v56 = vmul.f32 %v447_v47, %v447_v47 }
 0x2d4   : > { %v443_v50 = vmul.f32 0.001953125, %v441_v46 }
 0x2d5   : > { %v460_v52 = vadd.f32 %v453_v49, %v452_v48 }
 0x2d6   : > { %v448_v53 = vsub.f32 %v400_v31, %v443_v50  ;;  %v449_v54 = vsub.f32 %v401_v32, %v443_v50  ;;  %v450_v55 = vsub.f32 %v402_v33, %v443_v50  ;;  %v451_v58 = vsub.f32 %v403_v34, %v443_v50 }
 0x2d7   : > { %v461_v57 = vadd.f32 %v460_v52, %v454_v51 }
 0x2d8   : > { %v456_v59 = vmul.f32 %v448_v53, %v448_v53  ;;  %v457_v60 = vmul.f32 %v449_v54, %v449_v54  ;;  %v458_v62 = vmul.f32 %v450_v55, %v450_v55  ;;  %v459_v0 = vmul.f32 %v451_v58, %v451_v58 }
 0x2d9   : > { %v462_v61 = vadd.f32 %v461_v57, %v455_v56 }
 0x2da   : > { %v465_v63 = vadd.f32 %v457_v60, %v456_v59 }
 0x2db   : > { %463 = vadd.xlane.f32.xlu0 %v462_v61 }
 0x2dc   : > { %v466_v1 = vadd.f32 %v465_v63, %v458_v62 }
 0x2de   : > { %v467_v2 = vadd.f32 %v466_v1, %v459_v0 }
 0x2e0   : > { %468 = vadd.xlane.f32.xlu1 %v467_v2 }
 0x368   : > { %v464_v3 = vpop.xlane.xlu0 %463 }
 0x369   : > { %v470_v4 = vmul.f32 0.001953125, %v464_v3 }
 0x36b   : > { %v472_v5 = vadd.f32 1e-05, %v470_v4 }
 0x36d   : > { %616 = vrsqrt.f32 %v472_v5  ;;  %v469_v6 = vpop.xlane.xlu1 %468 }
 0x36e   : > { %v471_v7 = vmul.f32 0.001953125, %v469_v6 }
 0x370   : > { %v473_v8 = vadd.f32 1e-05, %v471_v7 }
 0x372   : > { %618 = vrsqrt.f32 %v473_v8 }
 0x377   : > { %v617_v9 = vpop.eup %616 }
 0x378   : > { %v476_v10 = vmul.f32 %v617_v9, %v444_v43  ;;  %v477_v11 = vmul.f32 %v617_v9, %v445_v44  ;;  %v478_v12 = vmul.f32 %v617_v9, %v446_v45  ;;  %v479_v13 = vmul.f32 %v617_v9, %v447_v47 }
 0x37a   : > { %v591_v14 = vpack.c.bf16 %v477_v11, %v476_v10  ;;  %v592_v15 = vpack.c.bf16 %v479_v13, %v478_v12 }
 0x37c   : > { %v619_v16 = vpop.eup %618  ;;  %508 = vst [vmem:[%s700_s3] sm:$0xff] %v591_v14  ;;  %509 = vst [vmem:[%s700_s3 + $0x8] sm:$0xff] %v592_v15 }
 0x37d   : > { %v480_v17 = vmul.f32 %v619_v16, %v448_v53  ;;  %v481_v18 = vmul.f32 %v619_v16, %v449_v54  ;;  %v482_v19 = vmul.f32 %v619_v16, %v450_v55  ;;  %v483_v20 = vmul.f32 %v619_v16, %v451_v58 }
 0x37f   : > { %v593_v21 = vpack.c.bf16 %v481_v18, %v480_v17  ;;  %v594_v22 = vpack.c.bf16 %v483_v20, %v482_v19 }
 0x381   : > { %510 = vst [vmem:[%s700_s3 + $0x10] sm:$0xff] %v593_v21  ;;  %511 = vst [vmem:[%s700_s3 + $0x18] sm:$0xff] %v594_v22 }
 0x382 PF: > { %s14_s12 = sadd.s32 1, %s626_s12  }
 0x383   : > { %p11_p6 = scmp.ge.s32.totalorder %s14_s12, 11  }
 0x385   :  { %13 = sbr.rel (!%p11_p6) target bundleno = 1 (0x1), region = 73 }

// kernel: dcblock_fwd.13
= control target key start
LH: loop header
LB: loop body
LE: loop exit
PB: predicated region body
PF: predicated region fallthrough
CT: control target
= control target key end

     0   :  { %s916_s12 = smov 0   ;;  %s1136_s0 = inlined_call_operand.vmem [shape: bf16[9,16,512], index: 0, kind: input, shape index: {}]   ;;  %s1137_s1 = inlined_call_operand.vmem [shape: bf16[9,32,16], index: 1, kind: input, shape index: {}]   ;;  %s1138_s2 = inlined_call_operand.vmem [shape: bf16[32,512], index: 2, kind: output, shape index: {0}]   ;;  %s1139_s3 = inlined_call_operand.vmem [shape: bf16[32,512], index: 3, kind: output, shape index: {1}]  }
   0x1 LB: > { %s922_s13 = sadd.s32 4294967295, %s892_s12   ;;  %p799_p0 = scmp.ge.s32.totalorder %s892_s12, 1  ;;  %s892_s12 = sphi %s916_s12, %s14_s12  }
   0x2   : > { %p140_p1 = scmp.lt.s32.totalorder %s892_s12, 10 }
   0x4   : > { %p141_p2 = pnand %p799_p0, %p140_p1 }
   0x5   : > { %p164_p3 = scmp.lt.s32.totalorder (!%p141_p2), %s922_s13, 8  ;;  %p804_p4 = scmp.ne.s32.totalorder (!%p141_p2), %s922_s13, 0 }
   0x6   : > { %144 = sbr.rel (%p141_p2) target bundleno = 908 (0x38c), region = 28 }
   0xd   : > { %s165_s14 = scalar_select %p164_p3, %s922_s13, 8 }
   0xe   : > { %178 = sbr.rel (%p804_p4) target bundleno = 23 (0x17), region = 32  ;;  %v894_v0 = vmov (!%p804_p4), 0.0  }
   0xf   : > { %s834_s15 = sshll.u32 %s165_s14, 5  ;;  %s835_s16 = sshll.u32 %s165_s14, 4  ;;  %179 = vst [vmem:[#allocation2] sm:$0xff] (!%p804_p4), %v894_v0  ;;  %180 = vst [vmem:[#allocation2 + $0x8] sm:$0xff] (!%p804_p4), %v894_v0 }
  0x10   : > { %s168_s19 = scalar_lea.vmem %s1136_s0, %s834_s15  ;;  %s934_s22 = scalar_lea.vmem %s1137_s1, %s835_s16  ;;  %181 = vst [vmem:[#allocation2 + $0x10] sm:$0xff] (!%p804_p4), %v894_v0  ;;  %182 = vst [vmem:[#allocation2 + $0x18] sm:$0xff] (!%p804_p4), %v894_v0 }
  0x11   : > { %183 = vst [vmem:[#allocation2 + $0x20] sm:$0xff] (!%p804_p4), %v894_v0  ;;  %184 = vst [vmem:[#allocation2 + $0x28] sm:$0xff] (!%p804_p4), %v894_v0 }
  0x12   : > { %185 = vst [vmem:[#allocation2 + $0x30] sm:$0xff] (!%p804_p4), %v894_v0  ;;  %186 = vst [vmem:[#allocation2 + $0x38] sm:$0xff] (!%p804_p4), %v894_v0 }
  0x13   : > { %187 = vst [vmem:[#allocation2 + $0x40] sm:$0xff] (!%p804_p4), %v894_v0  ;;  %188 = vst [vmem:[#allocation2 + $0x48] sm:$0xff] (!%p804_p4), %v894_v0 }
  0x14   : > { %189 = vst [vmem:[#allocation2 + $0x50] sm:$0xff] (!%p804_p4), %v894_v0  ;;  %190 = vst [vmem:[#allocation2 + $0x58] sm:$0xff] (!%p804_p4), %v894_v0 }
  0x15   : > { %191 = vst [vmem:[#allocation2 + $0x60] sm:$0xff] %v894_v0  ;;  %192 = vst [vmem:[#allocation2 + $0x68] sm:$0xff] %v894_v0 }
  0x16   : > { %193 = vst [vmem:[#allocation2 + $0x70] sm:$0xff] %v894_v0  ;;  %194 = vst [vmem:[#allocation2 + $0x78] sm:$0xff] %v894_v0 }
  0x17 PF: > { %v862_v1 = vld [vmem:[%s168_s19 + $0x4] ss:$16 sps:$4 sm:$0xff]   ;;  %v864_v2 = vld [vmem:[%s168_s19 + $0xc] ss:$16 sps:$4 sm:$0xff]   ;;  %v895_v3 = vmov 0   ;;  %vm249_vm0 = vcmask 130048  }
  0x18   : > { %288 = vmatprep.mubr.bf16.mxu0 %v895_v3  ;;  %341 = vmatprep.mubr.bf16.mxu1 %v895_v3  ;;  %v866_v4 = vld [vmem:[%s168_s19] ss:$16 sps:$4 sm:$0xff]   ;;  %v867_v5 = vld [vmem:[%s168_s19 + $0x8] ss:$16 sps:$4 sm:$0xff]   ;;  %p815_p5 = scmp.ne.s32.totalorder %s922_s13, 8 }
  0x19   : > { %256 = vmatprep.subr.bf16.mxu0 %v862_v1  ;;  %309 = vmatprep.subr.bf16.mxu1 %v864_v2  ;;  %v868_v6 = vld [vmem:[%s934_s22] sm:$0xff]   ;;  %v869_v7 = vld [vmem:[%s934_s22 + $0x8] sm:$0xff]   ;;  %v197_v9 = vld [vmem:[#allocation2 + $0x10] sm:$0xff] }
  0x1a   : > { %257 = vmatpush1.bf16.msra.mxu0 %v866_v4  ;;  %310 = vmatpush1.bf16.msra.mxu1 %v867_v5  ;;  %v195_v8 = vld [vmem:[#allocation2] sm:$0xff]  ;;  %v196_v10 = vld [vmem:[#allocation2 + $0x8] sm:$0xff]  ;;  %v198_v11 = vld [vmem:[#allocation2 + $0x18] sm:$0xff] }
  0x1b   : > { %v199_v14 = vld [vmem:[#allocation2 + $0x20] sm:$0xff]  ;;  %v201_v15 = vld [vmem:[#allocation2 + $0x30] sm:$0xff]  ;;  %v200_v20 = vld [vmem:[#allocation2 + $0x28] sm:$0xff] }
  0x1c   : > { %v202_v21 = vld [vmem:[#allocation2 + $0x38] sm:$0xff]  ;;  %v203_v32 = vld [vmem:[#allocation2 + $0x40] sm:$0xff]  ;;  %v204_v34 = vld [vmem:[#allocation2 + $0x48] sm:$0xff] }
  0x1d   : > { %811 = vmatmul.mubr.msk.bf16.vlgmr.msra.gmra.mrb[0].mxu0 %vm249_vm0, %v868_v6  ;;  %813 = vmatmul.mubr.msk.bf16.vlgmr.msra.gmra.mrb[0].mxu1 %vm249_vm0, %v868_v6  ;;  %v205_v33 = vld [vmem:[#allocation2 + $0x50] sm:$0xff]  ;;  %v206_v35 = vld [vmem:[#allocation2 + $0x58] sm:$0xff]  ;;  %v207_v38 = vld [vmem:[#allocation2 + $0x60] sm:$0xff] }
  0x1e   : > { %298 = vmatprep.mubr.bf16.mxu0 %v895_v3  ;;  %351 = vmatprep.mubr.bf16.mxu1 %v895_v3  ;;  %v209_v39 = vld [vmem:[#allocation2 + $0x70] sm:$0xff]  ;;  %v208_v44 = vld [vmem:[#allocation2 + $0x68] sm:$0xff]  ;;  %v210_v45 = vld [vmem:[#allocation2 + $0x78] sm:$0xff] }
  0x25   : > { %812 = vmatmul.mubr.msk.bf16.gmra.mrb[4].mxu0 %vm249_vm0, %v869_v7  ;;  %814 = vmatmul.mubr.msk.bf16.gmra.mrb[4].mxu1 %vm249_vm0, %v869_v7 }
  0xf0   : > { %v290_v12 = vpop.f32.mrb[0].mxu0  ;;  %v343_v13 = vpop.f32.mrb[0].mxu1 }
  0xf1   : > { %v362_v16 = vadd.f32 %v290_v12, %v195_v8  ;;  %v364_v17 = vadd.f32 %v343_v13, %v197_v9  ;;  %v292_v18 = vpop.f32.mrb[1].mxu0  ;;  %v345_v19 = vpop.f32.mrb[1].mxu1 }
  0xf2   : > { %v363_v22 = vadd.f32 %v292_v18, %v196_v10  ;;  %v365_v23 = vadd.f32 %v345_v19, %v198_v11  ;;  %v294_v24 = vpop.f32.mrb[2].mxu0  ;;  %v347_v25 = vpop.f32.mrb[2].mxu1 }
  0xf3   : > { %378 = vst [vmem:[#allocation2] sm:$0xff] %v362_v16  ;;  %380 = vst [vmem:[#allocation2 + $0x10] sm:$0xff] %v364_v17  ;;  %v366_v26 = vadd.f32 %v294_v24, %v199_v14  ;;  %v368_v27 = vadd.f32 %v347_v25, %v201_v15  ;;  %v296_v28 = vpop.f32.mrb[3].mxu0  ;;  %v349_v29 = vpop.f32.mrb[3].mxu1 }
  0xf4   : > { %379 = vst [vmem:[#allocation2 + $0x8] sm:$0xff] %v363_v22  ;;  %381 = vst [vmem:[#allocation2 + $0x18] sm:$0xff] %v365_v23  ;;  %v367_v30 = vadd.f32 %v296_v28, %v200_v20  ;;  %v369_v31 = vadd.f32 %v349_v29, %v202_v21 }
  0xf5   : > { %382 = vst [vmem:[#allocation2 + $0x20] sm:$0xff] %v366_v26  ;;  %384 = vst [vmem:[#allocation2 + $0x30] sm:$0xff] %v368_v27 }
  0xf6   : > { %383 = vst [vmem:[#allocation2 + $0x28] sm:$0xff] %v367_v30  ;;  %385 = vst [vmem:[#allocation2 + $0x38] sm:$0xff] %v369_v31 }
  0xf8   : > { %v300_v36 = vpop.f32.mrb[4].mxu0  ;;  %v353_v37 = vpop.f32.mrb[4].mxu1  ;;  %397 = sbr.rel (%p815_p5) target bundleno = 908 (0x38c), region = 36 }
  0xf9   : > { %v370_v40 = vadd.f32 %v300_v36, %v203_v32  ;;  %v372_v41 = vadd.f32 %v353_v37, %v205_v33  ;;  %v302_v42 = vpop.f32.mrb[5].mxu0  ;;  %v355_v43 = vpop.f32.mrb[5].mxu1 }
  0xfa   : > { %v371_v46 = vadd.f32 %v302_v42, %v204_v34  ;;  %v373_v47 = vadd.f32 %v355_v43, %v206_v35  ;;  %v304_v48 = vpop.f32.mrb[6].mxu0  ;;  %v357_v49 = vpop.f32.mrb[6].mxu1  ;;  %v398_v60 = vld [vmem:[#allocation2] sm:$0xff] (!%p815_p5)  ;;  %v400_v63 = vld [vmem:[#allocation2 + $0x10] sm:$0xff] (!%p815_p5) }
  0xfb   : > { %386 = vst [vmem:[#allocation2 + $0x40] sm:$0xff] %v370_v40  ;;  %388 = vst [vmem:[#allocation2 + $0x50] sm:$0xff] %v372_v41  ;;  %v374_v50 = vadd.f32 %v304_v48, %v207_v38  ;;  %v376_v51 = vadd.f32 %v357_v49, %v209_v39  ;;  %v306_v52 = vpop.f32.mrb[7].mxu0  ;;  %v359_v53 = vpop.f32.mrb[7].mxu1  ;;  %v399_v61 = vld [vmem:[#allocation2 + $0x8] sm:$0xff] (!%p815_p5)  ;;  %v401_v3 = vld [vmem:[#allocation2 + $0x18] sm:$0xff] (!%p815_p5) }
  0xfc   : > { %387 = vst [vmem:[#allocation2 + $0x48] sm:$0xff] %v371_v46  ;;  %389 = vst [vmem:[#allocation2 + $0x58] sm:$0xff] %v373_v47  ;;  %v375_v54 = vadd.f32 %v306_v52, %v208_v44  ;;  %v377_v55 = vadd.f32 %v359_v53, %v210_v45  ;;  %v414_v0 = vadd.f32 (!%p815_p5), %v399_v61, %v398_v60  ;;  %v402_v8 = vld [vmem:[#allocation2 + $0x20] sm:$0xff] (!%p815_p5)  ;;  %v404_v10 = vld [vmem:[#allocation2 + $0x30] sm:$0xff] (!%p815_p5) }
  0xfd   : > { %390 = vst [vmem:[#allocation2 + $0x60] sm:$0xff] %v374_v50  ;;  %392 = vst [vmem:[#allocation2 + $0x70] sm:$0xff] %v376_v51  ;;  %v403_v9 = vld [vmem:[#allocation2 + $0x28] sm:$0xff] (!%p815_p5)  ;;  %v405_v16 = vld [vmem:[#allocation2 + $0x38] sm:$0xff] (!%p815_p5) }
  0xfe   : > { %391 = vst [vmem:[#allocation2 + $0x68] sm:$0xff] %v375_v54  ;;  %393 = vst [vmem:[#allocation2 + $0x78] sm:$0xff] %v377_v55  ;;  %v415_v6 = vadd.f32 (!%p815_p5), %v414_v0, %v400_v63  ;;  %v419_v13 = vadd.f32 (!%p815_p5), %v403_v9, %v402_v8 }
 0x100   : > { %v416_v14 = vadd.f32 %v415_v6, %v401_v3  ;;  %v420_v17 = vadd.f32 %v419_v13, %v404_v10 }
 0x102   : > { %v406_v56 = vld [vmem:[#allocation2 + $0x40] sm:$0xff]  ;;  %v408_v58 = vld [vmem:[#allocation2 + $0x50] sm:$0xff]  ;;  %417 = vadd.xlane.f32.xlu0 %v416_v14  ;;  %v421_v19 = vadd.f32 %v420_v17, %v405_v16 }
 0x103   : > { %v407_v57 = vld [vmem:[#allocation2 + $0x48] sm:$0xff]  ;;  %v409_v62 = vld [vmem:[#allocation2 + $0x58] sm:$0xff] }
 0x104   : > { %v424_v59 = vadd.f32 %v407_v57, %v406_v56  ;;  %v410_v1 = vld [vmem:[#allocation2 + $0x60] sm:$0xff]  ;;  %v412_v5 = vld [vmem:[#allocation2 + $0x70] sm:$0xff] }
 0x105   : > { %v411_v4 = vld [vmem:[#allocation2 + $0x68] sm:$0xff]  ;;  %v413_v12 = vld [vmem:[#allocation2 + $0x78] sm:$0xff] }
 0x106   : > { %v425_v2 = vadd.f32 %v424_v59, %v408_v58  ;;  %v429_v7 = vadd.f32 %v411_v4, %v410_v1  ;;  %422 = vadd.xlane.f32.xlu0 %v421_v19 }
 0x108   : > { %v426_v11 = vadd.f32 %v425_v2, %v409_v62  ;;  %v430_v15 = vadd.f32 %v429_v7, %v412_v5 }
 0x10a   : > { %427 = vadd.xlane.f32.xlu1 %v426_v11  ;;  %v431_v18 = vadd.f32 %v430_v15, %v413_v12 }
 0x10e   : > { %432 = vadd.xlane.f32.xlu1 %v431_v18 }
 0x18f   : > { %v418_v22 = vpop.xlane.xlu0 %417 }
 0x190   : > { %v434_v23 = vmul.f32 0.001953125, %v418_v22 }
 0x192   : > { %v946_v27 = vsub.f32 %v398_v60, %v434_v23  ;;  %v948_v28 = vsub.f32 %v399_v61, %v434_v23  ;;  %v950_v30 = vsub.f32 %v400_v63, %v434_v23  ;;  %v441_v34 = vsub.f32 %v401_v3, %v434_v23 }
 0x193   : > { %v423_v33 = vpop.xlane.xlu0 %422 }
 0x194   : > { %v435_v37 = vmul.f32 0.001953125, %v423_v33  ;;  %v454_v38 = vmul.f32 %v946_v27, %v946_v27  ;;  %v455_v39 = vmul.f32 %v948_v28, %v948_v28  ;;  %v456_v42 = vmul.f32 %v950_v30, %v950_v30 }
 0x195   : > { %v457_v48 = vmul.f32 %v441_v34, %v441_v34 }
 0x196   : > { %v442_v44 = vsub.f32 %v402_v8, %v435_v37  ;;  %v443_v45 = vsub.f32 %v403_v9, %v435_v37  ;;  %v470_v46 = vadd.f32 %v455_v39, %v454_v38  ;;  %v444_v50 = vsub.f32 %v404_v10, %v435_v37 }
 0x197   : > { %v428_v20 = vpop.xlane.xlu1 %427  ;;  %v445_v53 = vsub.f32 %v405_v16, %v435_v37 }
 0x198   : > { %v436_v21 = vmul.f32 0.001953125, %v428_v20  ;;  %v471_v52 = vadd.f32 %v470_v46, %v456_v42  ;;  %v458_v54 = vmul.f32 %v442_v44, %v442_v44  ;;  %v459_v55 = vmul.f32 %v443_v45, %v443_v45 }
 0x199   : > { %v460_v61 = vmul.f32 %v444_v50, %v444_v50 }
 0x19a   : > { %v940_v24 = vsub.f32 %v406_v56, %v436_v21  ;;  %v942_v25 = vsub.f32 %v407_v57, %v436_v21  ;;  %v944_v26 = vsub.f32 %v408_v58, %v436_v21  ;;  %v952_v31 = vsub.f32 %v409_v62, %v436_v21 }
 0x19b   : > { %v433_v29 = vpop.xlane.xlu1 %432  ;;  %v472_v60 = vadd.f32 %v471_v52, %v457_v48  ;;  %v475_v62 = vadd.f32 %v459_v55, %v458_v54 }
 0x19c   : > { %v437_v32 = vmul.f32 0.001953125, %v433_v29  ;;  %v462_v35 = vmul.f32 %v940_v24, %v940_v24  ;;  %v463_v36 = vmul.f32 %v942_v25, %v942_v25  ;;  %v464_v43 = vmul.f32 %v944_v26, %v944_v26 }
 0x19d   : > { %v465_v49 = vmul.f32 %v952_v31, %v952_v31  ;;  %473 = vadd.xlane.f32.xlu0 %v472_v60  ;;  %v476_v2 = vadd.f32 %v475_v62, %v460_v61 }
 0x19e   : > { %v962_v40 = vsub.f32 %v410_v1, %v437_v32  ;;  %v964_v41 = vsub.f32 %v411_v4, %v437_v32  ;;  %v480_v47 = vadd.f32 %v463_v36, %v462_v35  ;;  %v972_v51 = vsub.f32 %v412_v5, %v437_v32 }
 0x19f   : > { %v974_v57 = vsub.f32 %v413_v12, %v437_v32  ;;  %v461_v1 = vmul.f32 %v445_v53, %v445_v53 }
 0x1a0   : > { %v481_v56 = vadd.f32 %v480_v47, %v464_v43  ;;  %v466_v58 = vmul.f32 %v962_v40, %v962_v40  ;;  %v467_v59 = vmul.f32 %v964_v41, %v964_v41  ;;  %v468_v63 = vmul.f32 %v972_v51, %v972_v51 }
 0x1a1   : > { %v477_v4 = vadd.f32 %v476_v2, %v461_v1  ;;  %v469_v5 = vmul.f32 %v974_v57, %v974_v57 }
 0x1a2   : > { %v485_v0 = vadd.f32 %v467_v59, %v466_v58  ;;  %v482_v3 = vadd.f32 %v481_v56, %v465_v49 }
 0x1a3   : > { %478 = vadd.xlane.f32.xlu1 %v477_v4 }
 0x1a4   : > { %v486_v6 = vadd.f32 %v485_v0, %v468_v63  ;;  %483 = vadd.xlane.f32.xlu0 %v482_v3 }
 0x1a6   : > { %v487_v7 = vadd.f32 %v486_v6, %v469_v5 }
 0x1a8   : > { %488 = vadd.xlane.f32.xlu1 %v487_v7 }
 0x22a   : > { %v474_v8 = vpop.xlane.xlu0 %473 }
 0x22b   : > { %v490_v9 = vmul.f32 0.001953125, %v474_v8 }
 0x22d   : > { %v494_v10 = vadd.f32 1e-05, %v490_v9 }
 0x22f   : > { %870 = vrsqrt.f32 %v494_v10 }
 0x230   : > { %v479_v11 = vpop.xlane.xlu1 %478 }
 0x231   : > { %v484_v12 = vpop.xlane.xlu0 %483  ;;  %v491_v13 = vmul.f32 0.001953125, %v479_v11 }
 0x232   : > { %v492_v14 = vmul.f32 0.001953125, %v484_v12 }
 0x233   : > { %v495_v15 = vadd.f32 1e-05, %v491_v13 }
 0x234   : > { %v496_v16 = vadd.f32 1e-05, %v492_v14 }
 0x235   : > { %v489_v17 = vpop.xlane.xlu1 %488  ;;  %872 = vrsqrt.f32 %v495_v15 }
 0x236   : > { %v493_v18 = vmul.f32 0.001953125, %v489_v17  ;;  %874 = vrsqrt.f32 %v496_v16 }
 0x238   : > { %v497_v19 = vadd.f32 1e-05, %v493_v18 }
 0x239   : > { %v871_v20 = vpop.eup %870 }
 0x23a   : > { %876 = vrsqrt.f32 %v497_v19  ;;  %v502_v21 = vmul.f32 %v871_v20, %v946_v27  ;;  %v503_v22 = vmul.f32 %v871_v20, %v948_v28  ;;  %v504_v23 = vmul.f32 %v871_v20, %v950_v30 }
 0x23b   : > { %v505_v29 = vmul.f32 %v871_v20, %v441_v34 }
 0x23c   : > { %v987_v32 = vmax.f32 %v502_v21, 0.0  ;;  %v989_v33 = vmax.f32 %v503_v22, 0.0  ;;  %v991_v35 = vmax.f32 %v504_v23, 0.0 }
 0x23d   : > { %v993_v36 = vmax.f32 %v505_v29, 0.0 }
 0x23e   : > { %v590_v27 = vadd.f32 %v989_v33, %v987_v32  ;;  %v836_v28 = vpack.c.bf16 %v989_v33, %v987_v32 }
 0x23f   : > { %v873_v37 = vpop.eup %872  ;;  %v837_v39 = vpack.c.bf16 %v993_v36, %v991_v35 }
 0x240   : > { %v875_v38 = vpop.eup %874  ;;  %v506_v30 = vmul.f32 %v873_v37, %v442_v44  ;;  %v507_v34 = vmul.f32 %v873_v37, %v443_v45  ;;  %v508_v42 = vmul.f32 %v873_v37, %v444_v50  ;;  %v509_v43 = vmul.f32 %v873_v37, %v445_v53  ;;  %582 = vst [vmem:[%s1138_s2] sm:$0xff] %v836_v28 }
 0x241   : > { %v510_v46 = vmul.f32 %v875_v38, %v940_v24  ;;  %583 = vst [vmem:[%s1138_s2 + $0x8] sm:$0xff] %v837_v39  ;;  %v591_v47 = vadd.f32 %v590_v27, %v991_v35  ;;  %v511_v49 = vmul.f32 %v875_v38, %v942_v25  ;;  %v512_v44 = vmul.f32 %v875_v38, %v944_v26 }
 0x242   : > { %v522_v48 = vmax.f32 %v506_v30, 0.0  ;;  %v523_v50 = vmax.f32 %v507_v34, 0.0  ;;  %v524_v52 = vmax.f32 %v508_v42, 0.0  ;;  %v525_v53 = vmax.f32 %v509_v43, 0.0 }
 0x243   : > { %v513_v24 = vmul.f32 %v875_v38, %v952_v31  ;;  %v592_v54 = vadd.f32 %v591_v47, %v993_v36  ;;  %v526_v55 = vmax.f32 %v510_v46, 0.0  ;;  %v527_v56 = vmax.f32 %v511_v49, 0.0 }
 0x244   : > { %v877_v45 = vpop.eup %876  ;;  %v528_v58 = vmax.f32 %v512_v44, 0.0  ;;  %v839_v59 = vpack.c.bf16 %v525_v53, %v524_v52  ;;  %v595_v60 = vadd.f32 %v523_v50, %v522_v48  ;;  %v838_v61 = vpack.c.bf16 %v523_v50, %v522_v48 }
 0x245   : > { %v529_v62 = vmax.f32 %v513_v24, 0.0  ;;  %593 = vadd.xlane.f32.xlu0 %v592_v54  ;;  %v600_v63 = vadd.f32 %v527_v56, %v526_v55  ;;  %v840_v25 = vpack.c.bf16 %v527_v56, %v526_v55  ;;  %v514_v26 = vmul.f32 %v877_v45, %v962_v40 }
 0x246   : > { %v515_v0 = vmul.f32 %v877_v45, %v964_v41  ;;  %585 = vst [vmem:[%s1138_s2 + $0x18] sm:$0xff] %v839_v59  ;;  %v596_v31 = vadd.f32 %v595_v60, %v524_v52  ;;  %584 = vst [vmem:[%s1138_s2 + $0x10] sm:$0xff] %v838_v61  ;;  %v516_v2 = vmul.f32 %v877_v45, %v972_v51 }
 0x247   : > { %v841_v1 = vpack.c.bf16 %v529_v62, %v528_v58  ;;  %v517_v3 = vmul.f32 %v877_v45, %v974_v57  ;;  %v601_v4 = vadd.f32 %v600_v63, %v528_v58  ;;  %586 = vst [vmem:[%s1138_s2 + $0x20] sm:$0xff] %v840_v25  ;;  %v530_v40 = vmax.f32 %v514_v26, 0.0 }
 0x248   : > { %v531_v41 = vmax.f32 %v515_v0, 0.0  ;;  %v597_v5 = vadd.f32 %v596_v31, %v525_v53  ;;  %v532_v6 = vmax.f32 %v516_v2, 0.0 }
 0x249   : > { %587 = vst [vmem:[%s1138_s2 + $0x28] sm:$0xff] %v841_v1  ;;  %v533_v7 = vmax.f32 %v517_v3, 0.0  ;;  %v602_v8 = vadd.f32 %v601_v4, %v529_v62 }
 0x24a   : > { %v605_v9 = vadd.f32 %v531_v41, %v530_v40  ;;  %v842_v10 = vpack.c.bf16 %v531_v41, %v530_v40  ;;  %598 = vadd.xlane.f32.xlu1 %v597_v5 }
 0x24b   : > { %v843_v51 = vpack.c.bf16 %v533_v7, %v532_v6  ;;  %603 = vadd.xlane.f32.xlu0 %v602_v8 }
 0x24c   : > { %v606_v57 = vadd.f32 %v605_v9, %v532_v6  ;;  %588 = vst [vmem:[%s1138_s2 + $0x30] sm:$0xff] %v842_v10 }
 0x24d   : > { %589 = vst [vmem:[%s1138_s2 + $0x38] sm:$0xff] %v843_v51 }
 0x24e   : > { %v607_v11 = vadd.f32 %v606_v57, %v533_v7 }
 0x250   : > { %608 = vadd.xlane.f32.xlu1 %v607_v11 }
 0x2d2   : > { %v594_v12 = vpop.xlane.xlu0 %593 }
 0x2d3   : > { %v610_v13 = vmul.f32 0.001953125, %v594_v12 }
 0x2d5   : > { %v1036_v14 = vsub.f32 %v987_v32, %v610_v13  ;;  %v1039_v15 = vsub.f32 %v989_v33, %v610_v13  ;;  %v1042_v16 = vsub.f32 %v991_v35, %v610_v13  ;;  %v1045_v18 = vsub.f32 %v993_v36, %v610_v13 }
 0x2d7   : > { %v599_v17 = vpop.xlane.xlu1 %598  ;;  %v630_v19 = vmul.f32 %v1036_v14, %v1036_v14  ;;  %v631_v20 = vmul.f32 %v1039_v15, %v1039_v15  ;;  %v632_v29 = vmul.f32 %v1042_v16, %v1042_v16  ;;  %v633_v39 = vmul.f32 %v1045_v18, %v1045_v18 }
 0x2d8   : > { %v611_v21 = vmul.f32 0.001953125, %v599_v17  ;;  %v604_v22 = vpop.xlane.xlu0 %603 }
 0x2d9   : > { %v612_v23 = vmul.f32 0.001953125, %v604_v22  ;;  %v646_v32 = vadd.f32 %v631_v20, %v630_v19 }
 0x2da   : > { %v1053_v33 = vsub.f32 %v522_v48, %v611_v21  ;;  %v1055_v35 = vsub.f32 %v523_v50, %v611_v21  ;;  %v1057_v37 = vsub.f32 %v524_v52, %v611_v21  ;;  %v1065_v30 = vsub.f32 %v525_v53, %v611_v21 }
 0x2db   : > { %v1059_v36 = vsub.f32 %v526_v55, %v612_v23  ;;  %v1061_v38 = vsub.f32 %v527_v56, %v612_v23  ;;  %v647_v27 = vadd.f32 %v646_v32, %v632_v29  ;;  %v1071_v43 = vsub.f32 %v528_v58, %v612_v23 }
 0x2dc   : > { %v634_v34 = vmul.f32 %v1053_v33, %v1053_v33  ;;  %v635_v42 = vmul.f32 %v1055_v35, %v1055_v35  ;;  %v636_v49 = vmul.f32 %v1057_v37, %v1057_v37  ;;  %v625_v45 = vsub.f32 %v529_v62, %v612_v23 }
 0x2dd   : > { %v609_v28 = vpop.xlane.xlu1 %608  ;;  %v648_v47 = vadd.f32 %v647_v27, %v633_v39  ;;  %v638_v48 = vmul.f32 %v1059_v36, %v1059_v36  ;;  %v639_v50 = vmul.f32 %v1061_v38, %v1061_v38  ;;  %v637_v54 = vmul.f32 %v1065_v30, %v1065_v30 }
 0x2de   : > { %v613_v46 = vmul.f32 0.001953125, %v609_v28  ;;  %v651_v44 = vadd.f32 %v635_v42, %v634_v34  ;;  %v640_v56 = vmul.f32 %v1071_v43, %v1071_v43  ;;  %v641_v63 = vmul.f32 %v625_v45, %v625_v45 }
 0x2df   : > { %649 = vadd.xlane.f32.xlu0 %v648_v47  ;;  %v656_v58 = vadd.f32 %v639_v50, %v638_v48 }
 0x2e0   : > { %v1079_v52 = vsub.f32 %v530_v40, %v613_v46  ;;  %v1081_v53 = vsub.f32 %v531_v41, %v613_v46  ;;  %v1083_v24 = vsub.f32 %v532_v6, %v613_v46  ;;  %v652_v55 = vadd.f32 %v651_v44, %v636_v49 }
 0x2e1   : > { %v629_v59 = vsub.f32 %v533_v7, %v613_v46  ;;  %v657_v25 = vadd.f32 %v656_v58, %v640_v56 }
 0x2e2   : > { %v642_v60 = vmul.f32 %v1079_v52, %v1079_v52  ;;  %v643_v61 = vmul.f32 %v1081_v53, %v1081_v53  ;;  %v653_v62 = vadd.f32 %v652_v55, %v637_v54  ;;  %v644_v26 = vmul.f32 %v1083_v24, %v1083_v24 }
 0x2e3   : > { %v658_v31 = vadd.f32 %v657_v25, %v641_v63  ;;  %v645_v1 = vmul.f32 %v629_v59, %v629_v59 }
 0x2e4   : > { %v661_v0 = vadd.f32 %v643_v61, %v642_v60  ;;  %654 = vadd.xlane.f32.xlu1 %v653_v62 }
 0x2e5   : > { %659 = vadd.xlane.f32.xlu0 %v658_v31 }
 0x2e6   : > { %v662_v2 = vadd.f32 %v661_v0, %v644_v26 }
 0x2e8   : > { %v663_v3 = vadd.f32 %v662_v2, %v645_v1 }
 0x2ea   : > { %664 = vadd.xlane.f32.xlu1 %v663_v3 }
 0x36c   : > { %v650_v4 = vpop.xlane.xlu0 %649 }
 0x36d   : > { %v666_v40 = vmul.f32 0.001953125, %v650_v4 }
 0x36f   : > { %v670_v41 = vadd.f32 1e-05, %v666_v40 }
 0x371   : > { %878 = vrsqrt.f32 %v670_v41  ;;  %v655_v5 = vpop.xlane.xlu1 %654 }
 0x372   : > { %v667_v6 = vmul.f32 0.001953125, %v655_v5  ;;  %v660_v7 = vpop.xlane.xlu0 %659 }
 0x373   : > { %v668_v9 = vmul.f32 0.001953125, %v660_v7 }
 0x374   : > { %v671_v8 = vadd.f32 1e-05, %v667_v6 }
 0x375   : > { %v672_v10 = vadd.f32 1e-05, %v668_v9 }
 0x376   : > { %880 = vrsqrt.f32 %v671_v8 }
 0x377   : > { %v665_v51 = vpop.xlane.xlu1 %664  ;;  %882 = vrsqrt.f32 %v672_v10 }
 0x378   : > { %v669_v57 = vmul.f32 0.001953125, %v665_v51 }
 0x37a   : > { %v673_v11 = vadd.f32 1e-05, %v669_v57 }
 0x37b   : > { %v879_v12 = vpop.eup %878 }
 0x37c   : > { %884 = vrsqrt.f32 %v673_v11  ;;  %v678_v13 = vmul.f32 %v879_v12, %v1036_v14  ;;  %v679_v17 = vmul.f32 %v879_v12, %v1039_v15  ;;  %v680_v19 = vmul.f32 %v879_v12, %v1042_v16 }
 0x37d   : > { %v681_v20 = vmul.f32 %v879_v12, %v1045_v18 }
 0x37e   : > { %v844_v21 = vpack.c.bf16 %v679_v17, %v678_v13 }
 0x37f   : > { %v845_v22 = vpack.c.bf16 %v681_v20, %v680_v19 }
 0x380   : > { %v881_v23 = vpop.eup %880  ;;  %742 = vst [vmem:[%s1139_s3] sm:$0xff] %v844_v21 }
 0x381   : > { %743 = vst [vmem:[%s1139_s3 + $0x8] sm:$0xff] %v845_v22  ;;  %v682_v29 = vmul.f32 %v881_v23, %v1053_v33  ;;  %v683_v14 = vmul.f32 %v881_v23, %v1055_v35  ;;  %v684_v15 = vmul.f32 %v881_v23, %v1057_v37  ;;  %v685_v16 = vmul.f32 %v881_v23, %v1065_v30  ;;  %v883_v18 = vpop.eup %882 }
 0x382   : > { %v686_v27 = vmul.f32 %v883_v18, %v1059_v36  ;;  %v687_v28 = vmul.f32 %v883_v18, %v1061_v38  ;;  %v688_v34 = vmul.f32 %v883_v18, %v1071_v43  ;;  %v689_v42 = vmul.f32 %v883_v18, %v625_v45 }
 0x383   : > { %v846_v32 = vpack.c.bf16 %v683_v14, %v682_v29  ;;  %v847_v39 = vpack.c.bf16 %v685_v16, %v684_v15 }
 0x384   : > { %v848_v33 = vpack.c.bf16 %v687_v28, %v686_v27  ;;  %v849_v35 = vpack.c.bf16 %v689_v42, %v688_v34 }
 0x385   : > { %744 = vst [vmem:[%s1139_s3 + $0x10] sm:$0xff] %v846_v32  ;;  %745 = vst [vmem:[%s1139_s3 + $0x18] sm:$0xff] %v847_v39 }
 0x386   : > { %v885_v46 = vpop.eup %884  ;;  %746 = vst [vmem:[%s1139_s3 + $0x20] sm:$0xff] %v848_v33  ;;  %747 = vst [vmem:[%s1139_s3 + $0x28] sm:$0xff] %v849_v35 }
 0x387   : > { %v690_v37 = vmul.f32 %v885_v46, %v1079_v52  ;;  %v691_v36 = vmul.f32 %v885_v46, %v1081_v53  ;;  %v692_v38 = vmul.f32 %v885_v46, %v1083_v24  ;;  %v693_v30 = vmul.f32 %v885_v46, %v629_v59 }
 0x389   : > { %v850_v43 = vpack.c.bf16 %v691_v36, %v690_v37  ;;  %v851_v47 = vpack.c.bf16 %v693_v30, %v692_v38 }
 0x38b   : > { %748 = vst [vmem:[%s1139_s3 + $0x30] sm:$0xff] %v850_v43  ;;  %749 = vst [vmem:[%s1139_s3 + $0x38] sm:$0xff] %v851_v47 }
 0x38c PF: > { %s14_s12 = sadd.s32 1, %s892_s12  }
 0x38d   : > { %p11_p6 = scmp.ge.s32.totalorder %s14_s12, 11  }
 0x38f   :  { %13 = sbr.rel (!%p11_p6) target bundleno = 1 (0x1), region = 73 }

// kernel: dcblock_fwd.14
= control target key start
LH: loop header
LB: loop body
LE: loop exit
PB: predicated region body
PF: predicated region fallthrough
CT: control target
= control target key end

     0   :  { %9 = vsyncpa [#allocation4], 0  ;;  %s1015_s12 = smov 0   ;;  %s1244_s0 = inlined_call_operand.vmem [shape: bf16[9,32,512], index: 0, kind: input, shape index: {}]   ;;  %s1245_s1 = inlined_call_operand.vmem [shape: bf16[9,32,32], index: 1, kind: input, shape index: {}]   ;;  %s1246_s2 = inlined_call_operand.hbm [shape: bf16[32,512], index: 2, kind: output, shape index: {0}]   ;;  %s1247_s3 = inlined_call_operand.vmem [shape: bf16[32,512], index: 3, kind: output, shape index: {1}]  }
   0x1 LB: > { %s1021_s13 = sadd.s32 4294967295, %s988_s12   ;;  %p844_p0 = scmp.ge.s32.totalorder %s988_s12, 1  ;;  %s988_s12 = sphi %s1015_s12, %s15_s12  }
   0x2   : > { %p141_p1 = scmp.lt.s32.totalorder %s988_s12, 10 }
   0x4   : > { %p142_p2 = pnand %p844_p0, %p141_p1 }
   0x5   : > { %p165_p3 = scmp.lt.s32.totalorder (!%p142_p2), %s1021_s13, 8  ;;  %p849_p4 = scmp.ne.s32.totalorder (!%p142_p2), %s1021_s13, 0 }
   0x6   : > { %145 = sbr.rel (%p142_p2) target bundleno = 938 (0x3aa), region = 28 }
   0xd   : > { %s166_s14 = scalar_select %p165_p3, %s1021_s13, 8 }
   0xe   : > { %179 = sbr.rel (%p849_p4) target bundleno = 23 (0x17), region = 32  ;;  %v990_v0 = vmov (!%p849_p4), 0.0  }
   0xf   : > { %s885_s15 = sshll.u32 %s166_s14, 6  ;;  %s886_s16 = sshll.u32 %s166_s14, 4  ;;  %180 = vst [vmem:[#allocation2] sm:$0xff] (!%p849_p4), %v990_v0  ;;  %181 = vst [vmem:[#allocation2 + $0x8] sm:$0xff] (!%p849_p4), %v990_v0 }
  0x10   : > { %s1030_s19 = scalar_lea.vmem %s1244_s0, %s885_s15  ;;  %s1035_s22 = scalar_lea.vmem %s1245_s1, %s886_s16  ;;  %182 = vst [vmem:[#allocation2 + $0x10] sm:$0xff] (!%p849_p4), %v990_v0  ;;  %183 = vst [vmem:[#allocation2 + $0x18] sm:$0xff] (!%p849_p4), %v990_v0 }
  0x11   : > { %184 = vst [vmem:[#allocation2 + $0x20] sm:$0xff] (!%p849_p4), %v990_v0  ;;  %185 = vst [vmem:[#allocation2 + $0x28] sm:$0xff] (!%p849_p4), %v990_v0 }
  0x12   : > { %186 = vst [vmem:[#allocation2 + $0x30] sm:$0xff] (!%p849_p4), %v990_v0  ;;  %187 = vst [vmem:[#allocation2 + $0x38] sm:$0xff] (!%p849_p4), %v990_v0 }
  0x13   : > { %188 = vst [vmem:[#allocation2 + $0x40] sm:$0xff] (!%p849_p4), %v990_v0  ;;  %189 = vst [vmem:[#allocation2 + $0x48] sm:$0xff] (!%p849_p4), %v990_v0 }
  0x14   : > { %190 = vst [vmem:[#allocation2 + $0x50] sm:$0xff] (!%p849_p4), %v990_v0  ;;  %191 = vst [vmem:[#allocation2 + $0x58] sm:$0xff] (!%p849_p4), %v990_v0 }
  0x15   : > { %192 = vst [vmem:[#allocation2 + $0x60] sm:$0xff] %v990_v0  ;;  %193 = vst [vmem:[#allocation2 + $0x68] sm:$0xff] %v990_v0 }
  0x16   : > { %194 = vst [vmem:[#allocation2 + $0x70] sm:$0xff] %v990_v0  ;;  %195 = vst [vmem:[#allocation2 + $0x78] sm:$0xff] %v990_v0 }
  0x17 PF: > { %v922_v1 = vld [vmem:[%s1030_s19 + $0x4] ss:$16 sps:$4 sm:$0xff]   ;;  %v924_v2 = vld [vmem:[%s1030_s19 + $0xc] ss:$16 sps:$4 sm:$0xff]   ;;  %v991_v3 = vmov 0   ;;  %vm274_vm0 = vcmask 261120  }
  0x18   : > { %313 = vmatprep.mubr.bf16.mxu0 %v991_v3  ;;  %366 = vmatprep.mubr.bf16.mxu1 %v991_v3  ;;  %v926_v4 = vld [vmem:[%s1030_s19] ss:$16 sps:$4 sm:$0xff]   ;;  %v927_v5 = vld [vmem:[%s1030_s19 + $0x8] ss:$16 sps:$4 sm:$0xff]   ;;  %v928_v6 = vld [vmem:[%s1030_s19 + $0x24] ss:$16 sps:$4 sm:$0xff]  }
  0x19   : > { %281 = vmatprep.subr.bf16.mxu0 %v922_v1  ;;  %334 = vmatprep.subr.bf16.mxu1 %v924_v2  ;;  %v930_v7 = vld [vmem:[%s1030_s19 + $0x2c] ss:$16 sps:$4 sm:$0xff]   ;;  %v932_v8 = vld [vmem:[%s1030_s19 + $0x20] ss:$16 sps:$4 sm:$0xff]   ;;  %v933_v9 = vld [vmem:[%s1030_s19 + $0x28] ss:$16 sps:$4 sm:$0xff]  }
  0x1a   : > { %282 = vmatpush1.bf16.msra.mxu0 %v926_v4  ;;  %335 = vmatpush1.bf16.msra.mxu1 %v927_v5  ;;  %v934_v10 = vld [vmem:[%s1035_s22] sm:$0xff]   ;;  %v935_v11 = vld [vmem:[%s1035_s22 + $0x8] sm:$0xff]   ;;  %v198_v13 = vld [vmem:[#allocation2 + $0x10] sm:$0xff]  ;;  %p864_p5 = scmp.ne.s32.totalorder %s1021_s13, 8 }
  0x1b   : > { %283 = vmatprep.subr.bf16.mxu0 %v928_v6  ;;  %336 = vmatprep.subr.bf16.mxu1 %v930_v7  ;;  %v196_v12 = vld [vmem:[#allocation2] sm:$0xff]  ;;  %v197_v14 = vld [vmem:[#allocation2 + $0x8] sm:$0xff]  ;;  %v199_v15 = vld [vmem:[#allocation2 + $0x18] sm:$0xff] }
  0x1c   : > { %v200_v18 = vld [vmem:[#allocation2 + $0x20] sm:$0xff]  ;;  %v202_v19 = vld [vmem:[#allocation2 + $0x30] sm:$0xff]  ;;  %v201_v24 = vld [vmem:[#allocation2 + $0x28] sm:$0xff] }
  0x1d   : > { %v203_v25 = vld [vmem:[#allocation2 + $0x38] sm:$0xff]  ;;  %v204_v36 = vld [vmem:[#allocation2 + $0x40] sm:$0xff]  ;;  %v206_v37 = vld [vmem:[#allocation2 + $0x50] sm:$0xff] }
  0x1e   : > { %284 = vmatpush1.bf16.msra.mxu0 %v932_v8  ;;  %337 = vmatpush1.bf16.msra.mxu1 %v933_v9  ;;  %v205_v38 = vld [vmem:[#allocation2 + $0x48] sm:$0xff]  ;;  %v207_v39 = vld [vmem:[#allocation2 + $0x58] sm:$0xff]  ;;  %v208_v42 = vld [vmem:[#allocation2 + $0x60] sm:$0xff] }
  0x1f   : > { %v210_v43 = vld [vmem:[#allocation2 + $0x70] sm:$0xff]  ;;  %v209_v48 = vld [vmem:[#allocation2 + $0x68] sm:$0xff]  ;;  %v211_v49 = vld [vmem:[#allocation2 + $0x78] sm:$0xff] }
  0x21   : > { %860 = vmatmul.mubr.msk.bf16.vlgmr.msra.gmra.mrb[0].mxu0 %vm274_vm0, %v934_v10  ;;  %862 = vmatmul.mubr.msk.bf16.vlgmr.msra.gmra.mrb[0].mxu1 %vm274_vm0, %v934_v10 }
  0x22   : > { %323 = vmatprep.mubr.bf16.mxu0 %v991_v3  ;;  %376 = vmatprep.mubr.bf16.mxu1 %v991_v3 }
  0x29   : > { %861 = vmatmul.mubr.msk.bf16.gmra.mrb[4].mxu0 %vm274_vm0, %v935_v11  ;;  %863 = vmatmul.mubr.msk.bf16.gmra.mrb[4].mxu1 %vm274_vm0, %v935_v11 }
  0xf4   : > { %v315_v16 = vpop.f32.mrb[0].mxu0  ;;  %v368_v17 = vpop.f32.mrb[0].mxu1 }
  0xf5   : > { %v387_v20 = vadd.f32 %v315_v16, %v196_v12  ;;  %v389_v21 = vadd.f32 %v368_v17, %v198_v13  ;;  %v317_v22 = vpop.f32.mrb[1].mxu0  ;;  %v370_v23 = vpop.f32.mrb[1].mxu1 }
  0xf6   : > { %v388_v26 = vadd.f32 %v317_v22, %v197_v14  ;;  %v390_v27 = vadd.f32 %v370_v23, %v199_v15  ;;  %v319_v28 = vpop.f32.mrb[2].mxu0  ;;  %v372_v29 = vpop.f32.mrb[2].mxu1 }
  0xf7   : > { %403 = vst [vmem:[#allocation2] sm:$0xff] %v387_v20  ;;  %405 = vst [vmem:[#allocation2 + $0x10] sm:$0xff] %v389_v21  ;;  %v391_v30 = vadd.f32 %v319_v28, %v200_v18  ;;  %v393_v31 = vadd.f32 %v372_v29, %v202_v19  ;;  %v321_v32 = vpop.f32.mrb[3].mxu0  ;;  %v374_v33 = vpop.f32.mrb[3].mxu1 }
  0xf8   : > { %404 = vst [vmem:[#allocation2 + $0x8] sm:$0xff] %v388_v26  ;;  %406 = vst [vmem:[#allocation2 + $0x18] sm:$0xff] %v390_v27  ;;  %v392_v34 = vadd.f32 %v321_v32, %v201_v24  ;;  %v394_v35 = vadd.f32 %v374_v33, %v203_v25 }
  0xf9   : > { %407 = vst [vmem:[#allocation2 + $0x20] sm:$0xff] %v391_v30  ;;  %409 = vst [vmem:[#allocation2 + $0x30] sm:$0xff] %v393_v31 }
  0xfa   : > { %408 = vst [vmem:[#allocation2 + $0x28] sm:$0xff] %v392_v34  ;;  %410 = vst [vmem:[#allocation2 + $0x38] sm:$0xff] %v394_v35 }
  0xfc   : > { %v325_v40 = vpop.f32.mrb[4].mxu0  ;;  %v378_v41 = vpop.f32.mrb[4].mxu1  ;;  %422 = sbr.rel (%p864_p5) target bundleno = 912 (0x390), region = 36 }
  0xfd   : > { %v395_v44 = vadd.f32 %v325_v40, %v204_v36  ;;  %v397_v45 = vadd.f32 %v378_v41, %v206_v37  ;;  %v327_v46 = vpop.f32.mrb[5].mxu0  ;;  %v380_v47 = vpop.f32.mrb[5].mxu1 }
  0xfe   : > { %v396_v50 = vadd.f32 %v327_v46, %v205_v38  ;;  %v398_v51 = vadd.f32 %v380_v47, %v207_v39  ;;  %v329_v52 = vpop.f32.mrb[6].mxu0  ;;  %v382_v53 = vpop.f32.mrb[6].mxu1  ;;  %v423_v0 = vld [vmem:[#allocation2] sm:$0xff] (!%p864_p5)  ;;  %v425_v3 = vld [vmem:[#allocation2 + $0x10] sm:$0xff] (!%p864_p5) }
  0xff   : > { %411 = vst [vmem:[#allocation2 + $0x40] sm:$0xff] %v395_v44  ;;  %413 = vst [vmem:[#allocation2 + $0x50] sm:$0xff] %v397_v45  ;;  %v399_v54 = vadd.f32 %v329_v52, %v208_v42  ;;  %v401_v55 = vadd.f32 %v382_v53, %v210_v43  ;;  %v331_v56 = vpop.f32.mrb[7].mxu0  ;;  %v384_v57 = vpop.f32.mrb[7].mxu1  ;;  %v424_v1 = vld [vmem:[#allocation2 + $0x8] sm:$0xff] (!%p864_p5)  ;;  %v426_v7 = vld [vmem:[#allocation2 + $0x18] sm:$0xff] (!%p864_p5) }
 0x100   : > { %412 = vst [vmem:[#allocation2 + $0x48] sm:$0xff] %v396_v50  ;;  %414 = vst [vmem:[#allocation2 + $0x58] sm:$0xff] %v398_v51  ;;  %v400_v58 = vadd.f32 %v331_v56, %v209_v48  ;;  %v402_v59 = vadd.f32 %v384_v57, %v211_v49  ;;  %v439_v4 = vadd.f32 (!%p864_p5), %v424_v1, %v423_v0  ;;  %v427_v12 = vld [vmem:[#allocation2 + $0x20] sm:$0xff] (!%p864_p5)  ;;  %v429_v14 = vld [vmem:[#allocation2 + $0x30] sm:$0xff] (!%p864_p5) }
 0x101   : > { %415 = vst [vmem:[#allocation2 + $0x60] sm:$0xff] %v399_v54  ;;  %417 = vst [vmem:[#allocation2 + $0x70] sm:$0xff] %v401_v55  ;;  %v428_v13 = vld [vmem:[#allocation2 + $0x28] sm:$0xff] (!%p864_p5)  ;;  %v430_v20 = vld [vmem:[#allocation2 + $0x38] sm:$0xff] (!%p864_p5) }
 0x102   : > { %416 = vst [vmem:[#allocation2 + $0x68] sm:$0xff] %v400_v58  ;;  %418 = vst [vmem:[#allocation2 + $0x78] sm:$0xff] %v402_v59  ;;  %v440_v10 = vadd.f32 (!%p864_p5), %v439_v4, %v425_v3  ;;  %v444_v17 = vadd.f32 (!%p864_p5), %v428_v13, %v427_v12 }
 0x104   : > { %v441_v18 = vadd.f32 %v440_v10, %v426_v7  ;;  %v445_v21 = vadd.f32 %v444_v17, %v429_v14 }
 0x106   : > { %v431_v60 = vld [vmem:[#allocation2 + $0x40] sm:$0xff]  ;;  %v433_v62 = vld [vmem:[#allocation2 + $0x50] sm:$0xff]  ;;  %442 = vadd.xlane.f32.xlu0 %v441_v18  ;;  %v446_v23 = vadd.f32 %v445_v21, %v430_v20 }
 0x107   : > { %v432_v61 = vld [vmem:[#allocation2 + $0x48] sm:$0xff]  ;;  %v434_v2 = vld [vmem:[#allocation2 + $0x58] sm:$0xff] }
 0x108   : > { %v449_v63 = vadd.f32 %v432_v61, %v431_v60  ;;  %v435_v5 = vld [vmem:[#allocation2 + $0x60] sm:$0xff]  ;;  %v437_v9 = vld [vmem:[#allocation2 + $0x70] sm:$0xff] }
 0x109   : > { %v436_v8 = vld [vmem:[#allocation2 + $0x68] sm:$0xff]  ;;  %v438_v16 = vld [vmem:[#allocation2 + $0x78] sm:$0xff] }
 0x10a   : > { %v450_v6 = vadd.f32 %v449_v63, %v433_v62  ;;  %v454_v11 = vadd.f32 %v436_v8, %v435_v5  ;;  %447 = vadd.xlane.f32.xlu0 %v446_v23 }
 0x10c   : > { %v451_v15 = vadd.f32 %v450_v6, %v434_v2  ;;  %v455_v19 = vadd.f32 %v454_v11, %v437_v9 }
 0x10e   : > { %452 = vadd.xlane.f32.xlu1 %v451_v15  ;;  %v456_v22 = vadd.f32 %v455_v19, %v438_v16 }
 0x112   : > { %457 = vadd.xlane.f32.xlu1 %v456_v22 }
 0x193   : > { %v443_v26 = vpop.xlane.xlu0 %442 }
 0x194   : > { %v459_v27 = vmul.f32 0.001953125, %v443_v26 }
 0x196   : > { %v1055_v31 = vsub.f32 %v423_v0, %v459_v27  ;;  %v1057_v32 = vsub.f32 %v424_v1, %v459_v27  ;;  %v1059_v34 = vsub.f32 %v425_v3, %v459_v27  ;;  %v466_v38 = vsub.f32 %v426_v7, %v459_v27 }
 0x197   : > { %v448_v37 = vpop.xlane.xlu0 %447 }
 0x198   : > { %v460_v41 = vmul.f32 0.001953125, %v448_v37  ;;  %v479_v42 = vmul.f32 %v1055_v31, %v1055_v31  ;;  %v480_v43 = vmul.f32 %v1057_v32, %v1057_v32  ;;  %v481_v46 = vmul.f32 %v1059_v34, %v1059_v34 }
 0x199   : > { %v482_v52 = vmul.f32 %v466_v38, %v466_v38 }
 0x19a   : > { %v467_v48 = vsub.f32 %v427_v12, %v460_v41  ;;  %v468_v49 = vsub.f32 %v428_v13, %v460_v41  ;;  %v495_v50 = vadd.f32 %v480_v43, %v479_v42  ;;  %v469_v54 = vsub.f32 %v429_v14, %v460_v41 }
 0x19b   : > { %v453_v24 = vpop.xlane.xlu1 %452  ;;  %v470_v57 = vsub.f32 %v430_v20, %v460_v41 }
 0x19c   : > { %v461_v25 = vmul.f32 0.001953125, %v453_v24  ;;  %v496_v56 = vadd.f32 %v495_v50, %v481_v46  ;;  %v483_v58 = vmul.f32 %v467_v48, %v467_v48  ;;  %v484_v59 = vmul.f32 %v468_v49, %v468_v49 }
 0x19d   : > { %v485_v1 = vmul.f32 %v469_v54, %v469_v54 }
 0x19e   : > { %v1049_v28 = vsub.f32 %v431_v60, %v461_v25  ;;  %v1051_v29 = vsub.f32 %v432_v61, %v461_v25  ;;  %v1053_v30 = vsub.f32 %v433_v62, %v461_v25  ;;  %v1061_v35 = vsub.f32 %v434_v2, %v461_v25 }
 0x19f   : > { %v458_v33 = vpop.xlane.xlu1 %457  ;;  %v497_v0 = vadd.f32 %v496_v56, %v482_v52  ;;  %v500_v2 = vadd.f32 %v484_v59, %v483_v58 }
 0x1a0   : > { %v462_v36 = vmul.f32 0.001953125, %v458_v33  ;;  %v487_v39 = vmul.f32 %v1049_v28, %v1049_v28  ;;  %v488_v40 = vmul.f32 %v1051_v29, %v1051_v29  ;;  %v489_v47 = vmul.f32 %v1053_v30, %v1053_v30 }
 0x1a1   : > { %v490_v53 = vmul.f32 %v1061_v35, %v1061_v35  ;;  %498 = vadd.xlane.f32.xlu0 %v497_v0  ;;  %v501_v6 = vadd.f32 %v500_v2, %v485_v1 }
 0x1a2   : > { %v1071_v44 = vsub.f32 %v435_v5, %v462_v36  ;;  %v1073_v45 = vsub.f32 %v436_v8, %v462_v36  ;;  %v505_v51 = vadd.f32 %v488_v40, %v487_v39  ;;  %v1081_v55 = vsub.f32 %v437_v9, %v462_v36 }
 0x1a3   : > { %v1083_v61 = vsub.f32 %v438_v16, %v462_v36  ;;  %v486_v5 = vmul.f32 %v470_v57, %v470_v57 }
 0x1a4   : > { %v506_v60 = vadd.f32 %v505_v51, %v489_v47  ;;  %v491_v62 = vmul.f32 %v1071_v44, %v1071_v44  ;;  %v492_v63 = vmul.f32 %v1073_v45, %v1073_v45  ;;  %v493_v3 = vmul.f32 %v1081_v55, %v1081_v55 }
 0x1a5   : > { %v502_v8 = vadd.f32 %v501_v6, %v486_v5  ;;  %v494_v9 = vmul.f32 %v1083_v61, %v1083_v61 }
 0x1a6   : > { %v510_v4 = vadd.f32 %v492_v63, %v491_v62  ;;  %v507_v7 = vadd.f32 %v506_v60, %v490_v53 }
 0x1a7   : > { %503 = vadd.xlane.f32.xlu1 %v502_v8 }
 0x1a8   : > { %v511_v10 = vadd.f32 %v510_v4, %v493_v3  ;;  %508 = vadd.xlane.f32.xlu0 %v507_v7 }
 0x1aa   : > { %v512_v11 = vadd.f32 %v511_v10, %v494_v9 }
 0x1ac   : > { %513 = vadd.xlane.f32.xlu1 %v512_v11 }
 0x22e   : > { %v499_v12 = vpop.xlane.xlu0 %498 }
 0x22f   : > { %v515_v13 = vmul.f32 0.001953125, %v499_v12 }
 0x231   : > { %v519_v14 = vadd.f32 1e-05, %v515_v13 }
 0x233   : > { %936 = vrsqrt.f32 %v519_v14 }
 0x234   : > { %v504_v15 = vpop.xlane.xlu1 %503 }
 0x235   : > { %v509_v16 = vpop.xlane.xlu0 %508  ;;  %v516_v17 = vmul.f32 0.001953125, %v504_v15 }
 0x236   : > { %v517_v18 = vmul.f32 0.001953125, %v509_v16 }
 0x237   : > { %v520_v19 = vadd.f32 1e-05, %v516_v17 }
 0x238   : > { %v521_v20 = vadd.f32 1e-05, %v517_v18 }
 0x239   : > { %v514_v21 = vpop.xlane.xlu1 %513  ;;  %938 = vrsqrt.f32 %v520_v19 }
 0x23a   : > { %v518_v22 = vmul.f32 0.001953125, %v514_v21  ;;  %940 = vrsqrt.f32 %v521_v20 }
 0x23c   : > { %v522_v23 = vadd.f32 1e-05, %v518_v22 }
 0x23d   : > { %v937_v24 = vpop.eup %936 }
 0x23e   : > { %942 = vrsqrt.f32 %v522_v23  ;;  %v527_v25 = vmul.f32 %v937_v24, %v1055_v31  ;;  %v528_v26 = vmul.f32 %v937_v24, %v1057_v32  ;;  %v529_v27 = vmul.f32 %v937_v24, %v1059_v34 }
 0x23f   : > { %v530_v33 = vmul.f32 %v937_v24, %v466_v38 }
 0x240   : > { %v1096_v36 = vmax.f32 %v527_v25, 0.0  ;;  %v1098_v37 = vmax.f32 %v528_v26, 0.0  ;;  %v1100_v39 = vmax.f32 %v529_v27, 0.0 }
 0x241   : > { %v1102_v40 = vmax.f32 %v530_v33, 0.0 }
 0x242   : > { %v615_v31 = vadd.f32 %v1098_v37, %v1096_v36  ;;  %v887_v32 = vpack.c.bf16 %v1098_v37, %v1096_v36 }
 0x243   : > { %v939_v41 = vpop.eup %938  ;;  %v888_v43 = vpack.c.bf16 %v1102_v40, %v1100_v39 }
 0x244   : > { %v941_v42 = vpop.eup %940  ;;  %v531_v34 = vmul.f32 %v939_v41, %v467_v48  ;;  %v532_v38 = vmul.f32 %v939_v41, %v468_v49  ;;  %v533_v46 = vmul.f32 %v939_v41, %v469_v54  ;;  %v534_v47 = vmul.f32 %v939_v41, %v470_v57  ;;  %607 = vst [vmem:[#allocation3] sm:$0xff] %v887_v32 }
 0x245   : > { %v535_v50 = vmul.f32 %v941_v42, %v1049_v28  ;;  %608 = vst [vmem:[#allocation3 + $0x8] sm:$0xff] %v888_v43  ;;  %v616_v51 = vadd.f32 %v615_v31, %v1100_v39  ;;  %v536_v53 = vmul.f32 %v941_v42, %v1051_v29  ;;  %v537_v56 = vmul.f32 %v941_v42, %v1053_v30 }
 0x246   : > { %v547_v52 = vmax.f32 %v531_v34, 0.0  ;;  %v548_v59 = vmax.f32 %v532_v38, 0.0  ;;  %v549_v60 = vmax.f32 %v533_v46, 0.0  ;;  %v550_v62 = vmax.f32 %v534_v47, 0.0 }
 0x247   : > { %v538_v48 = vmul.f32 %v941_v42, %v1061_v35  ;;  %v617_v49 = vadd.f32 %v616_v51, %v1102_v40  ;;  %v551_v54 = vmax.f32 %v535_v50, 0.0  ;;  %v552_v57 = vmax.f32 %v536_v53, 0.0 }
 0x248   : > { %v943_v58 = vpop.eup %942  ;;  %v553_v28 = vmax.f32 %v537_v56, 0.0  ;;  %v890_v63 = vpack.c.bf16 %v550_v62, %v549_v60  ;;  %v620_v0 = vadd.f32 %v548_v59, %v547_v52  ;;  %v889_v1 = vpack.c.bf16 %v548_v59, %v547_v52 }
 0x249   : > { %v554_v2 = vmax.f32 %v538_v48, 0.0  ;;  %618 = vadd.xlane.f32.xlu0 %v617_v49  ;;  %v625_v3 = vadd.f32 %v552_v57, %v551_v54  ;;  %v891_v29 = vpack.c.bf16 %v552_v57, %v551_v54  ;;  %v539_v30 = vmul.f32 %v943_v58, %v1071_v44 }
 0x24a   : > { %v540_v4 = vmul.f32 %v943_v58, %v1073_v45  ;;  %610 = vst [vmem:[#allocation3 + $0x18] sm:$0xff] %v890_v63  ;;  %v621_v5 = vadd.f32 %v620_v0, %v549_v60  ;;  %609 = vst [vmem:[#allocation3 + $0x10] sm:$0xff] %v889_v1  ;;  %v541_v6 = vmul.f32 %v943_v58, %v1081_v55 }
 0x24b   : > { %v892_v35 = vpack.c.bf16 %v554_v2, %v553_v28  ;;  %v542_v7 = vmul.f32 %v943_v58, %v1083_v61  ;;  %v626_v8 = vadd.f32 %v625_v3, %v553_v28  ;;  %611 = vst [vmem:[#allocation3 + $0x20] sm:$0xff] %v891_v29  ;;  %v555_v9 = vmax.f32 %v539_v30, 0.0 }
 0x24c   : > { %v556_v10 = vmax.f32 %v540_v4, 0.0  ;;  %v622_v11 = vadd.f32 %v621_v5, %v550_v62  ;;  %v557_v12 = vmax.f32 %v541_v6, 0.0 }
 0x24d   : > { %612 = vst [vmem:[#allocation3 + $0x28] sm:$0xff] %v892_v35  ;;  %v558_v13 = vmax.f32 %v542_v7, 0.0  ;;  %v627_v14 = vadd.f32 %v626_v8, %v554_v2 }
 0x24e   : > { %v630_v44 = vadd.f32 %v556_v10, %v555_v9  ;;  %v893_v15 = vpack.c.bf16 %v556_v10, %v555_v9  ;;  %623 = vadd.xlane.f32.xlu1 %v622_v11 }
 0x24f   : > { %v894_v45 = vpack.c.bf16 %v558_v13, %v557_v12  ;;  %628 = vadd.xlane.f32.xlu0 %v627_v14 }
 0x250   : > { %v631_v16 = vadd.f32 %v630_v44, %v557_v12  ;;  %613 = vst [vmem:[#allocation3 + $0x30] sm:$0xff] %v893_v15 }
 0x251   : > { %614 = vst [vmem:[#allocation3 + $0x38] sm:$0xff] %v894_v45 }
 0x252   : > { %v632_v55 = vadd.f32 %v631_v16, %v558_v13 }
 0x254   : > { %633 = vadd.xlane.f32.xlu1 %v632_v55 }
 0x2d6   : > { %v619_v61 = vpop.xlane.xlu0 %618 }
 0x2d7   : > { %v635_v17 = vmul.f32 0.001953125, %v619_v61 }
 0x2d9   : > { %v1121_v18 = vsub.f32 %v1096_v36, %v635_v17  ;;  %v1124_v19 = vsub.f32 %v1098_v37, %v635_v17  ;;  %v1127_v20 = vsub.f32 %v1100_v39, %v635_v17  ;;  %v1130_v22 = vsub.f32 %v1102_v40, %v635_v17 }
 0x2db   : > { %v624_v21 = vpop.xlane.xlu1 %623  ;;  %v655_v23 = vmul.f32 %v1121_v18, %v1121_v18  ;;  %v656_v24 = vmul.f32 %v1124_v19, %v1124_v19  ;;  %v657_v33 = vmul.f32 %v1127_v20, %v1127_v20  ;;  %v658_v43 = vmul.f32 %v1130_v22, %v1130_v22 }
 0x2dc   : > { %v636_v25 = vmul.f32 0.001953125, %v624_v21  ;;  %v629_v26 = vpop.xlane.xlu0 %628 }
 0x2dd   : > { %v637_v27 = vmul.f32 0.001953125, %v629_v26  ;;  %v671_v36 = vadd.f32 %v656_v24, %v655_v23 }
 0x2de   : > { %v1138_v37 = vsub.f32 %v547_v52, %v636_v25  ;;  %v1140_v39 = vsub.f32 %v548_v59, %v636_v25  ;;  %v1142_v41 = vsub.f32 %v549_v60, %v636_v25  ;;  %v1150_v34 = vsub.f32 %v550_v62, %v636_v25 }
 0x2df   : > { %v1144_v40 = vsub.f32 %v551_v54, %v637_v27  ;;  %v1146_v42 = vsub.f32 %v552_v57, %v637_v27  ;;  %v672_v31 = vadd.f32 %v671_v36, %v657_v33  ;;  %v1156_v47 = vsub.f32 %v553_v28, %v637_v27 }
 0x2e0   : > { %v659_v38 = vmul.f32 %v1138_v37, %v1138_v37  ;;  %v660_v46 = vmul.f32 %v1140_v39, %v1140_v39  ;;  %v661_v53 = vmul.f32 %v1142_v41, %v1142_v41  ;;  %v650_v58 = vsub.f32 %v554_v2, %v637_v27 }
 0x2e1   : > { %v634_v32 = vpop.xlane.xlu1 %633  ;;  %v673_v51 = vadd.f32 %v672_v31, %v658_v43  ;;  %v663_v52 = vmul.f32 %v1144_v40, %v1144_v40  ;;  %v664_v59 = vmul.f32 %v1146_v42, %v1146_v42  ;;  %v662_v49 = vmul.f32 %v1150_v34, %v1150_v34 }
 0x2e2   : > { %v638_v50 = vmul.f32 0.001953125, %v634_v32  ;;  %v676_v56 = vadd.f32 %v660_v46, %v659_v38  ;;  %v665_v57 = vmul.f32 %v1156_v47, %v1156_v47  ;;  %v666_v3 = vmul.f32 %v650_v58, %v650_v58 }
 0x2e3   : > { %674 = vadd.xlane.f32.xlu0 %v673_v51  ;;  %v681_v28 = vadd.f32 %v664_v59, %v663_v52 }
 0x2e4   : > { %v1164_v60 = vsub.f32 %v555_v9, %v638_v50  ;;  %v1166_v62 = vsub.f32 %v556_v10, %v638_v50  ;;  %v1168_v48 = vsub.f32 %v557_v12, %v638_v50  ;;  %v677_v54 = vadd.f32 %v676_v56, %v661_v53 }
 0x2e5   : > { %v654_v63 = vsub.f32 %v558_v13, %v638_v50  ;;  %v682_v29 = vadd.f32 %v681_v28, %v665_v57 }
 0x2e6   : > { %v667_v0 = vmul.f32 %v1164_v60, %v1164_v60  ;;  %v668_v1 = vmul.f32 %v1166_v62, %v1166_v62  ;;  %v678_v2 = vadd.f32 %v677_v54, %v662_v49  ;;  %v669_v30 = vmul.f32 %v1168_v48, %v1168_v48 }
 0x2e7   : > { %v683_v5 = vadd.f32 %v682_v29, %v666_v3  ;;  %v670_v35 = vmul.f32 %v654_v63, %v654_v63 }
 0x2e8   : > { %v686_v4 = vadd.f32 %v668_v1, %v667_v0  ;;  %679 = vadd.xlane.f32.xlu1 %v678_v2 }
 0x2e9   : > { %684 = vadd.xlane.f32.xlu0 %v683_v5 }
 0x2ea   : > { %v687_v6 = vadd.f32 %v686_v4, %v669_v30 }
 0x2ec   : > { %v688_v7 = vadd.f32 %v687_v6, %v670_v35 }
 0x2ee   : > { %689 = vadd.xlane.f32.xlu1 %v688_v7 }
 0x370   : > { %v675_v8 = vpop.xlane.xlu0 %674 }
 0x371   : > { %v691_v9 = vmul.f32 0.001953125, %v675_v8 }
 0x373   : > { %v695_v10 = vadd.f32 1e-05, %v691_v9 }
 0x375   : > { %944 = vrsqrt.f32 %v695_v10  ;;  %v680_v11 = vpop.xlane.xlu1 %679 }
 0x376   : > { %v692_v12 = vmul.f32 0.001953125, %v680_v11  ;;  %v685_v13 = vpop.xlane.xlu0 %684 }
 0x377   : > { %v693_v44 = vmul.f32 0.001953125, %v685_v13 }
 0x378   : > { %v696_v14 = vadd.f32 1e-05, %v692_v12 }
 0x379   : > { %v697_v15 = vadd.f32 1e-05, %v693_v44 }
 0x37a   : > { %946 = vrsqrt.f32 %v696_v14 }
 0x37b   : > { %v690_v45 = vpop.xlane.xlu1 %689  ;;  %948 = vrsqrt.f32 %v697_v15 }
 0x37c   : > { %v694_v16 = vmul.f32 0.001953125, %v690_v45 }
 0x37e   : > { %v698_v55 = vadd.f32 1e-05, %v694_v16 }
 0x37f   : > { %v945_v61 = vpop.eup %944 }
 0x380   : > { %950 = vrsqrt.f32 %v698_v55  ;;  %v703_v17 = vmul.f32 %v945_v61, %v1121_v18  ;;  %v704_v21 = vmul.f32 %v945_v61, %v1124_v19  ;;  %v705_v23 = vmul.f32 %v945_v61, %v1127_v20 }
 0x381   : > { %v706_v24 = vmul.f32 %v945_v61, %v1130_v22 }
 0x382   : > { %v895_v25 = vpack.c.bf16 %v704_v21, %v703_v17 }
 0x383   : > { %v896_v26 = vpack.c.bf16 %v706_v24, %v705_v23 }
 0x384   : > { %v947_v27 = vpop.eup %946  ;;  %767 = vst [vmem:[%s1247_s3] sm:$0xff] %v895_v25 }
 0x385   : > { %768 = vst [vmem:[%s1247_s3 + $0x8] sm:$0xff] %v896_v26  ;;  %v707_v33 = vmul.f32 %v947_v27, %v1138_v37  ;;  %v708_v18 = vmul.f32 %v947_v27, %v1140_v39  ;;  %v709_v19 = vmul.f32 %v947_v27, %v1142_v41  ;;  %v710_v20 = vmul.f32 %v947_v27, %v1150_v34  ;;  %v949_v22 = vpop.eup %948 }
 0x386   : > { %v711_v31 = vmul.f32 %v949_v22, %v1144_v40  ;;  %v712_v32 = vmul.f32 %v949_v22, %v1146_v42  ;;  %v713_v38 = vmul.f32 %v949_v22, %v1156_v47  ;;  %v714_v46 = vmul.f32 %v949_v22, %v650_v58 }
 0x387   : > { %v897_v36 = vpack.c.bf16 %v708_v18, %v707_v33  ;;  %v898_v43 = vpack.c.bf16 %v710_v20, %v709_v19 }
 0x388   : > { %v899_v37 = vpack.c.bf16 %v712_v32, %v711_v31  ;;  %v900_v39 = vpack.c.bf16 %v714_v46, %v713_v38 }
 0x389   : > { %769 = vst [vmem:[%s1247_s3 + $0x10] sm:$0xff] %v897_v36  ;;  %770 = vst [vmem:[%s1247_s3 + $0x18] sm:$0xff] %v898_v43 }
 0x38a   : > { %v951_v50 = vpop.eup %950  ;;  %771 = vst [vmem:[%s1247_s3 + $0x20] sm:$0xff] %v899_v37  ;;  %772 = vst [vmem:[%s1247_s3 + $0x28] sm:$0xff] %v900_v39 }
 0x38b   : > { %v715_v41 = vmul.f32 %v951_v50, %v1164_v60  ;;  %v716_v40 = vmul.f32 %v951_v50, %v1166_v62  ;;  %v717_v42 = vmul.f32 %v951_v50, %v1168_v48  ;;  %v718_v34 = vmul.f32 %v951_v50, %v654_v63 }
 0x38d   : > { %v901_v47 = vpack.c.bf16 %v716_v40, %v715_v41  ;;  %v902_v51 = vpack.c.bf16 %v718_v34, %v717_v42 }
 0x38f   : > { %773 = vst [vmem:[%s1247_s3 + $0x30] sm:$0xff] %v901_v47  ;;  %774 = vst [vmem:[%s1247_s3 + $0x38] sm:$0xff] %v902_v51 }
 0x390 PF: > { %p907_p6 = scmp.eq.s32.totalorder %s1021_s13, 8  ;;  %s992_s14 = smov [#allocation3]  }
 0x391   : > { %s781_s15 = sshll.u32 %s992_s14, 4  ;;  %s782_s15 = int_to_ptr.vmem [resolvable:$true] %s781_s15 }
 0x392   : > { %s952_s16 = scalar_lea.vmem %s782_s15, 1024  ;;  %p959_p10 = scmp.lt.s32.totalorder %s782_s15, %s782_s15 }
 0x393   : > { %p953_p7 = scmp.ne.s32.totalorder %s782_s15, %s952_s16  ;;  %p960_p11 = scmp.lt.s32.totalorder %s952_s16, %s952_s16 }
 0x395   : > { %p954_p8 = pnand %p953_p7, %p907_p6  ;;  %p961_p12 = por %p960_p11, %p959_p10 }
 0x397   : > { %p955_p9 = pneg %p954_p8 }
 0x399   : > { %p962_p13 = pnand %p961_p12, %p955_p9 }
 0x39b   : > { %965 = shalt.err (!%p962_p13)
}
 0x39c   : > { %s966_s19 = scalar_lea.hbm %s1246_s2, 1024 }
 0x39d   : > { %p967_p0 = scmp.ne.s32.totalorder %s1246_s2, %s966_s19  ;;  %p972_p3 = scmp.lt.u32.totalorder %s966_s19, %s1246_s2 }
 0x39f   : > { %p968_p1 = pnand %p967_p0, %p907_p6 }
 0x3a1   : > { %p969_p2 = pneg %p968_p1 }
 0x3a3   : > { %p974_p4 = pnand %p972_p3, %p969_p2 }
 0x3a5   : > { %977 = shalt.err (!%p974_p4)
}
 0x3a6   : > { %s993_s24 = smov 256   ;;  %s994_s25 = smov 16  }
 0x3a7   : > { %904 = dma.vmem_to_hbm [thread:$0]  (%p907_p6), %s782_s15, 1024, %s1246_s2, [#allocation4], %s993_s24, %s993_s24, %s994_s25  }
 0x3a8   : > { %983 = dma.done.wait (%p907_p6), [#allocation4], 1024  }
 0x3a9   : > { %985 = vsyncadd (%p907_p6), [#allocation4], 4294966272 }
 0x3aa PF: > { %s15_s12 = sadd.s32 1, %s988_s12  }
 0x3ab   : > { %p12_p5 = scmp.ge.s32.totalorder %s15_s12, 11  }
 0x3ad   :  { %14 = sbr.rel (!%p12_p5) target bundleno = 1 (0x1), region = 74 }
 0x3b4   :  { %803 = vsyncpa [#allocation4], 1 }
 0x3b5   :  { %805 = vsyncpa [#allocation4 + $0x1], 1 }

// kernel: dcblock_fwd.15
= control target key start
LH: loop header
LB: loop body
LE: loop exit
PB: predicated region body
PF: predicated region fallthrough
CT: control target
= control target key end

     0   :  { %s1158_s0 = inlined_call_operand.vmem [shape: bf16[64,512], index: 0, kind: input, shape index: {}]   ;;  %s1159_s1 = inlined_call_operand.vmem [shape: bf16[64,512], index: 1, kind: input, shape index: {}]   ;;  %s1160_s2 = inlined_call_operand.vmem [shape: bf16[64,512], index: 2, kind: input, shape index: {}]   ;;  %s1161_s3 = inlined_call_operand.vmem [shape: f32[64,512], index: 3, kind: output, shape index: {}]  }
   0x1   :  { %v18_v0 = vld [vmem:[%s1158_s0 + $0x20] sm:$0xff]  ;;  %v19_v1 = vld [vmem:[%s1158_s0 + $0x28] sm:$0xff]  ;;  %v20_v44 = vld [vmem:[%s1158_s0 + $0x30] sm:$0xff] }
   0x2   :  { %v66_v2 = vld [vmem:[%s1159_s1 + $0x20] sm:$0xff]  ;;  %v38_v3 = vunpack.c.l.bf16 %v18_v0  ;;  %v39_v4 = vunpack.c.h.bf16 %v18_v0  ;;  %v40_v5 = vunpack.c.l.bf16 %v19_v1  ;;  %v41_v6 = vunpack.c.h.bf16 %v19_v1  ;;  %v67_v7 = vld [vmem:[%s1159_s1 + $0x28] sm:$0xff]  ;;  %v21_v45 = vld [vmem:[%s1158_s0 + $0x38] sm:$0xff] }
   0x3   :  { %v146_v8 = vld [vmem:[%s1160_s2 + $0x20] sm:$0xff]  ;;  %v147_v9 = vld [vmem:[%s1160_s2 + $0x28] sm:$0xff]  ;;  %v86_v10 = vunpack.c.l.bf16 %v66_v2  ;;  %v87_v11 = vunpack.c.h.bf16 %v66_v2  ;;  %v88_v12 = vunpack.c.l.bf16 %v67_v7  ;;  %v89_v13 = vunpack.c.h.bf16 %v67_v7  ;;  %v68_v54 = vld [vmem:[%s1159_s1 + $0x30] sm:$0xff] }
   0x4   :  { %v14_v14 = vld [vmem:[%s1158_s0] sm:$0xff]  ;;  %v15_v15 = vld [vmem:[%s1158_s0 + $0x8] sm:$0xff]  ;;  %v166_v16 = vunpack.c.l.bf16 %v146_v8  ;;  %v167_v17 = vunpack.c.h.bf16 %v146_v8  ;;  %v168_v18 = vunpack.c.l.bf16 %v147_v9  ;;  %v169_v19 = vunpack.c.h.bf16 %v147_v9  ;;  %v69_v63 = vld [vmem:[%s1159_s1 + $0x38] sm:$0xff] }
   0x5   :  { %v118_v20 = vadd.f32 %v86_v10, %v38_v3  ;;  %v119_v21 = vadd.f32 %v87_v11, %v39_v4  ;;  %v120_v22 = vadd.f32 %v88_v12, %v40_v5  ;;  %v121_v23 = vadd.f32 %v89_v13, %v41_v6  ;;  %v62_v24 = vld [vmem:[%s1159_s1] sm:$0xff]  ;;  %v63_v25 = vld [vmem:[%s1159_s1 + $0x8] sm:$0xff]  ;;  %v148_v4 = vld [vmem:[%s1160_s2 + $0x30] sm:$0xff] }
   0x6   :  { %v30_v26 = vunpack.c.l.bf16 %v14_v14  ;;  %v31_v27 = vunpack.c.h.bf16 %v14_v14  ;;  %v32_v28 = vunpack.c.l.bf16 %v15_v15  ;;  %v33_v29 = vunpack.c.h.bf16 %v15_v15  ;;  %v142_v38 = vld [vmem:[%s1160_s2] sm:$0xff]  ;;  %v143_v39 = vld [vmem:[%s1160_s2 + $0x8] sm:$0xff]  ;;  %v149_v9 = vld [vmem:[%s1160_s2 + $0x38] sm:$0xff] }
   0x7   :  { %v564_v30 = vadd.f32 %v166_v16, %v118_v20  ;;  %v566_v31 = vadd.f32 %v167_v17, %v119_v21  ;;  %v568_v32 = vadd.f32 %v168_v18, %v120_v22  ;;  %v570_v33 = vadd.f32 %v169_v19, %v121_v23  ;;  %v16_v14 = vld [vmem:[%s1158_s0 + $0x10] sm:$0xff]  ;;  %v17_v19 = vld [vmem:[%s1158_s0 + $0x18] sm:$0xff] }
   0x8   :  { %v78_v34 = vunpack.c.l.bf16 %v62_v24  ;;  %v79_v35 = vunpack.c.h.bf16 %v62_v24  ;;  %v80_v36 = vunpack.c.l.bf16 %v63_v25  ;;  %v81_v37 = vunpack.c.h.bf16 %v63_v25 }
   0x9   :  { %v230_v40 = vmax.f32 %v564_v30, 0.0  ;;  %v231_v41 = vmax.f32 %v566_v31, 0.0  ;;  %v232_v42 = vmax.f32 %v568_v32, 0.0  ;;  %v233_v43 = vmax.f32 %v570_v33, 0.0 }
   0xa   :  { %v110_v46 = vadd.f32 %v78_v34, %v30_v26  ;;  %v111_v47 = vadd.f32 %v79_v35, %v31_v27  ;;  %v112_v48 = vadd.f32 %v80_v36, %v32_v28  ;;  %v113_v49 = vadd.f32 %v81_v37, %v33_v29  ;;  %v64_v28 = vld [vmem:[%s1159_s1 + $0x10] sm:$0xff]  ;;  %v65_v37 = vld [vmem:[%s1159_s1 + $0x18] sm:$0xff] }
   0xb   :  { %v264_v50 = vadd.f32 %v231_v41, %v230_v40  ;;  %v158_v51 = vunpack.c.l.bf16 %v142_v38  ;;  %v159_v52 = vunpack.c.h.bf16 %v142_v38  ;;  %v160_v53 = vunpack.c.l.bf16 %v143_v39  ;;  %v144_v38 = vld [vmem:[%s1160_s2 + $0x10] sm:$0xff] }
   0xc   :  { %v161_v55 = vunpack.c.h.bf16 %v143_v39  ;;  %v42_v56 = vunpack.c.l.bf16 %v20_v44  ;;  %v43_v57 = vunpack.c.h.bf16 %v20_v44  ;;  %v44_v58 = vunpack.c.l.bf16 %v21_v45 }
   0xd   :  { %v265_v59 = vadd.f32 %v264_v50, %v232_v42  ;;  %v597_v60 = vadd.f32 %v158_v51, %v110_v46  ;;  %v599_v61 = vadd.f32 %v159_v52, %v111_v47  ;;  %v601_v62 = vadd.f32 %v160_v53, %v112_v48  ;;  %v145_v47 = vld [vmem:[%s1160_s2 + $0x18] sm:$0xff] }
   0xe   :  { %v606_v0 = vadd.f32 %v161_v55, %v113_v49  ;;  %v45_v1 = vunpack.c.h.bf16 %v21_v45  ;;  %v90_v2 = vunpack.c.l.bf16 %v68_v54  ;;  %v91_v3 = vunpack.c.h.bf16 %v68_v54 }
   0xf   :  { %v266_v5 = vadd.f32 %v265_v59, %v233_v43  ;;  %v222_v6 = vmax.f32 %v597_v60, 0.0  ;;  %v223_v7 = vmax.f32 %v599_v61, 0.0  ;;  %v224_v8 = vmax.f32 %v601_v62, 0.0 }
  0x10   :  { %v225_v10 = vmax.f32 %v606_v0, 0.0  ;;  %v92_v11 = vunpack.c.l.bf16 %v69_v63  ;;  %v93_v12 = vunpack.c.h.bf16 %v69_v63  ;;  %v122_v13 = vadd.f32 %v90_v2, %v42_v56  ;;  %v24_v56 = vld [vmem:[%s1158_s0 + $0x50] sm:$0xff] }
  0x11   :  { %267 = vadd.xlane.f32.xlu1 %v266_v5  ;;  %v254_v15 = vadd.f32 %v223_v7, %v222_v6  ;;  %v123_v16 = vadd.f32 %v91_v3, %v43_v57  ;;  %v170_v17 = vunpack.c.l.bf16 %v148_v4  ;;  %v171_v18 = vunpack.c.h.bf16 %v148_v4 }
  0x12   :  { %v124_v20 = vadd.f32 %v92_v11, %v44_v58  ;;  %v125_v21 = vadd.f32 %v93_v12, %v45_v1  ;;  %v172_v22 = vunpack.c.l.bf16 %v149_v9  ;;  %v173_v23 = vunpack.c.h.bf16 %v149_v9  ;;  %v25_v1 = vld [vmem:[%s1158_s0 + $0x58] sm:$0xff]  ;;  %v72_v9 = vld [vmem:[%s1159_s1 + $0x50] sm:$0xff] }
  0x13   :  { %v255_v24 = vadd.f32 %v254_v15, %v224_v8  ;;  %v632_v25 = vadd.f32 %v170_v17, %v122_v13  ;;  %v634_v26 = vadd.f32 %v171_v18, %v123_v16  ;;  %v34_v27 = vunpack.c.l.bf16 %v16_v14  ;;  %v73_v15 = vld [vmem:[%s1159_s1 + $0x58] sm:$0xff] }
  0x14   :  { %v639_v29 = vadd.f32 %v172_v22, %v124_v20  ;;  %v641_v34 = vadd.f32 %v173_v23, %v125_v21  ;;  %v35_v35 = vunpack.c.h.bf16 %v16_v14  ;;  %v36_v36 = vunpack.c.l.bf16 %v17_v19  ;;  %v152_v20 = vld [vmem:[%s1160_s2 + $0x50] sm:$0xff] }
  0x15   :  { %v256_v39 = vadd.f32 %v255_v24, %v225_v10  ;;  %v234_v44 = vmax.f32 %v632_v25, 0.0  ;;  %v1176_v45 = vmax.f32 %v634_v26, 0.0  ;;  %v37_v46 = vunpack.c.h.bf16 %v17_v19 }
  0x16   :  { %v1175_v48 = vmax.f32 %v639_v29, 0.0  ;;  %v1166_v49 = vmax.f32 %v641_v34, 0.0  ;;  %v82_v50 = vunpack.c.l.bf16 %v64_v28  ;;  %v83_v51 = vunpack.c.h.bf16 %v64_v28 }
  0x17   :  { %257 = vadd.xlane.f32.xlu0 %v256_v39  ;;  %v269_v52 = vadd.f32 %v1176_v45, %v234_v44  ;;  %v84_v53 = vunpack.c.l.bf16 %v65_v37  ;;  %v85_v54 = vunpack.c.h.bf16 %v65_v37  ;;  %v162_v55 = vunpack.c.l.bf16 %v144_v38 }
  0x18   :  { %v114_v57 = vadd.f32 %v82_v50, %v34_v27  ;;  %v115_v58 = vadd.f32 %v83_v51, %v35_v35  ;;  %v163_v59 = vunpack.c.h.bf16 %v144_v38  ;;  %v164_v63 = vunpack.c.l.bf16 %v145_v47  ;;  %v153_v27 = vld [vmem:[%s1160_s2 + $0x58] sm:$0xff]  ;;  %v22_v50 = vld [vmem:[%s1158_s0 + $0x40] sm:$0xff] }
  0x19   :  { %v270_v2 = vadd.f32 %v269_v52, %v1175_v48  ;;  %v116_v3 = vadd.f32 %v84_v53, %v36_v36  ;;  %v117_v4 = vadd.f32 %v85_v54, %v37_v46  ;;  %v165_v5 = vunpack.c.h.bf16 %v145_v47 }
  0x1a   :  { %v673_v11 = vadd.f32 %v162_v55, %v114_v57  ;;  %v675_v12 = vadd.f32 %v163_v59, %v115_v58  ;;  %v50_v13 = vunpack.c.l.bf16 %v24_v56  ;;  %v51_v14 = vunpack.c.h.bf16 %v24_v56  ;;  %v23_v55 = vld [vmem:[%s1158_s0 + $0x48] sm:$0xff] }
  0x1b   :  { %v271_v16 = vadd.f32 %v270_v2, %v1166_v49  ;;  %v682_v17 = vadd.f32 %v164_v63, %v116_v3  ;;  %v684_v18 = vadd.f32 %v165_v5, %v117_v4  ;;  %v52_v19 = vunpack.c.l.bf16 %v25_v1  ;;  %v70_v63 = vld [vmem:[%s1159_s1 + $0x40] sm:$0xff]  ;;  %v71_v5 = vld [vmem:[%s1159_s1 + $0x48] sm:$0xff] }
  0x1c   :  { %v1170_v21 = vmax.f32 %v673_v11, 0.0  ;;  %v1169_v22 = vmax.f32 %v675_v12, 0.0  ;;  %v53_v23 = vunpack.c.h.bf16 %v25_v1  ;;  %v98_v24 = vunpack.c.l.bf16 %v72_v9 }
  0x1d   :  { %272 = vadd.xlane.f32.xlu1 %v271_v16  ;;  %v1168_v28 = vmax.f32 %v682_v17, 0.0  ;;  %v1167_v35 = vmax.f32 %v684_v18, 0.0  ;;  %v99_v36 = vunpack.c.h.bf16 %v72_v9  ;;  %v100_v37 = vunpack.c.l.bf16 %v73_v15  ;;  %v150_v16 = vld [vmem:[%s1160_s2 + $0x40] sm:$0xff] }
  0x1e   :  { %v259_v38 = vadd.f32 %v1169_v22, %v1170_v21  ;;  %v101_v39 = vunpack.c.h.bf16 %v73_v15  ;;  %v130_v46 = vadd.f32 %v98_v24, %v50_v13  ;;  %v178_v47 = vunpack.c.l.bf16 %v152_v20 }
  0x1f   :  { %v131_v51 = vadd.f32 %v99_v36, %v51_v14  ;;  %v132_v52 = vadd.f32 %v100_v37, %v52_v19  ;;  %v179_v53 = vunpack.c.h.bf16 %v152_v20  ;;  %v180_v54 = vunpack.c.l.bf16 %v153_v27 }
  0x20   :  { %v260_v56 = vadd.f32 %v259_v38, %v1168_v28  ;;  %v133_v57 = vadd.f32 %v101_v39, %v53_v23  ;;  %v181_v58 = vunpack.c.h.bf16 %v153_v27  ;;  %v708_v59 = vadd.f32 %v178_v47, %v130_v46  ;;  %v151_v27 = vld [vmem:[%s1160_s2 + $0x48] sm:$0xff]  ;;  %v28_v46 = vld [vmem:[%s1158_s0 + $0x70] sm:$0xff] }
  0x21   :  { %v713_v1 = vadd.f32 %v179_v53, %v131_v51  ;;  %v715_v2 = vadd.f32 %v180_v54, %v132_v52  ;;  %v46_v3 = vunpack.c.l.bf16 %v22_v50  ;;  %v47_v4 = vunpack.c.h.bf16 %v22_v50  ;;  %v29_v53 = vld [vmem:[%s1158_s0 + $0x78] sm:$0xff] }
  0x22   :  { %v261_v9 = vadd.f32 %v260_v56, %v1167_v35  ;;  %v722_v13 = vadd.f32 %v181_v58, %v133_v57  ;;  %v1165_v14 = vmax.f32 %v708_v59, 0.0  ;;  %v48_v15 = vunpack.c.l.bf16 %v23_v55 }
  0x23   :  { %v1162_v19 = vmax.f32 %v713_v1, 0.0  ;;  %v1164_v20 = vmax.f32 %v715_v2, 0.0  ;;  %v49_v23 = vunpack.c.h.bf16 %v23_v55  ;;  %v94_v24 = vunpack.c.l.bf16 %v70_v63 }
  0x24   :  { %262 = vadd.xlane.f32.xlu0 %v261_v9  ;;  %v1163_v36 = vmax.f32 %v722_v13, 0.0  ;;  %v95_v37 = vunpack.c.h.bf16 %v70_v63  ;;  %v96_v38 = vunpack.c.l.bf16 %v71_v5  ;;  %v97_v39 = vunpack.c.h.bf16 %v71_v5 }
  0x25   :  { %v279_v47 = vadd.f32 %v1162_v19, %v1165_v14  ;;  %v126_v50 = vadd.f32 %v94_v24, %v46_v3  ;;  %v174_v51 = vunpack.c.l.bf16 %v150_v16  ;;  %v175_v52 = vunpack.c.h.bf16 %v150_v16  ;;  %v76_v3 = vld [vmem:[%s1159_s1 + $0x70] sm:$0xff] }
  0x26   :  { %v127_v54 = vadd.f32 %v95_v37, %v47_v4  ;;  %v128_v55 = vadd.f32 %v96_v38, %v48_v15  ;;  %v129_v56 = vadd.f32 %v97_v39, %v49_v23  ;;  %v176_v57 = vunpack.c.l.bf16 %v151_v27  ;;  %v77_v15 = vld [vmem:[%s1159_s1 + $0x78] sm:$0xff]  ;;  %v156_v23 = vld [vmem:[%s1160_s2 + $0x70] sm:$0xff] }
  0x27   :  { %v280_v58 = vadd.f32 %v279_v47, %v1164_v20  ;;  %v177_v63 = vunpack.c.h.bf16 %v151_v27  ;;  %v746_v5 = vadd.f32 %v174_v51, %v126_v50  ;;  %v58_v9 = vunpack.c.l.bf16 %v28_v46 }
  0x28   :  { %v751_v16 = vadd.f32 %v175_v52, %v127_v54  ;;  %v753_v24 = vadd.f32 %v176_v57, %v128_v55  ;;  %v59_v19 = vunpack.c.h.bf16 %v28_v46  ;;  %v60_v4 = vunpack.c.l.bf16 %v29_v53  ;;  %v157_v52 = vld [vmem:[%s1160_s2 + $0x78] sm:$0xff] }
  0x29   :  { %v281_v27 = vadd.f32 %v280_v58, %v1163_v36  ;;  %v763_v37 = vadd.f32 %v177_v63, %v129_v56  ;;  %v1174_v38 = vmax.f32 %v746_v5, 0.0  ;;  %v61_v39 = vunpack.c.h.bf16 %v29_v53  ;;  %v26_v53 = vld [vmem:[%s1158_s0 + $0x60] sm:$0xff] }
  0x2a   :  { %v1173_v47 = vmax.f32 %v751_v16, 0.0  ;;  %v1172_v46 = vmax.f32 %v753_v24, 0.0  ;;  %v106_v50 = vunpack.c.l.bf16 %v76_v3  ;;  %v107_v51 = vunpack.c.h.bf16 %v76_v3 }
  0x2b   :  { %282 = vadd.xlane.f32.xlu1 %v281_v27  ;;  %v1171_v54 = vmax.f32 %v763_v37, 0.0  ;;  %v108_v55 = vunpack.c.l.bf16 %v77_v15  ;;  %v109_v57 = vunpack.c.h.bf16 %v77_v15  ;;  %v186_v56 = vunpack.c.l.bf16 %v156_v23  ;;  %v27_v27 = vld [vmem:[%s1158_s0 + $0x68] sm:$0xff] }
  0x2c   :  { %v274_v58 = vadd.f32 %v1173_v47, %v1174_v38  ;;  %v138_v63 = vadd.f32 %v106_v50, %v58_v9  ;;  %v139_v3 = vadd.f32 %v107_v51, %v59_v19  ;;  %v187_v36 = vunpack.c.h.bf16 %v156_v23  ;;  %v74_v19 = vld [vmem:[%s1159_s1 + $0x60] sm:$0xff]  ;;  %v75_v50 = vld [vmem:[%s1159_s1 + $0x68] sm:$0xff] }
  0x2d   :  { %v140_v20 = vadd.f32 %v108_v55, %v60_v4  ;;  %v141_v14 = vadd.f32 %v109_v57, %v61_v39  ;;  %v188_v15 = vunpack.c.l.bf16 %v157_v52  ;;  %v189_v49 = vunpack.c.h.bf16 %v157_v52 }
  0x2e   :  { %v275_v35 = vadd.f32 %v274_v58, %v1172_v46  ;;  %v784_v28 = vadd.f32 %v186_v56, %v138_v63  ;;  %v786_v22 = vadd.f32 %v187_v36, %v139_v3  ;;  %v54_v21 = vunpack.c.l.bf16 %v26_v53  ;;  %v154_v36 = vld [vmem:[%s1160_s2 + $0x60] sm:$0xff] }
  0x2f   :  { %v791_v9 = vadd.f32 %v188_v15, %v140_v20  ;;  %v793_v23 = vadd.f32 %v189_v49, %v141_v14  ;;  %v55_v4 = vunpack.c.h.bf16 %v26_v53  ;;  %v56_v39 = vunpack.c.l.bf16 %v27_v27  ;;  %v155_v49 = vld [vmem:[%s1160_s2 + $0x68] sm:$0xff] }
  0x30   :  { %v276_v51 = vadd.f32 %v275_v35, %v1171_v54  ;;  %v1178_v52 = vmax.f32 %v784_v28, 0.0  ;;  %v1177_v20 = vmax.f32 %v786_v22, 0.0  ;;  %v57_v55 = vunpack.c.h.bf16 %v27_v27 }
  0x31   :  { %v252_v14 = vmax.f32 %v791_v9, 0.0  ;;  %v253_v57 = vmax.f32 %v793_v23, 0.0  ;;  %v102_v56 = vunpack.c.l.bf16 %v74_v19  ;;  %v103_v53 = vunpack.c.h.bf16 %v74_v19 }
  0x32   :  { %277 = vadd.xlane.f32.xlu0 %v276_v51  ;;  %v289_v35 = vadd.f32 %v1177_v20, %v1178_v52  ;;  %v104_v58 = vunpack.c.l.bf16 %v75_v50  ;;  %v105_v63 = vunpack.c.h.bf16 %v75_v50  ;;  %v182_v3 = vunpack.c.l.bf16 %v154_v36 }
  0x33   :  { %v134_v27 = vadd.f32 %v102_v56, %v54_v21  ;;  %v135_v15 = vadd.f32 %v103_v53, %v55_v4  ;;  %v183_v54 = vunpack.c.h.bf16 %v154_v36  ;;  %v184_v46 = vunpack.c.l.bf16 %v155_v49 }
  0x34   :  { %v290_v47 = vadd.f32 %v289_v35, %v252_v14  ;;  %v136_v38 = vadd.f32 %v104_v58, %v56_v39  ;;  %v137_v48 = vadd.f32 %v105_v63, %v57_v55  ;;  %v185_v45 = vunpack.c.h.bf16 %v155_v49 }
  0x35   :  { %v816_v19 = vadd.f32 %v182_v3, %v134_v27  ;;  %v818_v51 = vadd.f32 %v183_v54, %v135_v15  ;;  %v1179_v27 = vmax.f32 %v634_v26, 0.0 }
  0x36   :  { %v291_v20 = vadd.f32 %v290_v47, %v253_v57  ;;  %v822_v52 = vadd.f32 %v184_v46, %v136_v38  ;;  %v824_v50 = vadd.f32 %v185_v45, %v137_v48 }
  0x37   :  { %v246_v21 = vmax.f32 %v816_v19, 0.0  ;;  %v247_v4 = vmax.f32 %v818_v51, 0.0 }
  0x38   :  { %292 = vadd.xlane.f32.xlu1 %v291_v20  ;;  %v248_v39 = vmax.f32 %v822_v52, 0.0  ;;  %v249_v36 = vmax.f32 %v824_v50, 0.0 }
  0x39   :  { %v284_v54 = vadd.f32 %v247_v4, %v246_v21 }
  0x3b   :  { %v285_v38 = vadd.f32 %v284_v54, %v248_v39 }
  0x3d   :  { %v286_v45 = vadd.f32 %v285_v38, %v249_v36 }
  0x3f   :  { %287 = vadd.xlane.f32.xlu0 %v286_v45 }
  0x9e   :  { %v268_v48 = vpop.xlane.xlu1 %267 }
  0x9f   :  { %v296_v47 = vmul.f32 0.001953125, %v268_v48  ;;  %v1180_v48 = vmax.f32 %v639_v29, 0.0 }
  0xa1   :  { %v840_v46 = vsub.f32 %v230_v40, %v296_v47  ;;  %v844_v20 = vsub.f32 %v231_v41, %v296_v47  ;;  %v848_v56 = vsub.f32 %v232_v42, %v296_v47  ;;  %v876_v61 = vsub.f32 %v233_v43, %v296_v47 }
  0xa3   :  { %v342_v53 = vmul.f32 %v840_v46, %v840_v46  ;;  %v343_v32 = vmul.f32 %v844_v20, %v844_v20  ;;  %v344_v62 = vmul.f32 %v848_v56, %v848_v56  ;;  %v345_v43 = vmul.f32 %v876_v61, %v876_v61 }
  0xa4   :  { %v258_v55 = vpop.xlane.xlu0 %257 }
  0xa5   :  { %v294_v49 = vmul.f32 0.001953125, %v258_v55 }
  0xa7   :  { %v854_v35 = vsub.f32 %v222_v6, %v294_v49  ;;  %v858_v30 = vsub.f32 %v223_v7, %v294_v49  ;;  %v862_v31 = vsub.f32 %v224_v8, %v294_v49  ;;  %v868_v40 = vsub.f32 %v225_v10, %v294_v49 }
  0xa8   :  { %v376_v8 = vadd.f32 %v343_v32, %v342_v53  ;;  %v1182_v49 = vmax.f32 %v675_v12, 0.0  ;;  %v1183_v53 = vmax.f32 %v682_v17, 0.0 }
  0xa9   :  { %v334_v41 = vmul.f32 %v854_v35, %v854_v35  ;;  %v335_v42 = vmul.f32 %v858_v30, %v858_v30  ;;  %v336_v0 = vmul.f32 %v862_v31, %v862_v31  ;;  %v337_v10 = vmul.f32 %v868_v40, %v868_v40 }
  0xaa   :  { %v273_v60 = vpop.xlane.xlu1 %272  ;;  %v377_v3 = vadd.f32 %v376_v8, %v344_v62 }
  0xab   :  { %v297_v6 = vmul.f32 0.001953125, %v273_v60  ;;  %v366_v7 = vadd.f32 %v335_v42, %v334_v41  ;;  %v1184_v41 = vmax.f32 %v684_v18, 0.0  ;;  %v1185_v60 = vmax.f32 %v641_v34, 0.0 }
  0xac   :  { %v378_v45 = vadd.f32 %v377_v3, %v345_v43  ;;  %v1186_v43 = vmax.f32 %v708_v59, 0.0  ;;  %v1187_v34 = vmax.f32 %v713_v1, 0.0 }
  0xad   :  { %v367_v58 = vadd.f32 %v366_v7, %v336_v0  ;;  %v886_v63 = vsub.f32 %v234_v44, %v297_v6  ;;  %v892_v15 = vsub.f32 %v1179_v27, %v297_v6  ;;  %v896_v47 = vsub.f32 %v1180_v48, %v297_v6 }
  0xae   :  { %v1181_v44 = vmax.f32 %v673_v11, 0.0  ;;  %v924_v62 = vsub.f32 %v1185_v60, %v297_v6  ;;  %v1188_v27 = vmax.f32 %v715_v2, 0.0 }
  0xaf   :  { %v368_v33 = vadd.f32 %v367_v58, %v337_v10  ;;  %v346_v25 = vmul.f32 %v886_v63, %v886_v63  ;;  %v347_v29 = vmul.f32 %v892_v15, %v892_v15  ;;  %v348_v18 = vmul.f32 %v896_v47, %v896_v47 }
  0xb1   :  { %v263_v54 = vpop.xlane.xlu0 %262  ;;  %369 = vadd.xlane.f32.xlu0 %v368_v33  ;;  %v381_v8 = vadd.f32 %v347_v29, %v346_v25  ;;  %v1189_v25 = vmax.f32 %v722_v13, 0.0 }
  0xb2   :  { %v295_v38 = vmul.f32 0.001953125, %v263_v54 }
  0xb3   :  { %v382_v48 = vadd.f32 %v381_v8, %v348_v18  ;;  %v1193_v8 = vmax.f32 %v763_v37, 0.0  ;;  %v1194_v37 = vmax.f32 %v784_v28, 0.0 }
  0xb4   :  { %v902_v55 = vsub.f32 %v1181_v44, %v295_v38  ;;  %v906_v26 = vsub.f32 %v1182_v49, %v295_v38  ;;  %v910_v32 = vsub.f32 %v1183_v53, %v295_v38  ;;  %v916_v42 = vsub.f32 %v1184_v41, %v295_v38 }
  0xb5   :  { %379 = vadd.xlane.f32.xlu0 %v378_v45  ;;  %v349_v45 = vmul.f32 %v924_v62, %v924_v62 }
  0xb6   :  { %v338_v11 = vmul.f32 %v902_v55, %v902_v55  ;;  %v339_v12 = vmul.f32 %v906_v26, %v906_v26  ;;  %v340_v0 = vmul.f32 %v910_v32, %v910_v32  ;;  %v341_v58 = vmul.f32 %v916_v42, %v916_v42 }
  0xb7   :  { %v383_v41 = vadd.f32 %v382_v48, %v349_v45  ;;  %v1195_v45 = vmax.f32 %v786_v22, 0.0 }
  0xb8   :  { %v283_v17 = vpop.xlane.xlu1 %282  ;;  %v371_v7 = vadd.f32 %v339_v12, %v338_v11  ;;  %v1190_v12 = vmax.f32 %v746_v5, 0.0 }
  0xb9   :  { %v299_v10 = vmul.f32 0.001953125, %v283_v17  ;;  %v1191_v17 = vmax.f32 %v751_v16, 0.0 }
  0xba   :  { %v372_v33 = vadd.f32 %v371_v7, %v340_v0  ;;  %v1192_v7 = vmax.f32 %v753_v24, 0.0 }
  0xbb   :  { %v934_v3 = vsub.f32 %v1186_v43, %v299_v10  ;;  %v938_v6 = vsub.f32 %v1187_v34, %v299_v10  ;;  %v942_v54 = vsub.f32 %v1188_v27, %v299_v10  ;;  %v948_v44 = vsub.f32 %v1189_v25, %v299_v10 }
  0xbc   :  { %v373_v38 = vadd.f32 %v372_v33, %v341_v58 }
  0xbd   :  { %v354_v59 = vmul.f32 %v934_v3, %v934_v3  ;;  %v355_v1 = vmul.f32 %v938_v6, %v938_v6  ;;  %v356_v2 = vmul.f32 %v942_v54, %v942_v54  ;;  %v357_v11 = vmul.f32 %v948_v44, %v948_v44 }
  0xbe   :  { %374 = vadd.xlane.f32.xlu1 %v373_v38 }
  0xbf   :  { %v278_v49 = vpop.xlane.xlu0 %277  ;;  %v391_v53 = vadd.f32 %v355_v1, %v354_v59 }
  0xc0   :  { %v298_v29 = vmul.f32 0.001953125, %v278_v49 }
  0xc1   :  { %v392_v13 = vadd.f32 %v391_v53, %v356_v2 }
  0xc2   :  { %v960_v60 = vsub.f32 %v1190_v12, %v298_v29  ;;  %v964_v0 = vsub.f32 %v1191_v17, %v298_v29  ;;  %384 = vadd.xlane.f32.xlu1 %v383_v41  ;;  %v968_v18 = vsub.f32 %v1192_v7, %v298_v29  ;;  %v972_v10 = vsub.f32 %v1193_v8, %v298_v29 }
  0xc3   :  { %v393_v33 = vadd.f32 %v392_v13, %v357_v11 }
  0xc4   :  { %v350_v58 = vmul.f32 %v960_v60, %v960_v60  ;;  %v351_v5 = vmul.f32 %v964_v0, %v964_v0  ;;  %v352_v16 = vmul.f32 %v968_v18, %v968_v18  ;;  %v353_v24 = vmul.f32 %v972_v10, %v972_v10 }
  0xc5   :  { %v293_v43 = vpop.xlane.xlu1 %292 }
  0xc6   :  { %v301_v34 = vmul.f32 0.001953125, %v293_v43  ;;  %v386_v27 = vadd.f32 %v351_v5, %v350_v58  ;;  %394 = vadd.xlane.f32.xlu1 %v393_v33 }
  0xc8   :  { %v984_v38 = vsub.f32 %v1194_v37, %v301_v34  ;;  %v988_v48 = vsub.f32 %v1195_v45, %v301_v34  ;;  %v387_v25 = vadd.f32 %v386_v27, %v352_v16  ;;  %v992_v59 = vsub.f32 %v252_v14, %v301_v34 }
  0xc9   :  { %v996_v1 = vsub.f32 %v253_v57, %v301_v34 }
  0xca   :  { %v388_v2 = vadd.f32 %v387_v25, %v353_v24  ;;  %v362_v49 = vmul.f32 %v984_v38, %v984_v38  ;;  %v363_v28 = vmul.f32 %v988_v48, %v988_v48  ;;  %v364_v22 = vmul.f32 %v992_v59, %v992_v59 }
  0xcb   :  { %v365_v9 = vmul.f32 %v996_v1, %v996_v1 }
  0xcc   :  { %v288_v53 = vpop.xlane.xlu0 %287  ;;  %389 = vadd.xlane.f32.xlu0 %v388_v2  ;;  %v401_v14 = vadd.f32 %v363_v28, %v362_v49 }
  0xcd   :  { %v300_v29 = vmul.f32 0.001953125, %v288_v53 }
  0xce   :  { %v402_v23 = vadd.f32 %v401_v14, %v364_v22 }
  0xcf   :  { %v1008_v57 = vsub.f32 %v246_v21, %v300_v29  ;;  %v1012_v41 = vsub.f32 %v247_v4, %v300_v29  ;;  %v1016_v11 = vsub.f32 %v248_v39, %v300_v29  ;;  %v1020_v13 = vsub.f32 %v249_v36, %v300_v29 }
  0xd0   :  { %v403_v12 = vadd.f32 %v402_v23, %v365_v9 }
  0xd1   :  { %v358_v17 = vmul.f32 %v1008_v57, %v1008_v57  ;;  %v359_v19 = vmul.f32 %v1012_v41, %v1012_v41  ;;  %v360_v51 = vmul.f32 %v1016_v11, %v1016_v11  ;;  %v361_v52 = vmul.f32 %v1020_v13, %v1020_v13 }
  0xd2   :  { %404 = vadd.xlane.f32.xlu1 %v403_v12 }
  0xd3   :  { %v396_v21 = vadd.f32 %v359_v19, %v358_v17 }
  0xd5   :  { %v397_v4 = vadd.f32 %v396_v21, %v360_v51 }
  0xd7   :  { %v398_v39 = vadd.f32 %v397_v4, %v361_v52 }
  0xd9   :  { %399 = vadd.xlane.f32.xlu0 %v398_v39 }
 0x13e   :  { %v370_v50 = vpop.xlane.xlu0 %369 }
 0x13f   :  { %v406_v36 = vmul.f32 0.001953125, %v370_v50 }
 0x141   :  { %v414_v7 = vadd.f32 1e-05, %v406_v36 }
 0x142   :  { %v380_v8 = vpop.xlane.xlu0 %379 }
 0x143   :  { %498 = vrsqrt.f32 %v414_v7  ;;  %v408_v58 = vmul.f32 0.001953125, %v380_v8 }
 0x145   :  { %v416_v5 = vadd.f32 1e-05, %v408_v58 }
 0x147   :  { %500 = vrsqrt.f32 %v416_v5 }
 0x14b   :  { %v375_v16 = vpop.xlane.xlu1 %374 }
 0x14c   :  { %v407_v33 = vmul.f32 0.001953125, %v375_v16 }
 0x14d   :  { %v499_v43 = vpop.eup %498 }
 0x14e   :  { %v430_v34 = vmul.f32 %v499_v43, %v854_v35  ;;  %v431_v24 = vmul.f32 %v499_v43, %v858_v30  ;;  %v432_v27 = vmul.f32 %v499_v43, %v862_v31  ;;  %v433_v37 = vmul.f32 %v499_v43, %v868_v40 }
 0x14f   :  { %v415_v45 = vadd.f32 1e-05, %v407_v33  ;;  %v385_v25 = vpop.xlane.xlu1 %384 }
 0x150   :  { %462 = vst [vmem:[%s1161_s3] sm:$0xff] %v430_v34  ;;  %463 = vst [vmem:[%s1161_s3 + $0x8] sm:$0xff] %v431_v24  ;;  %v409_v35 = vmul.f32 0.001953125, %v385_v25 }
 0x151   :  { %464 = vst [vmem:[%s1161_s3 + $0x10] sm:$0xff] %v432_v27  ;;  %465 = vst [vmem:[%s1161_s3 + $0x18] sm:$0xff] %v433_v37  ;;  %v501_v30 = vpop.eup %500  ;;  %502 = vrsqrt.f32 %v415_v45 }
 0x152   :  { %v438_v31 = vmul.f32 %v501_v30, %v840_v46  ;;  %v439_v40 = vmul.f32 %v501_v30, %v844_v20  ;;  %v440_v2 = vmul.f32 %v501_v30, %v848_v56  ;;  %v441_v49 = vmul.f32 %v501_v30, %v876_v61 }
 0x153   :  { %v417_v28 = vadd.f32 1e-05, %v409_v35  ;;  %v395_v22 = vpop.xlane.xlu1 %394 }
 0x154   :  { %470 = vst [vmem:[%s1161_s3 + $0x40] sm:$0xff] %v438_v31  ;;  %471 = vst [vmem:[%s1161_s3 + $0x48] sm:$0xff] %v439_v40  ;;  %v411_v46 = vmul.f32 0.001953125, %v395_v22 }
 0x155   :  { %472 = vst [vmem:[%s1161_s3 + $0x50] sm:$0xff] %v440_v2  ;;  %473 = vst [vmem:[%s1161_s3 + $0x58] sm:$0xff] %v441_v49  ;;  %504 = vrsqrt.f32 %v417_v28 }
 0x156   :  { %v419_v20 = vadd.f32 1e-05, %v411_v46 }
 0x158   :  { %506 = vrsqrt.f32 %v419_v20 }
 0x159   :  { %v390_v56 = vpop.xlane.xlu0 %389 }
 0x15a   :  { %v410_v61 = vmul.f32 0.001953125, %v390_v56 }
 0x15b   :  { %v503_v53 = vpop.eup %502 }
 0x15c   :  { %v434_v9 = vmul.f32 %v503_v53, %v902_v55  ;;  %v435_v14 = vmul.f32 %v503_v53, %v906_v26  ;;  %v436_v29 = vmul.f32 %v503_v53, %v910_v32  ;;  %v437_v23 = vmul.f32 %v503_v53, %v916_v42 }
 0x15d   :  { %v418_v12 = vadd.f32 1e-05, %v410_v61 }
 0x15e   :  { %466 = vst [vmem:[%s1161_s3 + $0x20] sm:$0xff] %v434_v9  ;;  %467 = vst [vmem:[%s1161_s3 + $0x28] sm:$0xff] %v435_v14 }
 0x15f   :  { %468 = vst [vmem:[%s1161_s3 + $0x30] sm:$0xff] %v436_v29  ;;  %469 = vst [vmem:[%s1161_s3 + $0x38] sm:$0xff] %v437_v23  ;;  %v505_v55 = vpop.eup %504  ;;  %508 = vrsqrt.f32 %v418_v12  ;;  %v405_v26 = vpop.xlane.xlu1 %404 }
 0x160   :  { %v442_v32 = vmul.f32 %v505_v55, %v886_v63  ;;  %v443_v42 = vmul.f32 %v505_v55, %v892_v15  ;;  %v444_v17 = vmul.f32 %v505_v55, %v896_v47  ;;  %v445_v19 = vmul.f32 %v505_v55, %v924_v62 }
 0x161   :  { %v413_v51 = vmul.f32 0.001953125, %v405_v26 }
 0x162   :  { %v507_v52 = vpop.eup %506  ;;  %474 = vst [vmem:[%s1161_s3 + $0x60] sm:$0xff] %v442_v32  ;;  %475 = vst [vmem:[%s1161_s3 + $0x68] sm:$0xff] %v443_v42 }
 0x163   :  { %476 = vst [vmem:[%s1161_s3 + $0x70] sm:$0xff] %v444_v17  ;;  %477 = vst [vmem:[%s1161_s3 + $0x78] sm:$0xff] %v445_v19  ;;  %v450_v63 = vmul.f32 %v507_v52, %v934_v3  ;;  %v451_v15 = vmul.f32 %v507_v52, %v938_v6  ;;  %v452_v47 = vmul.f32 %v507_v52, %v942_v54  ;;  %v421_v21 = vadd.f32 1e-05, %v413_v51 }
 0x164   :  { %v453_v62 = vmul.f32 %v507_v52, %v948_v44 }
 0x165   :  { %482 = vst [vmem:[%s1161_s3 + $0xa0] sm:$0xff] %v450_v63  ;;  %483 = vst [vmem:[%s1161_s3 + $0xa8] sm:$0xff] %v451_v15  ;;  %510 = vrsqrt.f32 %v421_v21 }
 0x166   :  { %484 = vst [vmem:[%s1161_s3 + $0xb0] sm:$0xff] %v452_v47  ;;  %485 = vst [vmem:[%s1161_s3 + $0xb8] sm:$0xff] %v453_v62  ;;  %v400_v3 = vpop.xlane.xlu0 %399 }
 0x167   :  { %v412_v6 = vmul.f32 0.001953125, %v400_v3 }
 0x169   :  { %v509_v54 = vpop.eup %508  ;;  %v420_v44 = vadd.f32 1e-05, %v412_v6 }
 0x16a   :  { %v446_v4 = vmul.f32 %v509_v54, %v960_v60  ;;  %v447_v39 = vmul.f32 %v509_v54, %v964_v0  ;;  %v448_v50 = vmul.f32 %v509_v54, %v968_v18  ;;  %v449_v36 = vmul.f32 %v509_v54, %v972_v10 }
 0x16b   :  { %512 = vrsqrt.f32 %v420_v44 }
 0x16c   :  { %478 = vst [vmem:[%s1161_s3 + $0x80] sm:$0xff] %v446_v4  ;;  %479 = vst [vmem:[%s1161_s3 + $0x88] sm:$0xff] %v447_v39 }
 0x16d   :  { %480 = vst [vmem:[%s1161_s3 + $0x90] sm:$0xff] %v448_v50  ;;  %481 = vst [vmem:[%s1161_s3 + $0x98] sm:$0xff] %v449_v36 }
 0x16f   :  { %v511_v60 = vpop.eup %510 }
 0x170   :  { %v458_v0 = vmul.f32 %v511_v60, %v984_v38  ;;  %v459_v18 = vmul.f32 %v511_v60, %v988_v48  ;;  %v460_v10 = vmul.f32 %v511_v60, %v992_v59  ;;  %v461_v7 = vmul.f32 %v511_v60, %v996_v1 }
 0x172   :  { %490 = vst [vmem:[%s1161_s3 + $0xe0] sm:$0xff] %v458_v0  ;;  %491 = vst [vmem:[%s1161_s3 + $0xe8] sm:$0xff] %v459_v18 }
 0x173   :  { %492 = vst [vmem:[%s1161_s3 + $0xf0] sm:$0xff] %v460_v10  ;;  %493 = vst [vmem:[%s1161_s3 + $0xf8] sm:$0xff] %v461_v7 }
 0x175   :  { %v513_v38 = vpop.eup %512 }
 0x176   :  { %v454_v48 = vmul.f32 %v513_v38, %v1008_v57  ;;  %v455_v59 = vmul.f32 %v513_v38, %v1012_v41  ;;  %v456_v1 = vmul.f32 %v513_v38, %v1016_v11  ;;  %v457_v8 = vmul.f32 %v513_v38, %v1020_v13 }
 0x178   :  { %486 = vst [vmem:[%s1161_s3 + $0xc0] sm:$0xff] %v454_v48  ;;  %487 = vst [vmem:[%s1161_s3 + $0xc8] sm:$0xff] %v455_v59 }
 0x179   :  { %488 = vst [vmem:[%s1161_s3 + $0xd0] sm:$0xff] %v456_v1  ;;  %489 = vst [vmem:[%s1161_s3 + $0xd8] sm:$0xff] %v457_v8 }

// kernel: dcblock_fwd.8
= control target key start
LH: loop header
LB: loop body
LE: loop exit
PB: predicated region body
PF: predicated region fallthrough
CT: control target
= control target key end

     0   :  { %v789_v1 = vmov 0   ;;  %vm132_vm0 = vcmask 130048   ;;  %s1173_s0 = inlined_call_operand.vmem [shape: bf16[1,16,512], index: 0, kind: input, shape index: {}]   ;;  %s1174_s1 = inlined_call_operand.vmem [shape: bf16[1,64,16], index: 1, kind: input, shape index: {}]   ;;  %s1175_s2 = inlined_call_operand.vmem [shape: bf16[64,512], index: 2, kind: output, shape index: {}]  }
   0x1   :  { %v763_v0 = vld [vmem:[%s1173_s0 + $0x4] ss:$16 sps:$4 sm:$0xff]   ;;  %177 = vmatprep.mubr.bf16.mxu0 %v789_v1  ;;  %250 = vmatprep.mubr.bf16.mxu1 %v789_v1  ;;  %v765_v2 = vld [vmem:[%s1173_s0 + $0xc] ss:$16 sps:$4 sm:$0xff]   ;;  %v767_v3 = vld [vmem:[%s1173_s0] ss:$16 sps:$4 sm:$0xff]  }
   0x2   :  { %145 = vmatprep.subr.bf16.mxu0 %v763_v0  ;;  %v768_v4 = vld [vmem:[%s1173_s0 + $0x8] ss:$16 sps:$4 sm:$0xff]   ;;  %218 = vmatprep.subr.bf16.mxu1 %v765_v2  ;;  %v769_v5 = vld [vmem:[%s1174_s1] sm:$0xff]   ;;  %v771_v7 = vld [vmem:[%s1174_s1 + $0x10] sm:$0xff]  }
   0x3   :  { %146 = vmatpush1.bf16.msra.mxu0 %v767_v3  ;;  %219 = vmatpush1.bf16.msra.mxu1 %v768_v4  ;;  %v770_v6 = vld [vmem:[%s1174_s1 + $0x8] sm:$0xff]   ;;  %v772_v8 = vld [vmem:[%s1174_s1 + $0x18] sm:$0xff]  }
   0x6   :  { %722 = vmatmul.mubr.msk.bf16.vlgmr.msra.gmra.mrb[0].mxu0 %vm132_vm0, %v769_v5  ;;  %726 = vmatmul.mubr.msk.bf16.vlgmr.msra.gmra.mrb[0].mxu1 %vm132_vm0, %v769_v5 }
   0x7   :  { %187 = vmatprep.mubr.bf16.mxu0 %v789_v1  ;;  %260 = vmatprep.mubr.bf16.mxu1 %v789_v1 }
   0xe   :  { %723 = vmatmul.mubr.msk.bf16.gmra.mrb[4].mxu0 %vm132_vm0, %v770_v6  ;;  %727 = vmatmul.mubr.msk.bf16.gmra.mrb[4].mxu1 %vm132_vm0, %v770_v6 }
   0xf   :  { %197 = vmatprep.mubr.bf16.mxu0 %v789_v1  ;;  %270 = vmatprep.mubr.bf16.mxu1 %v789_v1 }
  0x16   :  { %724 = vmatmul.mubr.msk.bf16.gmra.mrb[8].mxu0 %vm132_vm0, %v771_v7  ;;  %728 = vmatmul.mubr.msk.bf16.gmra.mrb[8].mxu1 %vm132_vm0, %v771_v7 }
  0x17   :  { %207 = vmatprep.mubr.bf16.mxu0 %v789_v1  ;;  %280 = vmatprep.mubr.bf16.mxu1 %v789_v1 }
  0x1e   :  { %725 = vmatmul.mubr.msk.bf16.gmra.mrb[12].mxu0 %vm132_vm0, %v772_v8  ;;  %729 = vmatmul.mubr.msk.bf16.gmra.mrb[12].mxu1 %vm132_vm0, %v772_v8 }
  0xd9   :  { %v837_v9 = vpop.f32.mrb[0].mxu0  ;;  %v839_v10 = vpop.f32.mrb[0].mxu1 }
  0xda   :  { %v841_v11 = vpop.f32.mrb[1].mxu0  ;;  %v843_v12 = vpop.f32.mrb[1].mxu1 }
  0xdb   :  { %v390_v13 = vadd.f32 %v841_v11, %v837_v9  ;;  %v847_v14 = vpop.f32.mrb[2].mxu0  ;;  %v849_v15 = vpop.f32.mrb[2].mxu1 }
  0xdc   :  { %v851_v16 = vpop.f32.mrb[3].mxu0  ;;  %v853_v17 = vpop.f32.mrb[3].mxu1 }
  0xdd   :  { %v395_v18 = vadd.f32 %v851_v16, %v847_v14  ;;  %v391_v19 = vadd.f32 %v390_v13, %v839_v10 }
  0xdf   :  { %v392_v20 = vadd.f32 %v391_v19, %v843_v12  ;;  %v396_v21 = vadd.f32 %v395_v18, %v849_v15 }
  0xe1   :  { %v860_v22 = vpop.f32.mrb[4].mxu1  ;;  %393 = vadd.xlane.f32.xlu0 %v392_v20  ;;  %v862_v23 = vpop.f32.mrb[4].mxu0  ;;  %v397_v24 = vadd.f32 %v396_v21, %v853_v17 }
  0xe2   :  { %v865_v25 = vpop.f32.mrb[5].mxu0  ;;  %v867_v26 = vpop.f32.mrb[5].mxu1 }
  0xe3   :  { %v400_v27 = vadd.f32 %v865_v25, %v862_v23  ;;  %v871_v28 = vpop.f32.mrb[6].mxu0  ;;  %v873_v29 = vpop.f32.mrb[6].mxu1 }
  0xe4   :  { %v875_v30 = vpop.f32.mrb[7].mxu0  ;;  %v877_v31 = vpop.f32.mrb[7].mxu1 }
  0xe5   :  { %v405_v32 = vadd.f32 %v875_v30, %v871_v28  ;;  %398 = vadd.xlane.f32.xlu0 %v397_v24  ;;  %v401_v33 = vadd.f32 %v400_v27, %v860_v22 }
  0xe7   :  { %v402_v34 = vadd.f32 %v401_v33, %v867_v26  ;;  %v406_v35 = vadd.f32 %v405_v32, %v873_v29 }
  0xe9   :  { %v884_v36 = vpop.f32.mrb[8].mxu1  ;;  %403 = vadd.xlane.f32.xlu1 %v402_v34  ;;  %v886_v37 = vpop.f32.mrb[8].mxu0  ;;  %v407_v38 = vadd.f32 %v406_v35, %v877_v31 }
  0xea   :  { %v889_v39 = vpop.f32.mrb[9].mxu0  ;;  %v891_v40 = vpop.f32.mrb[9].mxu1 }
  0xeb   :  { %v410_v41 = vadd.f32 %v889_v39, %v886_v37  ;;  %v895_v42 = vpop.f32.mrb[10].mxu0  ;;  %v897_v43 = vpop.f32.mrb[10].mxu1 }
  0xec   :  { %v899_v44 = vpop.f32.mrb[11].mxu0  ;;  %v901_v45 = vpop.f32.mrb[11].mxu1 }
  0xed   :  { %v415_v46 = vadd.f32 %v899_v44, %v895_v42  ;;  %408 = vadd.xlane.f32.xlu1 %v407_v38  ;;  %v411_v47 = vadd.f32 %v410_v41, %v884_v36 }
  0xef   :  { %v412_v48 = vadd.f32 %v411_v47, %v891_v40  ;;  %v416_v49 = vadd.f32 %v415_v46, %v897_v43 }
  0xf1   :  { %v908_v50 = vpop.f32.mrb[12].mxu1  ;;  %413 = vadd.xlane.f32.xlu0 %v412_v48  ;;  %v910_v51 = vpop.f32.mrb[12].mxu0  ;;  %v417_v52 = vadd.f32 %v416_v49, %v901_v45 }
  0xf2   :  { %v913_v53 = vpop.f32.mrb[13].mxu0  ;;  %v915_v54 = vpop.f32.mrb[13].mxu1 }
  0xf3   :  { %v420_v55 = vadd.f32 %v913_v53, %v910_v51  ;;  %v919_v56 = vpop.f32.mrb[14].mxu1  ;;  %418 = vadd.xlane.f32.xlu1 %v417_v52  ;;  %v921_v57 = vpop.f32.mrb[14].mxu0 }
  0xf4   :  { %v923_v58 = vpop.f32.mrb[15].mxu0  ;;  %v925_v59 = vpop.f32.mrb[15].mxu1 }
  0xf5   :  { %v425_v60 = vadd.f32 %v923_v58, %v921_v57  ;;  %v421_v61 = vadd.f32 %v420_v55, %v908_v50 }
  0xf7   :  { %v426_v62 = vadd.f32 %v425_v60, %v919_v56  ;;  %v422_v63 = vadd.f32 %v421_v61, %v915_v54 }
  0xf9   :  { %v427_v0 = vadd.f32 %v426_v62, %v925_v59  ;;  %423 = vadd.xlane.f32.xlu0 %v422_v63 }
  0xfb   :  { %428 = vadd.xlane.f32.xlu1 %v427_v0 }
 0x16e   :  { %v394_v1 = vpop.xlane.xlu0 %393 }
 0x16f   :  { %v430_v2 = vmul.f32 0.001953125, %v394_v1 }
 0x171   :  { %v934_v3 = vsub.f32 %v837_v9, %v430_v2  ;;  %v937_v4 = vsub.f32 %v841_v11, %v430_v2  ;;  %v940_v5 = vsub.f32 %v839_v10, %v430_v2  ;;  %v943_v7 = vsub.f32 %v843_v12, %v430_v2 }
 0x172   :  { %v399_v6 = vpop.xlane.xlu0 %398 }
 0x173   :  { %v431_v8 = vmul.f32 0.001953125, %v399_v6  ;;  %v470_v13 = vmul.f32 %v934_v3, %v934_v3  ;;  %v471_v18 = vmul.f32 %v937_v4, %v937_v4  ;;  %v472_v9 = vmul.f32 %v940_v5, %v940_v5 }
 0x174   :  { %v473_v21 = vmul.f32 %v943_v7, %v943_v7 }
 0x175   :  { %v952_v11 = vsub.f32 %v847_v14, %v431_v8  ;;  %v955_v10 = vsub.f32 %v851_v16, %v431_v8  ;;  %v502_v19 = vadd.f32 %v471_v18, %v470_v13  ;;  %v958_v12 = vsub.f32 %v849_v15, %v431_v8 }
 0x176   :  { %v404_v20 = vpop.xlane.xlu1 %403  ;;  %v963_v24 = vsub.f32 %v853_v17, %v431_v8 }
 0x177   :  { %v432_v27 = vmul.f32 0.001953125, %v404_v20  ;;  %v503_v32 = vadd.f32 %v502_v19, %v472_v9  ;;  %v474_v14 = vmul.f32 %v952_v11, %v952_v11  ;;  %v475_v16 = vmul.f32 %v955_v10, %v955_v10 }
 0x178   :  { %v476_v33 = vmul.f32 %v958_v12, %v958_v12  ;;  %v477_v41 = vmul.f32 %v963_v24, %v963_v24 }
 0x179   :  { %v972_v15 = vsub.f32 %v862_v23, %v432_v27  ;;  %v975_v34 = vsub.f32 %v865_v25, %v432_v27  ;;  %v504_v35 = vadd.f32 %v503_v32, %v473_v21  ;;  %v507_v17 = vadd.f32 %v475_v16, %v474_v14 }
 0x17a   :  { %v409_v38 = vpop.xlane.xlu1 %408  ;;  %v980_v46 = vsub.f32 %v860_v22, %v432_v27  ;;  %v983_v47 = vsub.f32 %v867_v26, %v432_v27 }
 0x17b   :  { %v433_v48 = vmul.f32 0.001953125, %v409_v38  ;;  %505 = vadd.xlane.f32.xlu0 %v504_v35  ;;  %v508_v49 = vadd.f32 %v507_v17, %v476_v33  ;;  %v478_v23 = vmul.f32 %v972_v15, %v972_v15  ;;  %v479_v25 = vmul.f32 %v975_v34, %v975_v34 }
 0x17c   :  { %v480_v52 = vmul.f32 %v980_v46, %v980_v46  ;;  %v481_v62 = vmul.f32 %v983_v47, %v983_v47 }
 0x17d   :  { %v992_v55 = vsub.f32 %v871_v28, %v433_v48  ;;  %v995_v22 = vsub.f32 %v875_v30, %v433_v48  ;;  %v509_v26 = vadd.f32 %v508_v49, %v477_v41  ;;  %v512_v60 = vadd.f32 %v479_v25, %v478_v23 }
 0x17e   :  { %v414_v61 = vpop.xlane.xlu0 %413  ;;  %v1000_v63 = vsub.f32 %v873_v29, %v433_v48  ;;  %v1007_v6 = vsub.f32 %v877_v31, %v433_v48 }
 0x17f   :  { %v434_v0 = vmul.f32 0.001953125, %v414_v61  ;;  %510 = vadd.xlane.f32.xlu1 %v509_v26  ;;  %v513_v1 = vadd.f32 %v512_v60, %v480_v52  ;;  %v482_v2 = vmul.f32 %v992_v55, %v992_v55  ;;  %v483_v28 = vmul.f32 %v995_v22, %v995_v22 }
 0x180   :  { %v419_v30 = vpop.xlane.xlu1 %418  ;;  %v484_v9 = vmul.f32 %v1000_v63, %v1000_v63 }
 0x181   :  { %v1010_v8 = vsub.f32 %v886_v37, %v434_v0  ;;  %v1013_v13 = vsub.f32 %v889_v39, %v434_v0  ;;  %v435_v29 = vmul.f32 0.001953125, %v419_v30  ;;  %v514_v18 = vadd.f32 %v513_v1, %v481_v62 }
 0x182   :  { %v517_v19 = vadd.f32 %v483_v28, %v482_v2  ;;  %v1018_v20 = vsub.f32 %v884_v36, %v434_v0  ;;  %v1021_v21 = vsub.f32 %v891_v40, %v434_v0  ;;  %v485_v36 = vmul.f32 %v1007_v6, %v1007_v6 }
 0x183   :  { %v1024_v31 = vsub.f32 %v895_v42, %v435_v29  ;;  %v1027_v37 = vsub.f32 %v899_v44, %v435_v29  ;;  %515 = vadd.xlane.f32.xlu0 %v514_v18  ;;  %v486_v39 = vmul.f32 %v1010_v8, %v1010_v8  ;;  %v487_v27 = vmul.f32 %v1013_v13, %v1013_v13 }
 0x184   :  { %v518_v32 = vadd.f32 %v517_v19, %v484_v9  ;;  %v1036_v40 = vsub.f32 %v897_v43, %v435_v29  ;;  %v488_v42 = vmul.f32 %v1018_v20, %v1018_v20  ;;  %v1045_v17 = vsub.f32 %v901_v45, %v435_v29 }
 0x185   :  { %v522_v14 = vadd.f32 %v487_v27, %v486_v39  ;;  %v490_v44 = vmul.f32 %v1024_v31, %v1024_v31  ;;  %v491_v16 = vmul.f32 %v1027_v37, %v1027_v37  ;;  %v489_v43 = vmul.f32 %v1021_v21, %v1021_v21 }
 0x186   :  { %v424_v33 = vpop.xlane.xlu0 %423  ;;  %v519_v35 = vadd.f32 %v518_v32, %v485_v36  ;;  %v492_v23 = vmul.f32 %v1036_v40, %v1036_v40  ;;  %v493_v60 = vmul.f32 %v1045_v17, %v1045_v17 }
 0x187   :  { %v436_v38 = vmul.f32 0.001953125, %v424_v33  ;;  %v523_v41 = vadd.f32 %v522_v14, %v488_v42  ;;  %v527_v48 = vadd.f32 %v491_v16, %v490_v44 }
 0x188   :  { %520 = vadd.xlane.f32.xlu1 %v519_v35  ;;  %v429_v49 = vpop.xlane.xlu1 %428 }
 0x189   :  { %v1052_v25 = vsub.f32 %v910_v51, %v436_v38  ;;  %v1055_v52 = vsub.f32 %v913_v53, %v436_v38  ;;  %v437_v26 = vmul.f32 0.001953125, %v429_v49  ;;  %v524_v45 = vadd.f32 %v523_v41, %v489_v43 }
 0x18a   :  { %v528_v61 = vadd.f32 %v527_v48, %v492_v23  ;;  %v1060_v62 = vsub.f32 %v908_v50, %v436_v38  ;;  %v1063_v0 = vsub.f32 %v915_v54, %v436_v38 }
 0x18b   :  { %v1066_v1 = vsub.f32 %v921_v57, %v437_v26  ;;  %v1069_v51 = vsub.f32 %v923_v58, %v437_v26  ;;  %525 = vadd.xlane.f32.xlu0 %v524_v45  ;;  %v494_v53 = vmul.f32 %v1052_v25, %v1052_v25  ;;  %v495_v2 = vmul.f32 %v1055_v52, %v1055_v52 }
 0x18c   :  { %v529_v28 = vadd.f32 %v528_v61, %v493_v60  ;;  %v496_v50 = vmul.f32 %v1060_v62, %v1060_v62  ;;  %v1078_v54 = vsub.f32 %v919_v56, %v437_v26  ;;  %v1081_v57 = vsub.f32 %v925_v59, %v437_v26 }
 0x18d   :  { %v532_v30 = vadd.f32 %v495_v2, %v494_v53  ;;  %v498_v58 = vmul.f32 %v1066_v1, %v1066_v1  ;;  %v499_v29 = vmul.f32 %v1069_v51, %v1069_v51  ;;  %v497_v18 = vmul.f32 %v1063_v0, %v1063_v0 }
 0x18e   :  { %530 = vadd.xlane.f32.xlu1 %v529_v28  ;;  %v500_v19 = vmul.f32 %v1078_v54, %v1078_v54  ;;  %v501_v59 = vmul.f32 %v1081_v57, %v1081_v57 }
 0x18f   :  { %v533_v9 = vadd.f32 %v532_v30, %v496_v50  ;;  %v537_v56 = vadd.f32 %v499_v29, %v498_v58 }
 0x191   :  { %v534_v39 = vadd.f32 %v533_v9, %v497_v18  ;;  %v538_v27 = vadd.f32 %v537_v56, %v500_v19 }
 0x193   :  { %535 = vadd.xlane.f32.xlu0 %v534_v39  ;;  %v539_v36 = vadd.f32 %v538_v27, %v501_v59 }
 0x195   :  { %540 = vadd.xlane.f32.xlu1 %v539_v36 }
 0x208   :  { %v506_v32 = vpop.xlane.xlu0 %505 }
 0x209   :  { %v542_v42 = vmul.f32 0.001953125, %v506_v32 }
 0x20b   :  { %v550_v14 = vadd.f32 1e-05, %v542_v42 }
 0x20c   :  { %v511_v44 = vpop.xlane.xlu1 %510 }
 0x20d   :  { %773 = vrsqrt.f32 %v550_v14  ;;  %v543_v16 = vmul.f32 0.001953125, %v511_v44 }
 0x20f   :  { %v551_v33 = vadd.f32 1e-05, %v543_v16 }
 0x210   :  { %v516_v35 = vpop.xlane.xlu0 %515 }
 0x211   :  { %775 = vrsqrt.f32 %v551_v33  ;;  %v544_v38 = vmul.f32 0.001953125, %v516_v35 }
 0x213   :  { %v552_v43 = vadd.f32 1e-05, %v544_v38 }
 0x215   :  { %777 = vrsqrt.f32 %v552_v43  ;;  %v521_v41 = vpop.xlane.xlu1 %520 }
 0x216   :  { %v545_v48 = vmul.f32 0.001953125, %v521_v41 }
 0x217   :  { %v774_v49 = vpop.eup %773 }
 0x218   :  { %v566_v23 = vmul.f32 %v774_v49, %v934_v3  ;;  %v567_v26 = vmul.f32 %v774_v49, %v937_v4  ;;  %v568_v45 = vmul.f32 %v774_v49, %v940_v5  ;;  %v569_v60 = vmul.f32 %v774_v49, %v943_v7  ;;  %v526_v61 = vpop.xlane.xlu0 %525 }
 0x219   :  { %v553_v53 = vadd.f32 1e-05, %v545_v48  ;;  %v546_v2 = vmul.f32 0.001953125, %v526_v61 }
 0x21a   :  { %v746_v28 = vpack.c.bf16 %v567_v26, %v566_v23  ;;  %v747_v50 = vpack.c.bf16 %v569_v60, %v568_v45 }
 0x21b   :  { %v776_v30 = vpop.eup %775  ;;  %779 = vrsqrt.f32 %v553_v53  ;;  %v554_v58 = vadd.f32 1e-05, %v546_v2  ;;  %v531_v29 = vpop.xlane.xlu1 %530 }
 0x21c   :  { %694 = vst [vmem:[%s1175_s2] sm:$0xff] %v746_v28  ;;  %695 = vst [vmem:[%s1175_s2 + $0x8] sm:$0xff] %v747_v50  ;;  %v570_v3 = vmul.f32 %v776_v30, %v952_v11  ;;  %v571_v4 = vmul.f32 %v776_v30, %v955_v10  ;;  %v572_v5 = vmul.f32 %v776_v30, %v958_v12  ;;  %v547_v18 = vmul.f32 0.001953125, %v531_v29 }
 0x21d   :  { %v573_v7 = vmul.f32 %v776_v30, %v963_v24  ;;  %781 = vrsqrt.f32 %v554_v58 }
 0x21e   :  { %v748_v9 = vpack.c.bf16 %v571_v4, %v570_v3  ;;  %v555_v39 = vadd.f32 1e-05, %v547_v18 }
 0x21f   :  { %v749_v19 = vpack.c.bf16 %v573_v7, %v572_v5  ;;  %v778_v56 = vpop.eup %777 }
 0x220   :  { %696 = vst [vmem:[%s1175_s2 + $0x10] sm:$0xff] %v748_v9  ;;  %v574_v11 = vmul.f32 %v778_v56, %v972_v15  ;;  %v575_v10 = vmul.f32 %v778_v56, %v975_v34  ;;  %v576_v12 = vmul.f32 %v778_v56, %v980_v46  ;;  %v577_v24 = vmul.f32 %v778_v56, %v983_v47  ;;  %v536_v59 = vpop.xlane.xlu0 %535 }
 0x221   :  { %697 = vst [vmem:[%s1175_s2 + $0x18] sm:$0xff] %v749_v19  ;;  %783 = vrsqrt.f32 %v555_v39  ;;  %v548_v27 = vmul.f32 0.001953125, %v536_v59 }
 0x222   :  { %v750_v36 = vpack.c.bf16 %v575_v10, %v574_v11  ;;  %v751_v32 = vpack.c.bf16 %v577_v24, %v576_v12  ;;  %v541_v42 = vpop.xlane.xlu1 %540 }
 0x223   :  { %v556_v14 = vadd.f32 1e-05, %v548_v27  ;;  %v549_v44 = vmul.f32 0.001953125, %v541_v42 }
 0x224   :  { %698 = vst [vmem:[%s1175_s2 + $0x20] sm:$0xff] %v750_v36  ;;  %699 = vst [vmem:[%s1175_s2 + $0x28] sm:$0xff] %v751_v32 }
 0x225   :  { %v780_v15 = vpop.eup %779  ;;  %785 = vrsqrt.f32 %v556_v14  ;;  %v557_v34 = vadd.f32 1e-05, %v549_v44 }
 0x226   :  { %v578_v46 = vmul.f32 %v780_v15, %v992_v55  ;;  %v579_v47 = vmul.f32 %v780_v15, %v995_v22  ;;  %v580_v16 = vmul.f32 %v780_v15, %v1000_v63  ;;  %v581_v33 = vmul.f32 %v780_v15, %v1007_v6 }
 0x227   :  { %v782_v35 = vpop.eup %781  ;;  %787 = vrsqrt.f32 %v557_v34 }
 0x228   :  { %v752_v38 = vpack.c.bf16 %v579_v47, %v578_v46  ;;  %v753_v43 = vpack.c.bf16 %v581_v33, %v580_v16  ;;  %v582_v41 = vmul.f32 %v782_v35, %v1010_v8  ;;  %v583_v48 = vmul.f32 %v782_v35, %v1013_v13 }
 0x229   :  { %v584_v49 = vmul.f32 %v782_v35, %v1018_v20  ;;  %v585_v23 = vmul.f32 %v782_v35, %v1021_v21 }
 0x22a   :  { %700 = vst [vmem:[%s1175_s2 + $0x30] sm:$0xff] %v752_v38  ;;  %701 = vst [vmem:[%s1175_s2 + $0x38] sm:$0xff] %v753_v43  ;;  %v754_v55 = vpack.c.bf16 %v583_v48, %v582_v41 }
 0x22b   :  { %v784_v22 = vpop.eup %783  ;;  %v755_v63 = vpack.c.bf16 %v585_v23, %v584_v49 }
 0x22c   :  { %702 = vst [vmem:[%s1175_s2 + $0x40] sm:$0xff] %v754_v55  ;;  %v586_v6 = vmul.f32 %v784_v22, %v1024_v31  ;;  %v587_v8 = vmul.f32 %v784_v22, %v1027_v37  ;;  %v588_v13 = vmul.f32 %v784_v22, %v1036_v40  ;;  %v589_v20 = vmul.f32 %v784_v22, %v1045_v17 }
 0x22d   :  { %703 = vst [vmem:[%s1175_s2 + $0x48] sm:$0xff] %v755_v63 }
 0x22e   :  { %v756_v21 = vpack.c.bf16 %v587_v8, %v586_v6  ;;  %v757_v26 = vpack.c.bf16 %v589_v20, %v588_v13 }
 0x22f   :  { %v786_v45 = vpop.eup %785 }
 0x230   :  { %704 = vst [vmem:[%s1175_s2 + $0x50] sm:$0xff] %v756_v21  ;;  %705 = vst [vmem:[%s1175_s2 + $0x58] sm:$0xff] %v757_v26  ;;  %v590_v31 = vmul.f32 %v786_v45, %v1052_v25  ;;  %v591_v37 = vmul.f32 %v786_v45, %v1055_v52  ;;  %v592_v40 = vmul.f32 %v786_v45, %v1060_v62 }
 0x231   :  { %v593_v17 = vmul.f32 %v786_v45, %v1063_v0  ;;  %v788_v60 = vpop.eup %787 }
 0x232   :  { %v758_v61 = vpack.c.bf16 %v591_v37, %v590_v31  ;;  %v594_v2 = vmul.f32 %v788_v60, %v1066_v1  ;;  %v595_v28 = vmul.f32 %v788_v60, %v1069_v51  ;;  %v596_v50 = vmul.f32 %v788_v60, %v1078_v54 }
 0x233   :  { %v759_v53 = vpack.c.bf16 %v593_v17, %v592_v40  ;;  %v597_v30 = vmul.f32 %v788_v60, %v1081_v57 }
 0x234   :  { %706 = vst [vmem:[%s1175_s2 + $0x60] sm:$0xff] %v758_v61  ;;  %v760_v25 = vpack.c.bf16 %v595_v28, %v594_v2 }
 0x235   :  { %707 = vst [vmem:[%s1175_s2 + $0x68] sm:$0xff] %v759_v53  ;;  %v761_v52 = vpack.c.bf16 %v597_v30, %v596_v50 }
 0x236   :  { %708 = vst [vmem:[%s1175_s2 + $0x70] sm:$0xff] %v760_v25 }
 0x237   :  { %709 = vst [vmem:[%s1175_s2 + $0x78] sm:$0xff] %v761_v52 }

</bundles_post_ra>
